<compile_context>
chip_gen: v5e
topology: v5e:2x2
jax: 0.10.0
libtpu: 0.0.40
codegen_flags: <defaults>
</compile_context>

<pallas_src>
import math

import jax
import jax.numpy as jnp
from jax.experimental import pallas as pl
from jax.experimental.pallas import tpu as pltpu

EPS = 1e-5
NEG_SLOPE = 0.2
KS = 4          # conv kernel size
ST = 2          # conv stride
OCP = 128       # final conv's single output channel, padded for a lane-dense store


def _out(s):
    return (s - KS) // ST + 1


def _pad8(x):
    return ((x + 7) // 8) * 8


# ------------------------------ Pallas kernel -------------------------------

def _make_kernel(n, c1, c2, oh1, ow1, ow1p, oh2, ow2, ow2p, oh3, ow3, ow3p):
    k2, k3 = 16 * c1, 16 * c2
    m2, m3 = n * oh2 * ow2p, n * oh3 * ow3p

    def bn_lrelu(y, gamma, beta, owp, owv, count):
        # BatchNorm2d, training mode (biased variance), stats over the VALID rows
        # only: rows with (row % OW_padded) >= OW_valid are zero padding.
        rows = y.shape[0]
        r = jax.lax.broadcasted_iota(jnp.int32, (rows, 1), 0)
        valid = (r % owp) < owv
        inv_n = 1.0 / float(count)
        mean = jnp.sum(jnp.where(valid, y, 0.0), axis=0, keepdims=True) * inv_n
        yc = jnp.where(valid, y - mean, 0.0)
        var = jnp.sum(yc * yc, axis=0, keepdims=True) * inv_n
        scale = gamma * jax.lax.rsqrt(var + EPS)      # BN affine folded into one FMA
        shift = beta - mean * scale
        z = y * scale + shift
        return jnp.maximum(z, NEG_SLOPE * z)          # LeakyReLU(0.2)

    def build_patches(act_ref, patch_ref, oh_o, ow_o, c_in):
        # stride-2 / 4x4 VALID-conv im2col built straight from the VMEM activation
        # scratch with strided slices (outer + sublane dims only; lanes untouched).
        for ki in range(KS):
            for kj in range(KS):
                tap = act_ref[:, pl.ds(ki, oh_o, stride=ST),
                              pl.ds(kj, ow_o, stride=ST), :]
                t = ki * KS + kj
                patch_ref[:, :, 0:ow_o, t * c_in:(t + 1) * c_in] = tap

    def kernel(p1_ref, w1_ref, g1_ref, be1_ref,
               w2_ref, g2_ref, be2_ref,
               w3_ref, b3_ref,
               o_ref,
               act1_ref, patch2_ref, act2_ref, patch3_ref):
        # Padded rows of the im2col scratches must be exact zeros (VMEM scratch is
        # uninitialized) so the GEMMs produce zeros there and BN masking stays exact.
        patch2_ref[...] = jnp.zeros_like(patch2_ref)
        patch3_ref[...] = jnp.zeros_like(patch3_ref)

        # ----- layer 1: conv (host-side im2col) as one GEMM + BN + LeakyReLU -----
        y1 = jnp.dot(p1_ref[...], w1_ref[...],
                     preferred_element_type=jnp.float32)                  # (M1, C1)
        a1 = bn_lrelu(y1, g1_ref[...], be1_ref[...], ow1p, ow1, n * oh1 * ow1)
        act1_ref[...] = a1.reshape(n, oh1, ow1p, c1)

        # ----- layer 2: in-VMEM im2col + one deep-K GEMM + BN + LeakyReLU --------
        build_patches(act1_ref, patch2_ref, oh2, ow2, c1)
        p2 = patch2_ref[...].reshape(m2, k2).astype(jnp.bfloat16)
        y2 = jnp.dot(p2, w2_ref[...], preferred_element_type=jnp.float32)  # (M2, C2)
        a2 = bn_lrelu(y2, g2_ref[...], be2_ref[...], ow2p, ow2, n * oh2 * ow2)
        act2_ref[...] = a2.reshape(n, oh2, ow2p, c2)

        # ----- layer 3: in-VMEM im2col + GEMM + bias (lane-dense 128-wide out) ---
        build_patches(act2_ref, patch3_ref, oh3, ow3, c2)
        p3 = patch3_ref[...].reshape(m3, k3).astype(jnp.bfloat16)
        y3 = jnp.dot(p3, w3_ref[...], preferred_element_type=jnp.float32)  # (M3, OCP)
        o_ref[...] = y3 + b3_ref[...]

    return kernel


# ------------------------------ host-side prep ------------------------------

def _padded_nbytes(shape, itemsize):
    d = list(shape)
    d[-1] = ((d[-1] + 127) // 128) * 128
    d[-2] = _pad8(d[-2])
    return math.prod(d) * itemsize


def _vmem_limit_bytes(footprint):
    try:
        cap = int(pltpu.get_tpu_info().vmem_capacity_bytes)
    except Exception:
        cap = 64 * 1024 * 1024           # v7x per-TensorCore VMEM (smallest current)
    want = 2 * footprint + (8 << 20)     # residents + layout / pipelining headroom
    return int(max(16 << 20, min(want, (cap * 3) // 4)))


# --------------------------------- forward ----------------------------------

def discriminator_forward(params, image):
    n, ic, h, w = image.shape
    oh1, ow1 = _out(h), _out(w)
    oh2, ow2 = _out(oh1), _out(ow1)
    oh3, ow3 = _out(oh2), _out(ow2)
    ow1p, ow2p, ow3p = _pad8(ow1), _pad8(ow2), _pad8(ow3)

    w1, w2, w3 = params["w1"], params["w2"], params["w3"]
    c1, c2, oc3 = w1.shape[0], w2.shape[0], w3.shape[0]
    assert oc3 == 1, "final conv of the module has a single output channel"
    k1, k2, k3 = ic * 16, c1 * 16, c2 * 16
    m1, m3 = n * oh1 * ow1p, n * oh3 * ow3p

    bf = jnp.bfloat16

    # ---- layer-1 im2col on the host (only this layer's input lives in HBM);
    #      rows ordered (n, oh, ow_padded), K ordered (ic, kh, kw); pad rows zero.
    cols = []
    for ki in range(KS):
        for kj in range(KS):
            cols.append(image[:, :, ki:ki + ST * oh1:ST, kj:kj + ST * ow1:ST])
    p1 = jnp.stack(cols, axis=2)                               # (N, IC, 16, OH1, OW1)
    p1 = jnp.transpose(p1, (0, 3, 4, 1, 2)).reshape(n, oh1, ow1, k1)
    p1 = jnp.pad(p1, ((0, 0), (0, 0), (0, ow1p - ow1), (0, 0)))
    p1 = p1.reshape(m1, k1).astype(bf)

    # ---- weights: contraction order matches the in-kernel im2col ((kh,kw,ic)-major
    #      for layers 2/3); final conv padded 1 -> 128 output channels.
    w1t = w1.reshape(c1, k1).T.astype(bf)                                  # (K1, C1)
    w2t = jnp.transpose(w2, (2, 3, 1, 0)).reshape(k2, c2).astype(bf)       # (K2, C2)
    w3t = jnp.transpose(w3, (2, 3, 1, 0)).reshape(k3, 1)
    w3p = jnp.pad(w3t, ((0, 0), (0, OCP - 1))).astype(bf)                  # (K3, OCP)
    b3p = jnp.pad(params["b3"].reshape(1, 1).astype(jnp.float32),
                  ((0, 0), (0, OCP - 1)))                                  # (1, OCP)

    row = lambda v: v.reshape(1, -1).astype(jnp.float32)
    inputs = (p1, w1t, row(params["g1"]), row(params["beta1"]),
              w2t, row(params["g2"]), row(params["beta2"]),
              w3p, b3p)
    # NOTE: b1 / b2 are intentionally NOT passed: a conv bias feeding BatchNorm is
    # exactly cancelled by the mean subtraction.

    scratch_shapes = [
        (n, oh1, ow1p, c1),      # layer-1 activations
        (n, oh2, ow2p, k2),      # layer-2 im2col patches
        (n, oh2, ow2p, c2),      # layer-2 activations
        (n, oh3, ow3p, k3),      # layer-3 im2col patches
    ]

    foot = sum(_padded_nbytes(a.shape, a.dtype.itemsize) for a in inputs)
    foot += sum(_padded_nbytes(s, 4) for s in scratch_shapes)
    foot += _padded_nbytes((m3, OCP), 4)

    kernel = _make_kernel(n, c1, c2, oh1, ow1, ow1p, oh2, ow2, ow2p, oh3, ow3, ow3p)

    # TODO(synk): for large batches, tile the (n, oh) rows with a "parallel" grid axis
    # (BlockSpec index_maps on p1 / the activations) and turn BN into a two-pass
    # sum/sumsq cross-tile reduction; that bounds VMEM residency (v7x: 64 MiB/TC)
    # and engages v7x's second TensorCore.
    out = pl.pallas_call(
        kernel,
        out_shape=jax.ShapeDtypeStruct((m3, OCP), jnp.float32),
        in_specs=[pl.BlockSpec(memory_space=pltpu.MemorySpace.VMEM)] * len(inputs),
        out_specs=pl.BlockSpec(memory_space=pltpu.MemorySpace.VMEM),
        scratch_shapes=[pltpu.VMEM(s, jnp.float32) for s in scratch_shapes],
        compiler_params=pltpu.CompilerParams(
            vmem_limit_bytes=_vmem_limit_bytes(foot)),
    )(*inputs)

    # Drop W/channel padding: valid logits live at ow3 < OW3, channel 0.
    out = out.reshape(n, oh3, ow3p, OCP)[:, :, :ow3, 0]
    return out.reshape(n, oh3 * ow3)              # == .view(len(image), -1)


# ------------------------------- parameters ---------------------------------

def init_params(key, input_channel=1, hidden_channel=64):
    ks = jax.random.split(key, 10)

    def conv_w(k, oc, ic):
        return 0.05 * jax.random.normal(k, (oc, ic, KS, KS), jnp.float32)

    return {
        "w1": conv_w(ks[0], hidden_channel, input_channel),
        "b1": 0.01 * jax.random.normal(ks[1], (hidden_channel,), jnp.float32),
        "g1": 1.0 + 0.1 * jax.random.normal(ks[2], (hidden_channel,), jnp.float32),
        "beta1": 0.1 * jax.random.normal(ks[3], (hidden_channel,), jnp.float32),
        "w2": conv_w(ks[4], hidden_channel * 2, hidden_channel),
        "b2": 0.01 * jax.random.normal(ks[5], (hidden_channel * 2,), jnp.float32),
        "g2": 1.0 + 0.1 * jax.random.normal(ks[6], (hidden_channel * 2,), jnp.float32),
        "beta2": 0.1 * jax.random.normal(ks[7], (hidden_channel * 2,), jnp.float32),
        "w3": conv_w(ks[8], 1, hidden_channel * 2),
        "b3": 0.01 * jax.random.normal(ks[9], (1,), jnp.float32),
    }


# --------------------------- pure-JAX f32 reference --------------------------

def _ref_forward(params, image):
    def conv(x, w, b):
        y = jax.lax.conv_general_dilated(
            x, w, window_strides=(ST, ST), padding="VALID",
            dimension_numbers=("NCHW", "OIHW", "NCHW"))
        return y + b.reshape(1, -1, 1, 1)

    def bn_lrelu(y, g, beta):
        mean = jnp.mean(y, axis=(0, 2, 3), keepdims=True)
        var = jnp.mean(jnp.square(y - mean), axis=(0, 2, 3), keepdims=True)
        z = (g.reshape(1, -1, 1, 1) * (y - mean) * jax.lax.rsqrt(var + EPS)
             + beta.reshape(1, -1, 1, 1))
        return jnp.where(z >= 0, z, NEG_SLOPE * z)

    x = bn_lrelu(conv(image, params["w1"], params["b1"]), params["g1"], params["beta1"])
    x = bn_lrelu(conv(x, params["w2"], params["b2"]), params["g2"], params["beta2"])
    x = conv(x, params["w3"], params["b3"])
    return x.reshape(image.shape[0], -1)


# ----------------------------------- main ------------------------------------

if __name__ == "__main__":
    key = jax.random.PRNGKey(0)
    k_img, k_par = jax.random.split(key)

    # MNIST-like input per the module defaults (input_channel=1); hidden_channel
    # scaled down to 16 to keep the demo small.  Spatial: 28 -> 13 -> 5 -> 1.
    image = jax.random.normal(k_img, (2, 1, 28, 28), jnp.float32)
    params = init_params(k_par, input_channel=1, hidden_channel=16)

    fwd = jax.jit(discriminator_forward)
    out = jax.block_until_ready(fwd(params, image))
    ref = jax.block_until_ready(_ref_forward(params, image))

    assert out.shape == (2, 1), f"unexpected output shape {out.shape}"
    # bf16 MXU inputs (f32 accumulation / BN math) vs. an f32 reference across 3
    # conv layers -> mixed-precision tolerance.
    assert jnp.allclose(out, ref, rtol=2e-2, atol=2e-2), (out, ref)

    print("KERNEL_OK")
</pallas_src>

<mosaic_0001>
module attributes {stable_mosaic.version = 11 : i64} {
  func.func @kernel(%arg0: memref<416x16xbf16, #tpu.memory_space<vmem>>, %arg1: memref<16x16xbf16, #tpu.memory_space<vmem>>, %arg2: memref<1x16xf32, #tpu.memory_space<vmem>>, %arg3: memref<1x16xf32, #tpu.memory_space<vmem>>, %arg4: memref<256x32xbf16, #tpu.memory_space<vmem>>, %arg5: memref<1x32xf32, #tpu.memory_space<vmem>>, %arg6: memref<1x32xf32, #tpu.memory_space<vmem>>, %arg7: memref<512x128xbf16, #tpu.memory_space<vmem>>, %arg8: memref<1x128xf32, #tpu.memory_space<vmem>>, %arg9: memref<16x128xf32, #tpu.memory_space<vmem>>, %arg10: memref<2x13x16x16xf32, #tpu.memory_space<vmem>>, %arg11: memref<2x5x8x256xf32, #tpu.memory_space<vmem>>, %arg12: memref<2x5x8x32xf32, #tpu.memory_space<vmem>>, %arg13: memref<2x1x8x512xf32, #tpu.memory_space<vmem>>) attributes {dimension_semantics = [], scalar_prefetch = 0 : i64, scratch_operands = 4 : i64, tpu.core_type = #tpu.core_type<tc>} {
    %cst = arith.constant 0.000000e+00 : f32
    %0 = vector.broadcast %cst : f32 to vector<2x5x8x256xf32>
    %c0 = arith.constant 0 : index
    %c0_0 = arith.constant 0 : index
    %c0_1 = arith.constant 0 : index
    %c0_2 = arith.constant 0 : index
    %1 = vector.load %arg11[%c0, %c0_0, %c0_1, %c0_2] : memref<2x5x8x256xf32, #tpu.memory_space<vmem>>, vector<2x5x8x256xf32>
    tpu.vector_store %arg11[%c0, %c0_0, %c0_1, %c0_2], %0 {strides = array<i32>} : memref<2x5x8x256xf32, #tpu.memory_space<vmem>>, vector<2x5x8x256xf32>,
    %cst_3 = arith.constant 0.000000e+00 : f32
    %2 = vector.broadcast %cst_3 : f32 to vector<2x1x8x512xf32>
    %c0_4 = arith.constant 0 : index
    %c0_5 = arith.constant 0 : index
    %c0_6 = arith.constant 0 : index
    %c0_7 = arith.constant 0 : index
    %3 = vector.load %arg13[%c0_4, %c0_5, %c0_6, %c0_7] : memref<2x1x8x512xf32, #tpu.memory_space<vmem>>, vector<2x1x8x512xf32>
    tpu.vector_store %arg13[%c0_4, %c0_5, %c0_6, %c0_7], %2 {strides = array<i32>} : memref<2x1x8x512xf32, #tpu.memory_space<vmem>>, vector<2x1x8x512xf32>,
    %c0_8 = arith.constant 0 : index
    %c0_9 = arith.constant 0 : index
    %4 = vector.load %arg0[%c0_8, %c0_9] : memref<416x16xbf16, #tpu.memory_space<vmem>>, vector<416x16xbf16>
    %c0_10 = arith.constant 0 : index
    %c0_11 = arith.constant 0 : index
    %5 = vector.load %arg1[%c0_10, %c0_11] : memref<16x16xbf16, #tpu.memory_space<vmem>>, vector<16x16xbf16>
    %cst_12 = arith.constant dense<0.000000e+00> : vector<416x16xf32>
    %6 = tpu.matmul %4, %5, %cst_12 {dimension_numbers = #tpu.dot_dimension_numbers<[1], [0], [0], [1], [0, 0, 1, 1], [], []>} : vector<416x16xbf16>, vector<16x16xbf16>, vector<416x16xf32> -> vector<416x16xf32>
    %c0_13 = arith.constant 0 : index
    %c0_14 = arith.constant 0 : index
    %7 = vector.load %arg2[%c0_13, %c0_14] : memref<1x16xf32, #tpu.memory_space<vmem>>, vector<1x16xf32>
    %c0_15 = arith.constant 0 : index
    %c0_16 = arith.constant 0 : index
    %8 = vector.load %arg3[%c0_15, %c0_16] : memref<1x16xf32, #tpu.memory_space<vmem>>, vector<1x16xf32>
    %9 = tpu.iota {dimensions = array<i32: 0>} : vector<416x1xi32>
    %c16_i32 = arith.constant 16 : i32
    %c0_i32 = arith.constant 0 : i32
    %10 = arith.cmpi eq, %c16_i32, %c0_i32 : i32
    %c1_i32 = arith.constant 1 : i32
    %11 = arith.select %10, %c1_i32, %c16_i32 : i32
    %12 = vector.broadcast %11 : i32 to vector<416x1xi32>
    %13 = arith.remsi %9, %12 : vector<416x1xi32>
    %c0_i32_17 = arith.constant 0 : i32
    %14 = vector.broadcast %c0_i32_17 : i32 to vector<416x1xi32>
    %15 = arith.cmpi ne, %13, %14 : vector<416x1xi32>
    %c0_i32_18 = arith.constant 0 : i32
    %16 = vector.broadcast %c0_i32_18 : i32 to vector<416x1xi32>
    %17 = arith.cmpi slt, %13, %16 : vector<416x1xi32>
    %c0_i32_19 = arith.constant 0 : i32
    %18 = arith.cmpi slt, %11, %c0_i32_19 : i32
    %19 = vector.broadcast %18 : i1 to vector<416x1xi1>
    %20 = vector.broadcast %19 : vector<416x1xi1> to vector<416x1xi1>
    %21 = arith.xori %17, %20 : vector<416x1xi1>
    %22 = arith.andi %21, %15 : vector<416x1xi1>
    %23 = vector.broadcast %11 : i32 to vector<416x1xi32>
    %24 = arith.addi %13, %23 : vector<416x1xi32>
    %25 = arith.select %22, %24, %13 : vector<416x1xi1>, vector<416x1xi32>
    %c13_i32 = arith.constant 13 : i32
    %26 = vector.broadcast %c13_i32 : i32 to vector<416x1xi32>
    %27 = arith.cmpi slt, %25, %26 : vector<416x1xi32>
    %cst_20 = arith.constant 0.000000e+00 : f32
    %28 = vector.shape_cast %27 : vector<416x1xi1> to vector<416x1xi1>
    %29 = vector.broadcast %28 : vector<416x1xi1> to vector<416x16xi1>
    %30 = vector.broadcast %cst_20 : f32 to vector<416x16xf32>
    %31 = arith.select %29, %6, %30 : vector<416x16xi1>, vector<416x16xf32>
    %cst_21 = arith.constant dense<0.000000e+00> : vector<16xf32>
    %32 = vector.multi_reduction <add>, %31, %cst_21 [0] : vector<416x16xf32> to vector<16xf32>
    %33 = vector.shape_cast %32 : vector<16xf32> to vector<1x16xf32>
    %cst_22 = arith.constant 2.958580e-03 : f32
    %34 = vector.broadcast %cst_22 : f32 to vector<1x16xf32>
    %35 = arith.mulf %33, %34 : vector<1x16xf32>
    %36 = vector.broadcast %35 : vector<1x16xf32> to vector<416x16xf32>
    %37 = arith.subf %6, %36 : vector<416x16xf32>
    %cst_23 = arith.constant 0.000000e+00 : f32
    %38 = vector.shape_cast %27 : vector<416x1xi1> to vector<416x1xi1>
    %39 = vector.broadcast %38 : vector<416x1xi1> to vector<416x16xi1>
    %40 = vector.broadcast %cst_23 : f32 to vector<416x16xf32>
    %41 = arith.select %39, %37, %40 : vector<416x16xi1>, vector<416x16xf32>
    %42 = arith.mulf %41, %41 : vector<416x16xf32>
    %cst_24 = arith.constant dense<0.000000e+00> : vector<16xf32>
    %43 = vector.multi_reduction <add>, %42, %cst_24 [0] : vector<416x16xf32> to vector<16xf32>
    %44 = vector.shape_cast %43 : vector<16xf32> to vector<1x16xf32>
    %cst_25 = arith.constant 2.958580e-03 : f32
    %45 = vector.broadcast %cst_25 : f32 to vector<1x16xf32>
    %46 = arith.mulf %44, %45 : vector<1x16xf32>
    %cst_26 = arith.constant 9.99999974E-6 : f32
    %47 = vector.broadcast %cst_26 : f32 to vector<1x16xf32>
    %48 = arith.addf %46, %47 : vector<1x16xf32>
    %49 = math.rsqrt %48 : vector<1x16xf32>
    %50 = arith.mulf %7, %49 : vector<1x16xf32>
    %51 = arith.mulf %35, %50 : vector<1x16xf32>
    %52 = arith.subf %8, %51 : vector<1x16xf32>
    %53 = vector.broadcast %50 : vector<1x16xf32> to vector<416x16xf32>
    %54 = arith.mulf %6, %53 : vector<416x16xf32>
    %55 = vector.broadcast %52 : vector<1x16xf32> to vector<416x16xf32>
    %56 = arith.addf %54, %55 : vector<416x16xf32>
    %cst_27 = arith.constant 2.000000e-01 : f32
    %57 = vector.broadcast %cst_27 : f32 to vector<416x16xf32>
    %58 = arith.mulf %57, %56 : vector<416x16xf32>
    %59 = arith.maximumf %56, %58 : vector<416x16xf32>
    %60 = vector.shape_cast %59 : vector<416x16xf32> to vector<2x13x16x16xf32>
    %c0_28 = arith.constant 0 : index
    %c0_29 = arith.constant 0 : index
    %c0_30 = arith.constant 0 : index
    %c0_31 = arith.constant 0 : index
    %61 = vector.load %arg10[%c0_28, %c0_29, %c0_30, %c0_31] : memref<2x13x16x16xf32, #tpu.memory_space<vmem>>, vector<2x13x16x16xf32>
    tpu.vector_store %arg10[%c0_28, %c0_29, %c0_30, %c0_31], %60 {strides = array<i32>} : memref<2x13x16x16xf32, #tpu.memory_space<vmem>>, vector<2x13x16x16xf32>,
    %c0_32 = arith.constant 0 : index
    %c0_33 = arith.constant 0 : index
    %c0_34 = arith.constant 0 : index
    %c0_35 = arith.constant 0 : index
    %62 = tpu.strided_load %arg10[%c0_32, %c0_33, %c0_34, %c0_35] {strides = array<i32: 1, 2, 2, 1>} : memref<2x13x16x16xf32, #tpu.memory_space<vmem>>, vector<2x5x5x16xf32>
    %c0_36 = arith.constant 0 : index
    %c0_37 = arith.constant 0 : index
    %c0_38 = arith.constant 0 : index
    %c0_39 = arith.constant 0 : index
    %63 = vector.load %arg11[%c0_36, %c0_37, %c0_38, %c0_39] : memref<2x5x8x256xf32, #tpu.memory_space<vmem>>, vector<2x5x5x16xf32>
    tpu.vector_store %arg11[%c0_36, %c0_37, %c0_38, %c0_39], %62 {strides = array<i32>} : memref<2x5x8x256xf32, #tpu.memory_space<vmem>>, vector<2x5x5x16xf32>,
    %c0_40 = arith.constant 0 : index
    %c0_41 = arith.constant 0 : index
    %c1 = arith.constant 1 : index
    %c0_42 = arith.constant 0 : index
    %64 = tpu.strided_load %arg10[%c0_40, %c0_41, %c1, %c0_42] {strides = array<i32: 1, 2, 2, 1>} : memref<2x13x16x16xf32, #tpu.memory_space<vmem>>, vector<2x5x5x16xf32>
    %c0_43 = arith.constant 0 : index
    %c0_44 = arith.constant 0 : index
    %c0_45 = arith.constant 0 : index
    %c16 = arith.constant 16 : index
    %65 = vector.load %arg11[%c0_43, %c0_44, %c0_45, %c16] : memref<2x5x8x256xf32, #tpu.memory_space<vmem>>, vector<2x5x5x16xf32>
    tpu.vector_store %arg11[%c0_43, %c0_44, %c0_45, %c16], %64 {strides = array<i32>} : memref<2x5x8x256xf32, #tpu.memory_space<vmem>>, vector<2x5x5x16xf32>,
    %c0_46 = arith.constant 0 : index
    %c0_47 = arith.constant 0 : index
    %c2 = arith.constant 2 : index
    %c0_48 = arith.constant 0 : index
    %66 = tpu.strided_load %arg10[%c0_46, %c0_47, %c2, %c0_48] {strides = array<i32: 1, 2, 2, 1>} : memref<2x13x16x16xf32, #tpu.memory_space<vmem>>, vector<2x5x5x16xf32>
    %c0_49 = arith.constant 0 : index
    %c0_50 = arith.constant 0 : index
    %c0_51 = arith.constant 0 : index
    %c32 = arith.constant 32 : index
    %67 = vector.load %arg11[%c0_49, %c0_50, %c0_51, %c32] : memref<2x5x8x256xf32, #tpu.memory_space<vmem>>, vector<2x5x5x16xf32>
    tpu.vector_store %arg11[%c0_49, %c0_50, %c0_51, %c32], %66 {strides = array<i32>} : memref<2x5x8x256xf32, #tpu.memory_space<vmem>>, vector<2x5x5x16xf32>,
    %c0_52 = arith.constant 0 : index
    %c0_53 = arith.constant 0 : index
    %c3 = arith.constant 3 : index
    %c0_54 = arith.constant 0 : index
    %68 = tpu.strided_load %arg10[%c0_52, %c0_53, %c3, %c0_54] {strides = array<i32: 1, 2, 2, 1>} : memref<2x13x16x16xf32, #tpu.memory_space<vmem>>, vector<2x5x5x16xf32>
    %c0_55 = arith.constant 0 : index
    %c0_56 = arith.constant 0 : index
    %c0_57 = arith.constant 0 : index
    %c48 = arith.constant 48 : index
    %69 = vector.load %arg11[%c0_55, %c0_56, %c0_57, %c48] : memref<2x5x8x256xf32, #tpu.memory_space<vmem>>, vector<2x5x5x16xf32>
    tpu.vector_store %arg11[%c0_55, %c0_56, %c0_57, %c48], %68 {strides = array<i32>} : memref<2x5x8x256xf32, #tpu.memory_space<vmem>>, vector<2x5x5x16xf32>,
    %c0_58 = arith.constant 0 : index
    %c1_59 = arith.constant 1 : index
    %c0_60 = arith.constant 0 : index
    %c0_61 = arith.constant 0 : index
    %70 = tpu.strided_load %arg10[%c0_58, %c1_59, %c0_60, %c0_61] {strides = array<i32: 1, 2, 2, 1>} : memref<2x13x16x16xf32, #tpu.memory_space<vmem>>, vector<2x5x5x16xf32>
    %c0_62 = arith.constant 0 : index
    %c0_63 = arith.constant 0 : index
    %c0_64 = arith.constant 0 : index
    %c64 = arith.constant 64 : index
    %71 = vector.load %arg11[%c0_62, %c0_63, %c0_64, %c64] : memref<2x5x8x256xf32, #tpu.memory_space<vmem>>, vector<2x5x5x16xf32>
    tpu.vector_store %arg11[%c0_62, %c0_63, %c0_64, %c64], %70 {strides = array<i32>} : memref<2x5x8x256xf32, #tpu.memory_space<vmem>>, vector<2x5x5x16xf32>,
    %c0_65 = arith.constant 0 : index
    %c1_66 = arith.constant 1 : index
    %c1_67 = arith.constant 1 : index
    %c0_68 = arith.constant 0 : index
    %72 = tpu.strided_load %arg10[%c0_65, %c1_66, %c1_67, %c0_68] {strides = array<i32: 1, 2, 2, 1>} : memref<2x13x16x16xf32, #tpu.memory_space<vmem>>, vector<2x5x5x16xf32>
    %c0_69 = arith.constant 0 : index
    %c0_70 = arith.constant 0 : index
    %c0_71 = arith.constant 0 : index
    %c80 = arith.constant 80 : index
    %73 = vector.load %arg11[%c0_69, %c0_70, %c0_71, %c80] : memref<2x5x8x256xf32, #tpu.memory_space<vmem>>, vector<2x5x5x16xf32>
    tpu.vector_store %arg11[%c0_69, %c0_70, %c0_71, %c80], %72 {strides = array<i32>} : memref<2x5x8x256xf32, #tpu.memory_space<vmem>>, vector<2x5x5x16xf32>,
    %c0_72 = arith.constant 0 : index
    %c1_73 = arith.constant 1 : index
    %c2_74 = arith.constant 2 : index
    %c0_75 = arith.constant 0 : index
    %74 = tpu.strided_load %arg10[%c0_72, %c1_73, %c2_74, %c0_75] {strides = array<i32: 1, 2, 2, 1>} : memref<2x13x16x16xf32, #tpu.memory_space<vmem>>, vector<2x5x5x16xf32>
    %c0_76 = arith.constant 0 : index
    %c0_77 = arith.constant 0 : index
    %c0_78 = arith.constant 0 : index
    %c96 = arith.constant 96 : index
    %75 = vector.load %arg11[%c0_76, %c0_77, %c0_78, %c96] : memref<2x5x8x256xf32, #tpu.memory_space<vmem>>, vector<2x5x5x16xf32>
    tpu.vector_store %arg11[%c0_76, %c0_77, %c0_78, %c96], %74 {strides = array<i32>} : memref<2x5x8x256xf32, #tpu.memory_space<vmem>>, vector<2x5x5x16xf32>,
    %c0_79 = arith.constant 0 : index
    %c1_80 = arith.constant 1 : index
    %c3_81 = arith.constant 3 : index
    %c0_82 = arith.constant 0 : index
    %76 = tpu.strided_load %arg10[%c0_79, %c1_80, %c3_81, %c0_82] {strides = array<i32: 1, 2, 2, 1>} : memref<2x13x16x16xf32, #tpu.memory_space<vmem>>, vector<2x5x5x16xf32>
    %c0_83 = arith.constant 0 : index
    %c0_84 = arith.constant 0 : index
    %c0_85 = arith.constant 0 : index
    %c112 = arith.constant 112 : index
    %77 = vector.load %arg11[%c0_83, %c0_84, %c0_85, %c112] : memref<2x5x8x256xf32, #tpu.memory_space<vmem>>, vector<2x5x5x16xf32>
    tpu.vector_store %arg11[%c0_83, %c0_84, %c0_85, %c112], %76 {strides = array<i32>} : memref<2x5x8x256xf32, #tpu.memory_space<vmem>>, vector<2x5x5x16xf32>,
    %c0_86 = arith.constant 0 : index
    %c2_87 = arith.constant 2 : index
    %c0_88 = arith.constant 0 : index
    %c0_89 = arith.constant 0 : index
    %78 = tpu.strided_load %arg10[%c0_86, %c2_87, %c0_88, %c0_89] {strides = array<i32: 1, 2, 2, 1>} : memref<2x13x16x16xf32, #tpu.memory_space<vmem>>, vector<2x5x5x16xf32>
    %c0_90 = arith.constant 0 : index
    %c0_91 = arith.constant 0 : index
    %c0_92 = arith.constant 0 : index
    %c128 = arith.constant 128 : index
    %79 = vector.load %arg11[%c0_90, %c0_91, %c0_92, %c128] : memref<2x5x8x256xf32, #tpu.memory_space<vmem>>, vector<2x5x5x16xf32>
    tpu.vector_store %arg11[%c0_90, %c0_91, %c0_92, %c128], %78 {strides = array<i32>} : memref<2x5x8x256xf32, #tpu.memory_space<vmem>>, vector<2x5x5x16xf32>,
    %c0_93 = arith.constant 0 : index
    %c2_94 = arith.constant 2 : index
    %c1_95 = arith.constant 1 : index
    %c0_96 = arith.constant 0 : index
    %80 = tpu.strided_load %arg10[%c0_93, %c2_94, %c1_95, %c0_96] {strides = array<i32: 1, 2, 2, 1>} : memref<2x13x16x16xf32, #tpu.memory_space<vmem>>, vector<2x5x5x16xf32>
    %c0_97 = arith.constant 0 : index
    %c0_98 = arith.constant 0 : index
    %c0_99 = arith.constant 0 : index
    %c144 = arith.constant 144 : index
    %81 = vector.load %arg11[%c0_97, %c0_98, %c0_99, %c144] : memref<2x5x8x256xf32, #tpu.memory_space<vmem>>, vector<2x5x5x16xf32>
    tpu.vector_store %arg11[%c0_97, %c0_98, %c0_99, %c144], %80 {strides = array<i32>} : memref<2x5x8x256xf32, #tpu.memory_space<vmem>>, vector<2x5x5x16xf32>,
    %c0_100 = arith.constant 0 : index
    %c2_101 = arith.constant 2 : index
    %c2_102 = arith.constant 2 : index
    %c0_103 = arith.constant 0 : index
    %82 = tpu.strided_load %arg10[%c0_100, %c2_101, %c2_102, %c0_103] {strides = array<i32: 1, 2, 2, 1>} : memref<2x13x16x16xf32, #tpu.memory_space<vmem>>, vector<2x5x5x16xf32>
    %c0_104 = arith.constant 0 : index
    %c0_105 = arith.constant 0 : index
    %c0_106 = arith.constant 0 : index
    %c160 = arith.constant 160 : index
    %83 = vector.load %arg11[%c0_104, %c0_105, %c0_106, %c160] : memref<2x5x8x256xf32, #tpu.memory_space<vmem>>, vector<2x5x5x16xf32>
    tpu.vector_store %arg11[%c0_104, %c0_105, %c0_106, %c160], %82 {strides = array<i32>} : memref<2x5x8x256xf32, #tpu.memory_space<vmem>>, vector<2x5x5x16xf32>,
    %c0_107 = arith.constant 0 : index
    %c2_108 = arith.constant 2 : index
    %c3_109 = arith.constant 3 : index
    %c0_110 = arith.constant 0 : index
    %84 = tpu.strided_load %arg10[%c0_107, %c2_108, %c3_109, %c0_110] {strides = array<i32: 1, 2, 2, 1>} : memref<2x13x16x16xf32, #tpu.memory_space<vmem>>, vector<2x5x5x16xf32>
    %c0_111 = arith.constant 0 : index
    %c0_112 = arith.constant 0 : index
    %c0_113 = arith.constant 0 : index
    %c176 = arith.constant 176 : index
    %85 = vector.load %arg11[%c0_111, %c0_112, %c0_113, %c176] : memref<2x5x8x256xf32, #tpu.memory_space<vmem>>, vector<2x5x5x16xf32>
    tpu.vector_store %arg11[%c0_111, %c0_112, %c0_113, %c176], %84 {strides = array<i32>} : memref<2x5x8x256xf32, #tpu.memory_space<vmem>>, vector<2x5x5x16xf32>,
    %c0_114 = arith.constant 0 : index
    %c3_115 = arith.constant 3 : index
    %c0_116 = arith.constant 0 : index
    %c0_117 = arith.constant 0 : index
    %86 = tpu.strided_load %arg10[%c0_114, %c3_115, %c0_116, %c0_117] {strides = array<i32: 1, 2, 2, 1>} : memref<2x13x16x16xf32, #tpu.memory_space<vmem>>, vector<2x5x5x16xf32>
    %c0_118 = arith.constant 0 : index
    %c0_119 = arith.constant 0 : index
    %c0_120 = arith.constant 0 : index
    %c192 = arith.constant 192 : index
    %87 = vector.load %arg11[%c0_118, %c0_119, %c0_120, %c192] : memref<2x5x8x256xf32, #tpu.memory_space<vmem>>, vector<2x5x5x16xf32>
    tpu.vector_store %arg11[%c0_118, %c0_119, %c0_120, %c192], %86 {strides = array<i32>} : memref<2x5x8x256xf32, #tpu.memory_space<vmem>>, vector<2x5x5x16xf32>,
    %c0_121 = arith.constant 0 : index
    %c3_122 = arith.constant 3 : index
    %c1_123 = arith.constant 1 : index
    %c0_124 = arith.constant 0 : index
    %88 = tpu.strided_load %arg10[%c0_121, %c3_122, %c1_123, %c0_124] {strides = array<i32: 1, 2, 2, 1>} : memref<2x13x16x16xf32, #tpu.memory_space<vmem>>, vector<2x5x5x16xf32>
    %c0_125 = arith.constant 0 : index
    %c0_126 = arith.constant 0 : index
    %c0_127 = arith.constant 0 : index
    %c208 = arith.constant 208 : index
    %89 = vector.load %arg11[%c0_125, %c0_126, %c0_127, %c208] : memref<2x5x8x256xf32, #tpu.memory_space<vmem>>, vector<2x5x5x16xf32>
    tpu.vector_store %arg11[%c0_125, %c0_126, %c0_127, %c208], %88 {strides = array<i32>} : memref<2x5x8x256xf32, #tpu.memory_space<vmem>>, vector<2x5x5x16xf32>,
    %c0_128 = arith.constant 0 : index
    %c3_129 = arith.constant 3 : index
    %c2_130 = arith.constant 2 : index
    %c0_131 = arith.constant 0 : index
    %90 = tpu.strided_load %arg10[%c0_128, %c3_129, %c2_130, %c0_131] {strides = array<i32: 1, 2, 2, 1>} : memref<2x13x16x16xf32, #tpu.memory_space<vmem>>, vector<2x5x5x16xf32>
    %c0_132 = arith.constant 0 : index
    %c0_133 = arith.constant 0 : index
    %c0_134 = arith.constant 0 : index
    %c224 = arith.constant 224 : index
    %91 = vector.load %arg11[%c0_132, %c0_133, %c0_134, %c224] : memref<2x5x8x256xf32, #tpu.memory_space<vmem>>, vector<2x5x5x16xf32>
    tpu.vector_store %arg11[%c0_132, %c0_133, %c0_134, %c224], %90 {strides = array<i32>} : memref<2x5x8x256xf32, #tpu.memory_space<vmem>>, vector<2x5x5x16xf32>,
    %c0_135 = arith.constant 0 : index
    %c3_136 = arith.constant 3 : index
    %c3_137 = arith.constant 3 : index
    %c0_138 = arith.constant 0 : index
    %92 = tpu.strided_load %arg10[%c0_135, %c3_136, %c3_137, %c0_138] {strides = array<i32: 1, 2, 2, 1>} : memref<2x13x16x16xf32, #tpu.memory_space<vmem>>, vector<2x5x5x16xf32>
    %c0_139 = arith.constant 0 : index
    %c0_140 = arith.constant 0 : index
    %c0_141 = arith.constant 0 : index
    %c240 = arith.constant 240 : index
    %93 = vector.load %arg11[%c0_139, %c0_140, %c0_141, %c240] : memref<2x5x8x256xf32, #tpu.memory_space<vmem>>, vector<2x5x5x16xf32>
    tpu.vector_store %arg11[%c0_139, %c0_140, %c0_141, %c240], %92 {strides = array<i32>} : memref<2x5x8x256xf32, #tpu.memory_space<vmem>>, vector<2x5x5x16xf32>,
    %c0_142 = arith.constant 0 : index
    %c0_143 = arith.constant 0 : index
    %c0_144 = arith.constant 0 : index
    %c0_145 = arith.constant 0 : index
    %94 = vector.load %arg11[%c0_142, %c0_143, %c0_144, %c0_145] : memref<2x5x8x256xf32, #tpu.memory_space<vmem>>, vector<2x5x8x256xf32>
    %95 = vector.shape_cast %94 : vector<2x5x8x256xf32> to vector<80x256xf32>
    %96 = arith.truncf %95 : vector<80x256xf32> to vector<80x256xbf16>
    %c0_146 = arith.constant 0 : index
    %c0_147 = arith.constant 0 : index
    %97 = vector.load %arg4[%c0_146, %c0_147] : memref<256x32xbf16, #tpu.memory_space<vmem>>, vector<256x32xbf16>
    %cst_148 = arith.constant dense<0.000000e+00> : vector<80x32xf32>
    %98 = tpu.matmul %96, %97, %cst_148 {dimension_numbers = #tpu.dot_dimension_numbers<[1], [0], [0], [1], [0, 0, 1, 1], [], []>} : vector<80x256xbf16>, vector<256x32xbf16>, vector<80x32xf32> -> vector<80x32xf32>
    %c0_149 = arith.constant 0 : index
    %c0_150 = arith.constant 0 : index
    %99 = vector.load %arg5[%c0_149, %c0_150] : memref<1x32xf32, #tpu.memory_space<vmem>>, vector<1x32xf32>
    %c0_151 = arith.constant 0 : index
    %c0_152 = arith.constant 0 : index
    %100 = vector.load %arg6[%c0_151, %c0_152] : memref<1x32xf32, #tpu.memory_space<vmem>>, vector<1x32xf32>
    %101 = tpu.iota {dimensions = array<i32: 0>} : vector<80x1xi32>
    %c8_i32 = arith.constant 8 : i32
    %c0_i32_153 = arith.constant 0 : i32
    %102 = arith.cmpi eq, %c8_i32, %c0_i32_153 : i32
    %c1_i32_154 = arith.constant 1 : i32
    %103 = arith.select %102, %c1_i32_154, %c8_i32 : i32
    %104 = vector.broadcast %103 : i32 to vector<80x1xi32>
    %105 = arith.remsi %101, %104 : vector<80x1xi32>
    %c0_i32_155 = arith.constant 0 : i32
    %106 = vector.broadcast %c0_i32_155 : i32 to vector<80x1xi32>
    %107 = arith.cmpi ne, %105, %106 : vector<80x1xi32>
    %c0_i32_156 = arith.constant 0 : i32
    %108 = vector.broadcast %c0_i32_156 : i32 to vector<80x1xi32>
    %109 = arith.cmpi slt, %105, %108 : vector<80x1xi32>
    %c0_i32_157 = arith.constant 0 : i32
    %110 = arith.cmpi slt, %103, %c0_i32_157 : i32
    %111 = vector.broadcast %110 : i1 to vector<80x1xi1>
    %112 = vector.broadcast %111 : vector<80x1xi1> to vector<80x1xi1>
    %113 = arith.xori %109, %112 : vector<80x1xi1>
    %114 = arith.andi %113, %107 : vector<80x1xi1>
    %115 = vector.broadcast %103 : i32 to vector<80x1xi32>
    %116 = arith.addi %105, %115 : vector<80x1xi32>
    %117 = arith.select %114, %116, %105 : vector<80x1xi1>, vector<80x1xi32>
    %c5_i32 = arith.constant 5 : i32
    %118 = vector.broadcast %c5_i32 : i32 to vector<80x1xi32>
    %119 = arith.cmpi slt, %117, %118 : vector<80x1xi32>
    %cst_158 = arith.constant 0.000000e+00 : f32
    %120 = vector.shape_cast %119 : vector<80x1xi1> to vector<80x1xi1>
    %121 = vector.broadcast %120 : vector<80x1xi1> to vector<80x32xi1>
    %122 = vector.broadcast %cst_158 : f32 to vector<80x32xf32>
    %123 = arith.select %121, %98, %122 : vector<80x32xi1>, vector<80x32xf32>
    %cst_159 = arith.constant dense<0.000000e+00> : vector<32xf32>
    %124 = vector.multi_reduction <add>, %123, %cst_159 [0] : vector<80x32xf32> to vector<32xf32>
    %125 = vector.shape_cast %124 : vector<32xf32> to vector<1x32xf32>
    %cst_160 = arith.constant 2.000000e-02 : f32
    %126 = vector.broadcast %cst_160 : f32 to vector<1x32xf32>
    %127 = arith.mulf %125, %126 : vector<1x32xf32>
    %128 = vector.broadcast %127 : vector<1x32xf32> to vector<80x32xf32>
    %129 = arith.subf %98, %128 : vector<80x32xf32>
    %cst_161 = arith.constant 0.000000e+00 : f32
    %130 = vector.shape_cast %119 : vector<80x1xi1> to vector<80x1xi1>
    %131 = vector.broadcast %130 : vector<80x1xi1> to vector<80x32xi1>
    %132 = vector.broadcast %cst_161 : f32 to vector<80x32xf32>
    %133 = arith.select %131, %129, %132 : vector<80x32xi1>, vector<80x32xf32>
    %134 = arith.mulf %133, %133 : vector<80x32xf32>
    %cst_162 = arith.constant dense<0.000000e+00> : vector<32xf32>
    %135 = vector.multi_reduction <add>, %134, %cst_162 [0] : vector<80x32xf32> to vector<32xf32>
    %136 = vector.shape_cast %135 : vector<32xf32> to vector<1x32xf32>
    %cst_163 = arith.constant 2.000000e-02 : f32
    %137 = vector.broadcast %cst_163 : f32 to vector<1x32xf32>
    %138 = arith.mulf %136, %137 : vector<1x32xf32>
    %cst_164 = arith.constant 9.99999974E-6 : f32
    %139 = vector.broadcast %cst_164 : f32 to vector<1x32xf32>
    %140 = arith.addf %138, %139 : vector<1x32xf32>
    %141 = math.rsqrt %140 : vector<1x32xf32>
    %142 = arith.mulf %99, %141 : vector<1x32xf32>
    %143 = arith.mulf %127, %142 : vector<1x32xf32>
    %144 = arith.subf %100, %143 : vector<1x32xf32>
    %145 = vector.broadcast %142 : vector<1x32xf32> to vector<80x32xf32>
    %146 = arith.mulf %98, %145 : vector<80x32xf32>
    %147 = vector.broadcast %144 : vector<1x32xf32> to vector<80x32xf32>
    %148 = arith.addf %146, %147 : vector<80x32xf32>
    %cst_165 = arith.constant 2.000000e-01 : f32
    %149 = vector.broadcast %cst_165 : f32 to vector<80x32xf32>
    %150 = arith.mulf %149, %148 : vector<80x32xf32>
    %151 = arith.maximumf %148, %150 : vector<80x32xf32>
    %152 = vector.shape_cast %151 : vector<80x32xf32> to vector<2x5x8x32xf32>
    %c0_166 = arith.constant 0 : index
    %c0_167 = arith.constant 0 : index
    %c0_168 = arith.constant 0 : index
    %c0_169 = arith.constant 0 : index
    %153 = vector.load %arg12[%c0_166, %c0_167, %c0_168, %c0_169] : memref<2x5x8x32xf32, #tpu.memory_space<vmem>>, vector<2x5x8x32xf32>
    tpu.vector_store %arg12[%c0_166, %c0_167, %c0_168, %c0_169], %152 {strides = array<i32>} : memref<2x5x8x32xf32, #tpu.memory_space<vmem>>, vector<2x5x8x32xf32>,
    %c0_170 = arith.constant 0 : index
    %c0_171 = arith.constant 0 : index
    %c0_172 = arith.constant 0 : index
    %c0_173 = arith.constant 0 : index
    %154 = tpu.strided_load %arg12[%c0_170, %c0_171, %c0_172, %c0_173] {strides = array<i32: 1, 2, 2, 1>} : memref<2x5x8x32xf32, #tpu.memory_space<vmem>>, vector<2x1x1x32xf32>
    %c0_174 = arith.constant 0 : index
    %c0_175 = arith.constant 0 : index
    %c0_176 = arith.constant 0 : index
    %c0_177 = arith.constant 0 : index
    %155 = vector.load %arg13[%c0_174, %c0_175, %c0_176, %c0_177] : memref<2x1x8x512xf32, #tpu.memory_space<vmem>>, vector<2x1x1x32xf32>
    tpu.vector_store %arg13[%c0_174, %c0_175, %c0_176, %c0_177], %154 {strides = array<i32>} : memref<2x1x8x512xf32, #tpu.memory_space<vmem>>, vector<2x1x1x32xf32>,
    %c0_178 = arith.constant 0 : index
    %c0_179 = arith.constant 0 : index
    %c1_180 = arith.constant 1 : index
    %c0_181 = arith.constant 0 : index
    %156 = tpu.strided_load %arg12[%c0_178, %c0_179, %c1_180, %c0_181] {strides = array<i32: 1, 2, 2, 1>} : memref<2x5x8x32xf32, #tpu.memory_space<vmem>>, vector<2x1x1x32xf32>
    %c0_182 = arith.constant 0 : index
    %c0_183 = arith.constant 0 : index
    %c0_184 = arith.constant 0 : index
    %c32_185 = arith.constant 32 : index
    %157 = vector.load %arg13[%c0_182, %c0_183, %c0_184, %c32_185] : memref<2x1x8x512xf32, #tpu.memory_space<vmem>>, vector<2x1x1x32xf32>
    tpu.vector_store %arg13[%c0_182, %c0_183, %c0_184, %c32_185], %156 {strides = array<i32>} : memref<2x1x8x512xf32, #tpu.memory_space<vmem>>, vector<2x1x1x32xf32>,
    %c0_186 = arith.constant 0 : index
    %c0_187 = arith.constant 0 : index
    %c2_188 = arith.constant 2 : index
    %c0_189 = arith.constant 0 : index
    %158 = tpu.strided_load %arg12[%c0_186, %c0_187, %c2_188, %c0_189] {strides = array<i32: 1, 2, 2, 1>} : memref<2x5x8x32xf32, #tpu.memory_space<vmem>>, vector<2x1x1x32xf32>
    %c0_190 = arith.constant 0 : index
    %c0_191 = arith.constant 0 : index
    %c0_192 = arith.constant 0 : index
    %c64_193 = arith.constant 64 : index
    %159 = vector.load %arg13[%c0_190, %c0_191, %c0_192, %c64_193] : memref<2x1x8x512xf32, #tpu.memory_space<vmem>>, vector<2x1x1x32xf32>
    tpu.vector_store %arg13[%c0_190, %c0_191, %c0_192, %c64_193], %158 {strides = array<i32>} : memref<2x1x8x512xf32, #tpu.memory_space<vmem>>, vector<2x1x1x32xf32>,
    %c0_194 = arith.constant 0 : index
    %c0_195 = arith.constant 0 : index
    %c3_196 = arith.constant 3 : index
    %c0_197 = arith.constant 0 : index
    %160 = tpu.strided_load %arg12[%c0_194, %c0_195, %c3_196, %c0_197] {strides = array<i32: 1, 2, 2, 1>} : memref<2x5x8x32xf32, #tpu.memory_space<vmem>>, vector<2x1x1x32xf32>
    %c0_198 = arith.constant 0 : index
    %c0_199 = arith.constant 0 : index
    %c0_200 = arith.constant 0 : index
    %c96_201 = arith.constant 96 : index
    %161 = vector.load %arg13[%c0_198, %c0_199, %c0_200, %c96_201] : memref<2x1x8x512xf32, #tpu.memory_space<vmem>>, vector<2x1x1x32xf32>
    tpu.vector_store %arg13[%c0_198, %c0_199, %c0_200, %c96_201], %160 {strides = array<i32>} : memref<2x1x8x512xf32, #tpu.memory_space<vmem>>, vector<2x1x1x32xf32>,
    %c0_202 = arith.constant 0 : index
    %c1_203 = arith.constant 1 : index
    %c0_204 = arith.constant 0 : index
    %c0_205 = arith.constant 0 : index
    %162 = tpu.strided_load %arg12[%c0_202, %c1_203, %c0_204, %c0_205] {strides = array<i32: 1, 2, 2, 1>} : memref<2x5x8x32xf32, #tpu.memory_space<vmem>>, vector<2x1x1x32xf32>
    %c0_206 = arith.constant 0 : index
    %c0_207 = arith.constant 0 : index
    %c0_208 = arith.constant 0 : index
    %c128_209 = arith.constant 128 : index
    %163 = vector.load %arg13[%c0_206, %c0_207, %c0_208, %c128_209] : memref<2x1x8x512xf32, #tpu.memory_space<vmem>>, vector<2x1x1x32xf32>
    tpu.vector_store %arg13[%c0_206, %c0_207, %c0_208, %c128_209], %162 {strides = array<i32>} : memref<2x1x8x512xf32, #tpu.memory_space<vmem>>, vector<2x1x1x32xf32>,
    %c0_210 = arith.constant 0 : index
    %c1_211 = arith.constant 1 : index
    %c1_212 = arith.constant 1 : index
    %c0_213 = arith.constant 0 : index
    %164 = tpu.strided_load %arg12[%c0_210, %c1_211, %c1_212, %c0_213] {strides = array<i32: 1, 2, 2, 1>} : memref<2x5x8x32xf32, #tpu.memory_space<vmem>>, vector<2x1x1x32xf32>
    %c0_214 = arith.constant 0 : index
    %c0_215 = arith.constant 0 : index
    %c0_216 = arith.constant 0 : index
    %c160_217 = arith.constant 160 : index
    %165 = vector.load %arg13[%c0_214, %c0_215, %c0_216, %c160_217] : memref<2x1x8x512xf32, #tpu.memory_space<vmem>>, vector<2x1x1x32xf32>
    tpu.vector_store %arg13[%c0_214, %c0_215, %c0_216, %c160_217], %164 {strides = array<i32>} : memref<2x1x8x512xf32, #tpu.memory_space<vmem>>, vector<2x1x1x32xf32>,
    %c0_218 = arith.constant 0 : index
    %c1_219 = arith.constant 1 : index
    %c2_220 = arith.constant 2 : index
    %c0_221 = arith.constant 0 : index
    %166 = tpu.strided_load %arg12[%c0_218, %c1_219, %c2_220, %c0_221] {strides = array<i32: 1, 2, 2, 1>} : memref<2x5x8x32xf32, #tpu.memory_space<vmem>>, vector<2x1x1x32xf32>
    %c0_222 = arith.constant 0 : index
    %c0_223 = arith.constant 0 : index
    %c0_224 = arith.constant 0 : index
    %c192_225 = arith.constant 192 : index
    %167 = vector.load %arg13[%c0_222, %c0_223, %c0_224, %c192_225] : memref<2x1x8x512xf32, #tpu.memory_space<vmem>>, vector<2x1x1x32xf32>
    tpu.vector_store %arg13[%c0_222, %c0_223, %c0_224, %c192_225], %166 {strides = array<i32>} : memref<2x1x8x512xf32, #tpu.memory_space<vmem>>, vector<2x1x1x32xf32>,
    %c0_226 = arith.constant 0 : index
    %c1_227 = arith.constant 1 : index
    %c3_228 = arith.constant 3 : index
    %c0_229 = arith.constant 0 : index
    %168 = tpu.strided_load %arg12[%c0_226, %c1_227, %c3_228, %c0_229] {strides = array<i32: 1, 2, 2, 1>} : memref<2x5x8x32xf32, #tpu.memory_space<vmem>>, vector<2x1x1x32xf32>
    %c0_230 = arith.constant 0 : index
    %c0_231 = arith.constant 0 : index
    %c0_232 = arith.constant 0 : index
    %c224_233 = arith.constant 224 : index
    %169 = vector.load %arg13[%c0_230, %c0_231, %c0_232, %c224_233] : memref<2x1x8x512xf32, #tpu.memory_space<vmem>>, vector<2x1x1x32xf32>
    tpu.vector_store %arg13[%c0_230, %c0_231, %c0_232, %c224_233], %168 {strides = array<i32>} : memref<2x1x8x512xf32, #tpu.memory_space<vmem>>, vector<2x1x1x32xf32>,
    %c0_234 = arith.constant 0 : index
    %c2_235 = arith.constant 2 : index
    %c0_236 = arith.constant 0 : index
    %c0_237 = arith.constant 0 : index
    %170 = tpu.strided_load %arg12[%c0_234, %c2_235, %c0_236, %c0_237] {strides = array<i32: 1, 2, 2, 1>} : memref<2x5x8x32xf32, #tpu.memory_space<vmem>>, vector<2x1x1x32xf32>
    %c0_238 = arith.constant 0 : index
    %c0_239 = arith.constant 0 : index
    %c0_240 = arith.constant 0 : index
    %c256 = arith.constant 256 : index
    %171 = vector.load %arg13[%c0_238, %c0_239, %c0_240, %c256] : memref<2x1x8x512xf32, #tpu.memory_space<vmem>>, vector<2x1x1x32xf32>
    tpu.vector_store %arg13[%c0_238, %c0_239, %c0_240, %c256], %170 {strides = array<i32>} : memref<2x1x8x512xf32, #tpu.memory_space<vmem>>, vector<2x1x1x32xf32>,
    %c0_241 = arith.constant 0 : index
    %c2_242 = arith.constant 2 : index
    %c1_243 = arith.constant 1 : index
    %c0_244 = arith.constant 0 : index
    %172 = tpu.strided_load %arg12[%c0_241, %c2_242, %c1_243, %c0_244] {strides = array<i32: 1, 2, 2, 1>} : memref<2x5x8x32xf32, #tpu.memory_space<vmem>>, vector<2x1x1x32xf32>
    %c0_245 = arith.constant 0 : index
    %c0_246 = arith.constant 0 : index
    %c0_247 = arith.constant 0 : index
    %c288 = arith.constant 288 : index
    %173 = vector.load %arg13[%c0_245, %c0_246, %c0_247, %c288] : memref<2x1x8x512xf32, #tpu.memory_space<vmem>>, vector<2x1x1x32xf32>
    tpu.vector_store %arg13[%c0_245, %c0_246, %c0_247, %c288], %172 {strides = array<i32>} : memref<2x1x8x512xf32, #tpu.memory_space<vmem>>, vector<2x1x1x32xf32>,
    %c0_248 = arith.constant 0 : index
    %c2_249 = arith.constant 2 : index
    %c2_250 = arith.constant 2 : index
    %c0_251 = arith.constant 0 : index
    %174 = tpu.strided_load %arg12[%c0_248, %c2_249, %c2_250, %c0_251] {strides = array<i32: 1, 2, 2, 1>} : memref<2x5x8x32xf32, #tpu.memory_space<vmem>>, vector<2x1x1x32xf32>
    %c0_252 = arith.constant 0 : index
    %c0_253 = arith.constant 0 : index
    %c0_254 = arith.constant 0 : index
    %c320 = arith.constant 320 : index
    %175 = vector.load %arg13[%c0_252, %c0_253, %c0_254, %c320] : memref<2x1x8x512xf32, #tpu.memory_space<vmem>>, vector<2x1x1x32xf32>
    tpu.vector_store %arg13[%c0_252, %c0_253, %c0_254, %c320], %174 {strides = array<i32>} : memref<2x1x8x512xf32, #tpu.memory_space<vmem>>, vector<2x1x1x32xf32>,
    %c0_255 = arith.constant 0 : index
    %c2_256 = arith.constant 2 : index
    %c3_257 = arith.constant 3 : index
    %c0_258 = arith.constant 0 : index
    %176 = tpu.strided_load %arg12[%c0_255, %c2_256, %c3_257, %c0_258] {strides = array<i32: 1, 2, 2, 1>} : memref<2x5x8x32xf32, #tpu.memory_space<vmem>>, vector<2x1x1x32xf32>
    %c0_259 = arith.constant 0 : index
    %c0_260 = arith.constant 0 : index
    %c0_261 = arith.constant 0 : index
    %c352 = arith.constant 352 : index
    %177 = vector.load %arg13[%c0_259, %c0_260, %c0_261, %c352] : memref<2x1x8x512xf32, #tpu.memory_space<vmem>>, vector<2x1x1x32xf32>
    tpu.vector_store %arg13[%c0_259, %c0_260, %c0_261, %c352], %176 {strides = array<i32>} : memref<2x1x8x512xf32, #tpu.memory_space<vmem>>, vector<2x1x1x32xf32>,
    %c0_262 = arith.constant 0 : index
    %c3_263 = arith.constant 3 : index
    %c0_264 = arith.constant 0 : index
    %c0_265 = arith.constant 0 : index
    %178 = tpu.strided_load %arg12[%c0_262, %c3_263, %c0_264, %c0_265] {strides = array<i32: 1, 2, 2, 1>} : memref<2x5x8x32xf32, #tpu.memory_space<vmem>>, vector<2x1x1x32xf32>
    %c0_266 = arith.constant 0 : index
    %c0_267 = arith.constant 0 : index
    %c0_268 = arith.constant 0 : index
    %c384 = arith.constant 384 : index
    %179 = vector.load %arg13[%c0_266, %c0_267, %c0_268, %c384] : memref<2x1x8x512xf32, #tpu.memory_space<vmem>>, vector<2x1x1x32xf32>
    tpu.vector_store %arg13[%c0_266, %c0_267, %c0_268, %c384], %178 {strides = array<i32>} : memref<2x1x8x512xf32, #tpu.memory_space<vmem>>, vector<2x1x1x32xf32>,
    %c0_269 = arith.constant 0 : index
    %c3_270 = arith.constant 3 : index
    %c1_271 = arith.constant 1 : index
    %c0_272 = arith.constant 0 : index
    %180 = tpu.strided_load %arg12[%c0_269, %c3_270, %c1_271, %c0_272] {strides = array<i32: 1, 2, 2, 1>} : memref<2x5x8x32xf32, #tpu.memory_space<vmem>>, vector<2x1x1x32xf32>
    %c0_273 = arith.constant 0 : index
    %c0_274 = arith.constant 0 : index
    %c0_275 = arith.constant 0 : index
    %c416 = arith.constant 416 : index
    %181 = vector.load %arg13[%c0_273, %c0_274, %c0_275, %c416] : memref<2x1x8x512xf32, #tpu.memory_space<vmem>>, vector<2x1x1x32xf32>
    tpu.vector_store %arg13[%c0_273, %c0_274, %c0_275, %c416], %180 {strides = array<i32>} : memref<2x1x8x512xf32, #tpu.memory_space<vmem>>, vector<2x1x1x32xf32>,
    %c0_276 = arith.constant 0 : index
    %c3_277 = arith.constant 3 : index
    %c2_278 = arith.constant 2 : index
    %c0_279 = arith.constant 0 : index
    %182 = tpu.strided_load %arg12[%c0_276, %c3_277, %c2_278, %c0_279] {strides = array<i32: 1, 2, 2, 1>} : memref<2x5x8x32xf32, #tpu.memory_space<vmem>>, vector<2x1x1x32xf32>
    %c0_280 = arith.constant 0 : index
    %c0_281 = arith.constant 0 : index
    %c0_282 = arith.constant 0 : index
    %c448 = arith.constant 448 : index
    %183 = vector.load %arg13[%c0_280, %c0_281, %c0_282, %c448] : memref<2x1x8x512xf32, #tpu.memory_space<vmem>>, vector<2x1x1x32xf32>
    tpu.vector_store %arg13[%c0_280, %c0_281, %c0_282, %c448], %182 {strides = array<i32>} : memref<2x1x8x512xf32, #tpu.memory_space<vmem>>, vector<2x1x1x32xf32>,
    %c0_283 = arith.constant 0 : index
    %c3_284 = arith.constant 3 : index
    %c3_285 = arith.constant 3 : index
    %c0_286 = arith.constant 0 : index
    %184 = tpu.strided_load %arg12[%c0_283, %c3_284, %c3_285, %c0_286] {strides = array<i32: 1, 2, 2, 1>} : memref<2x5x8x32xf32, #tpu.memory_space<vmem>>, vector<2x1x1x32xf32>
    %c0_287 = arith.constant 0 : index
    %c0_288 = arith.constant 0 : index
    %c0_289 = arith.constant 0 : index
    %c480 = arith.constant 480 : index
    %185 = vector.load %arg13[%c0_287, %c0_288, %c0_289, %c480] : memref<2x1x8x512xf32, #tpu.memory_space<vmem>>, vector<2x1x1x32xf32>
    tpu.vector_store %arg13[%c0_287, %c0_288, %c0_289, %c480], %184 {strides = array<i32>} : memref<2x1x8x512xf32, #tpu.memory_space<vmem>>, vector<2x1x1x32xf32>,
    %c0_290 = arith.constant 0 : index
    %c0_291 = arith.constant 0 : index
    %c0_292 = arith.constant 0 : index
    %c0_293 = arith.constant 0 : index
    %186 = vector.load %arg13[%c0_290, %c0_291, %c0_292, %c0_293] : memref<2x1x8x512xf32, #tpu.memory_space<vmem>>, vector<2x1x8x512xf32>
    %187 = vector.shape_cast %186 : vector<2x1x8x512xf32> to vector<16x512xf32>
    %188 = arith.truncf %187 : vector<16x512xf32> to vector<16x512xbf16>
    %c0_294 = arith.constant 0 : index
    %c0_295 = arith.constant 0 : index
    %189 = vector.load %arg7[%c0_294, %c0_295] : memref<512x128xbf16, #tpu.memory_space<vmem>>, vector<512x128xbf16>
    %cst_296 = arith.constant dense<0.000000e+00> : vector<16x128xf32>
    %190 = tpu.matmul %188, %189, %cst_296 {dimension_numbers = #tpu.dot_dimension_numbers<[1], [0], [0], [1], [0, 0, 1, 1], [], []>} : vector<16x512xbf16>, vector<512x128xbf16>, vector<16x128xf32> -> vector<16x128xf32>
    %c0_297 = arith.constant 0 : index
    %c0_298 = arith.constant 0 : index
    %191 = vector.load %arg8[%c0_297, %c0_298] : memref<1x128xf32, #tpu.memory_space<vmem>>, vector<1x128xf32>
    %192 = vector.broadcast %191 : vector<1x128xf32> to vector<16x128xf32>
    %193 = arith.addf %190, %192 : vector<16x128xf32>
    %c0_299 = arith.constant 0 : index
    %c0_300 = arith.constant 0 : index
    %194 = vector.load %arg9[%c0_299, %c0_300] : memref<16x128xf32, #tpu.memory_space<vmem>>, vector<16x128xf32>
    tpu.vector_store %arg9[%c0_299, %c0_300], %193 {strides = array<i32>} : memref<16x128xf32, #tpu.memory_space<vmem>>, vector<16x128xf32>,
    return
  }
}

</mosaic_0001>

<bundles_post_ra>
// kernel: discriminator_forward.1
= control target key start
LH: loop header
LB: loop body
LE: loop exit
PB: predicated region body
PF: predicated region fallthrough
CT: control target
= control target key end

     0   :  { %vm251_vm0 = vcmask 130048   ;;  %v471_v44 = vlaneseq  ;;  %s4686_s21 = smov 16   ;;  %s4687_s22 = smov 80   ;;  %s6480_s1 = inlined_call_operand.vmem [shape: bf16[16,16], index: 1, kind: input, shape index: {}]   ;;  %s6481_s0 = inlined_call_operand.vmem [shape: bf16[416,16], index: 0, kind: input, shape index: {}]   ;;  %s6482_s2 = inlined_call_operand.vmem [shape: f32[1,16], index: 2, kind: input, shape index: {}]   ;;  %s6483_s3 = inlined_call_operand.vmem [shape: f32[1,16], index: 3, kind: input, shape index: {}]   ;;  %s6484_s4 = inlined_call_operand.vmem [shape: bf16[256,32], index: 4, kind: input, shape index: {}]   ;;  %s6485_s5 = inlined_call_operand.vmem [shape: f32[1,32], index: 5, kind: input, shape index: {}]   ;;  %s6486_s6 = inlined_call_operand.vmem [shape: f32[1,32], index: 6, kind: input, shape index: {}]   ;;  %s6487_s7 = inlined_call_operand.vmem [shape: bf16[512,128], index: 7, kind: input, shape index: {}]   ;;  %s6488_s8 = inlined_call_operand.vmem [shape: f32[1,128], index: 8, kind: input, shape index: {}]   ;;  %s6489_s9 = inlined_call_operand.vmem [shape: f32[16,128], index: 9, kind: output, shape index: {}]  }
   0x1   :  { %v4619_v0 = vld [vmem:[%s6480_s1] sm:$0xff]  ;;  %v4594_v2 = vld [vmem:[%s6481_s0 + $0x8] sm:$0xff]  ;;  %v4595_v3 = vld [vmem:[%s6481_s0 + $0x10] sm:$0xff]  ;;  %s4688_s23 = smov 64   ;;  %s4689_s24 = smov 96  }
   0x2   :  { %v4593_v1 = vld [vmem:[%s6481_s0] sm:$0xff]  ;;  %337 = vmatpush.bf16.msra.mxu0 %v4619_v0  ;;  %4669 = vmatpush.bf16.msra.mxu2 %v4619_v0  ;;  %v4596_v4 = vld [vmem:[%s6481_s0 + $0x18] sm:$0xff]  ;;  %v4598_v6 = vld [vmem:[%s6481_s0 + $0x28] sm:$0xff]  ;;  %v4885_v46 = vshrl.u32 %v471_v44, 7  ;;  %s4690_s25 = smov 112  }
   0x3   :  { %4670 = vmatpush.bf16.msra.mxu3 %v4619_v0  ;;  %4668 = vmatpush.bf16.msra.mxu1 %v4619_v0  ;;  %v4597_v5 = vld [vmem:[%s6481_s0 + $0x20] sm:$0xff]  ;;  %v4607_v7 = vld [vmem:[%s6481_s0 + $0x70] sm:$0xff]  ;;  %v4608_v9 = vld [vmem:[%s6481_s0 + $0x78] sm:$0xff] }
   0x4   :  { %v4599_v8 = vld [vmem:[%s6481_s0 + $0x30] sm:$0xff]  ;;  %v4613_v10 = vld [vmem:[%s6481_s0 + $0xa0] sm:$0xff]  ;;  %v4600_v11 = vld [vmem:[%s6481_s0 + $0x38] sm:$0xff]  ;;  %6558 = vst [vmem:[#allocation10_spill] sm:$0xff] %v4885_v46  ;;  %v4890_v48 = vadd.s32 8, %v4885_v46  ;;  %v4896_v51 = vadd.s32 24, %v4885_v46 }
   0x5   :  { %4375 = vmatmul.msk.bf16.vlgmr.msra.gmra.mxu0 %vm251_vm0, %v4593_v1  ;;  %4389 = vmatmul.msk.bf16.vlgmr.msra.gmra.mxu2 %vm251_vm0, %v4607_v7  ;;  %v4609_v12 = vld [vmem:[%s6481_s0 + $0x80] sm:$0xff]  ;;  %v4614_v13 = vld [vmem:[%s6481_s0 + $0xa8] sm:$0xff]  ;;  %v4615_v19 = vld [vmem:[%s6481_s0 + $0xb0] sm:$0xff]  ;;  %v4908_v56 = vadd.s32 40, %v4885_v46  ;;  %v4921_v61 = vadd.s32 56, %v4885_v46 }
   0x6   :  { %4395 = vmatmul.msk.bf16.vlgmr.msra.gmra.mxu3 %vm251_vm0, %v4613_v10  ;;  %v4601_v14 = vld [vmem:[%s6481_s0 + $0x40] sm:$0xff]  ;;  %v4610_v17 = vld [vmem:[%s6481_s0 + $0x88] sm:$0xff]  ;;  %v4611_v23 = vld [vmem:[%s6481_s0 + $0x90] sm:$0xff]  ;;  %6559 = vst [vmem:[#allocation11_spill] sm:$0xff] %v4890_v48  ;;  %v535_v50 = vand.u32 15, %v4890_v48  ;;  %v549_v55 = vand.u32 15, %v4896_v51 }
   0x7   :  { %v4605_v16 = vld [vmem:[%s6481_s0 + $0x60] sm:$0xff]  ;;  %v4602_v20 = vld [vmem:[%s6481_s0 + $0x48] sm:$0xff]  ;;  %v4616_v25 = vld [vmem:[%s6481_s0 + $0xb8] sm:$0xff]  ;;  %6560 = vst [vmem:[#allocation12_spill] sm:$0xff] %v4896_v51  ;;  %v563_v60 = vand.u32 15, %v4908_v56 }
   0x8   :  { %4387 = vmatmul.msk.bf16.vlgmr.msra.gmra.mxu1 %vm251_vm0, %v4605_v16  ;;  %v4606_v22 = vld [vmem:[%s6481_s0 + $0x68] sm:$0xff]  ;;  %v4603_v26 = vld [vmem:[%s6481_s0 + $0x50] sm:$0xff]  ;;  %v4612_v28 = vld [vmem:[%s6481_s0 + $0x98] sm:$0xff]  ;;  %vm4902_vm1 = vcmp.lt.s32.totalorder %v535_v50, 13  ;;  %6563 = vst [vmem:[#allocation13_spill] sm:$0xff] %v4908_v56  ;;  %vm4915_vm2 = vcmp.lt.s32.totalorder %v549_v55, 13 }
   0x9   :  { %v4617_v30 = vld [vmem:[%s6481_s0 + $0xc0] sm:$0xff]  ;;  %v4604_v31 = vld [vmem:[%s6481_s0 + $0x58] sm:$0xff]  ;;  %v4618_v34 = vld [vmem:[%s6481_s0 + $0xc8] sm:$0xff]  ;;  %6566 = vst [vmem:[#allocation14_spill] sm:$0xff] %v4921_v61  ;;  %vm4933_vm3 = vcmp.lt.s32.totalorder %v563_v60, 13  ;;  %v483_v16 = vadd.s32 88, %v4885_v46 }
  0x15   :  { %4376 = vmatmul.msk.bf16.gmra.mxu0 %vm251_vm0, %v4594_v2  ;;  %4390 = vmatmul.msk.bf16.gmra.mxu2 %vm251_vm0, %v4608_v9 }
  0x16   :  { %4396 = vmatmul.msk.bf16.gmra.mxu3 %vm251_vm0, %v4614_v13 }
  0x18   :  { %4388 = vmatmul.msk.bf16.gmra.mxu1 %vm251_vm0, %v4606_v22 }
  0x25   :  { %4377 = vmatmul.msk.bf16.gmra.mxu0 %vm251_vm0, %v4595_v3  ;;  %4391 = vmatmul.msk.bf16.gmra.mxu2 %vm251_vm0, %v4609_v12 }
  0x26   :  { %4397 = vmatmul.msk.bf16.gmra.mxu3 %vm251_vm0, %v4615_v19 }
  0x35   :  { %4378 = vmatmul.msk.bf16.gmra.mxu0 %vm251_vm0, %v4596_v4  ;;  %4392 = vmatmul.msk.bf16.gmra.mxu2 %vm251_vm0, %v4610_v17  ;;  %v577_v4 = vand.u32 15, %v4921_v61 }
  0x36   :  { %4398 = vmatmul.msk.bf16.gmra.mxu3 %vm251_vm0, %v4616_v25 }
  0x37   :  { %vm4951_vm4 = vcmp.lt.s32.totalorder %v577_v4, 13 }
  0x45   :  { %4379 = vmatmul.msk.bf16.gmra.mxu0 %vm251_vm0, %v4597_v5  ;;  %4393 = vmatmul.msk.bf16.gmra.mxu2 %vm251_vm0, %v4611_v23  ;;  %v4939_v5 = vadd.s32 72, %v4885_v46 }
  0x46   :  { %4399 = vmatmul.msk.bf16.gmra.mxu3 %vm251_vm0, %v4617_v30 }
  0x47   :  { %6569 = vst [vmem:[#allocation15_spill] sm:$0xff] %v4939_v5 }
  0x55   :  { %4380 = vmatmul.msk.bf16.gmra.mxu0 %vm251_vm0, %v4598_v6  ;;  %4394 = vmatmul.msk.bf16.gmra.mxu2 %vm251_vm0, %v4612_v28  ;;  %v485_v28 = vadd.s32 104, %v4885_v46 }
  0x56   :  { %4400 = vmatmul.msk.bf16.gmra.mxu3 %vm251_vm0, %v4618_v34 }
  0x65   :  { %4381 = vmatmul.msk.bf16.gmra.mxu0 %vm251_vm0, %v4599_v8 }
  0x75   :  { %4382 = vmatmul.msk.bf16.gmra.mxu0 %vm251_vm0, %v4600_v11 }
  0x82   :  { %v4800_v15 = vpop.f32.mrf.mxu0 }
  0x83   :  { %v1356_v63 = vsel %vm251_vm0, %v4800_v15, 0.0 }
  0x85   :  { %4383 = vmatmul.msk.bf16.gmra.mxu0 %vm251_vm0, %v4601_v14  ;;  %v591_v14 = vand.u32 15, %v4939_v5 }
  0x87   :  { %vm4963_vm5 = vcmp.lt.s32.totalorder %v591_v14, 13  ;;  %v489_v14 = vadd.s32 136, %v4885_v46 }
  0x88   :  { %v4875_v40 = vpop.f32.mrf.mxu2 }
  0x89   :  { %6557 = vst [vmem:[#allocation9_spill] sm:$0xff] %v4875_v40  ;;  %v4898_v52 = vpop.f32.mrf.mxu3 }
  0x8a   :  { %v4811_v18 = vpop.f32.mrf.mxu0 }
  0x8b   :  { %v1305_v58 = vsel %vm4902_vm1, %v4811_v18, 0.0 }
  0x8c   :  { %v1357_v62 = vsel %vm251_vm0, %v1305_v58, 0.0 }
  0x8d   :  { %v1358_v7 = vadd.f32 %v1357_v62, %v1356_v63  ;;  %v619_v63 = vand.u32 15, %v485_v28 }
  0x8f   :  { %vm4991_vm7 = vcmp.lt.s32.totalorder %v619_v63, 13 }
  0x90   :  { %v4881_v43 = vpop.f32.mrf.mxu2 }
  0x91   :  { %v4929_v1 = vpop.f32.mrf.mxu3 }
  0x92   :  { %v4820_v21 = vpop.f32.mrf.mxu0 }
  0x93   :  { %6554 = vst [vmem:[#allocation6_spill] sm:$0xff] %v4820_v21  ;;  %v1359_v2 = vsel %vm251_vm0, %v4820_v21, 0.0 }
  0x94   :  { %v1360_v10 = vadd.f32 %v1359_v2, %v1358_v7 }
  0x95   :  { %4384 = vmatmul.msk.bf16.gmra.mxu0 %vm251_vm0, %v4602_v20 }
  0x98   :  { %v4887_v47 = vpop.f32.mrf.mxu2 }
  0x9a   :  { %v4831_v24 = vpop.f32.mrf.mxu0 }
  0x9b   :  { %6555 = vst [vmem:[#allocation7_spill] sm:$0xff] %v4831_v24  ;;  %v1307_v0 = vsel %vm4915_vm2, %v4831_v24, 0.0 }
  0x9c   :  { %v1361_v8 = vsel %vm251_vm0, %v1307_v0, 0.0  ;;  %v487_v0 = vadd.s32 120, %v4885_v46 }
  0x9d   :  { %v1362_v17 = vadd.f32 %v1361_v8, %v1360_v10 }
  0xa0   :  { %v4900_v53 = vpop.f32.mrf.mxu2 }
  0xa2   :  { %v4840_v27 = vpop.f32.mrf.mxu0 }
  0xa3   :  { %v1363_v12 = vsel %vm251_vm0, %v4840_v27, 0.0 }
  0xa4   :  { %v1364_v20 = vadd.f32 %v1363_v12, %v1362_v17  ;;  %v633_v12 = vand.u32 15, %v487_v0 }
  0xa5   :  { %4385 = vmatmul.msk.bf16.gmra.mxu0 %vm251_vm0, %v4603_v26  ;;  %v605_v26 = vand.u32 15, %v483_v16  ;;  %v4996_v16 = vpop.f32.mrf.mxu1 }
  0xa6   :  { %6581 = vst [vmem:[#allocation19_spill] sm:$0xff] %v4996_v16  ;;  %vm5008_vm8 = vcmp.lt.s32.totalorder %v633_v12, 13 }
  0xa7   :  { %vm4980_vm6 = vcmp.lt.s32.totalorder %v605_v26, 13 }
  0xa8   :  { %v4941_v6 = vpop.f32.mrf.mxu2 }
  0xa9   :  { %6570 = vst [vmem:[#allocation16_spill] sm:$0xff] %v4941_v6 }
  0xaa   :  { %v4847_v29 = vpop.f32.mrf.mxu0 }
  0xab   :  { %v1309_v11 = vsel %vm4933_vm3, %v4847_v29, 0.0 }
  0xac   :  { %v1365_v19 = vsel %vm251_vm0, %v1309_v11, 0.0 }
  0xad   :  { %v1366_v30 = vadd.f32 %v1365_v19, %v1364_v20 }
  0xb0   :  { %v4973_v50 = vpop.f32.mrf.mxu2 }
  0xb2   :  { %v4856_v32 = vpop.f32.mrf.mxu0 }
  0xb3   :  { %v1367_v23 = vsel %vm251_vm0, %v4856_v32, 0.0 }
  0xb4   :  { %v1368_v55 = vadd.f32 %v1367_v23, %v1366_v30 }
  0xb5   :  { %4386 = vmatmul.msk.bf16.gmra.mxu0 %vm251_vm0, %v4604_v31  ;;  %v4968_v31 = vpop.f32.mrf.mxu3 }
  0xb6   :  { %6576 = vst [vmem:[#allocation18_spill] sm:$0xff] %v4968_v31 }
  0xba   :  { %v4859_v33 = vpop.f32.mrf.mxu0 }
  0xbb   :  { %6556 = vst [vmem:[#allocation8_spill] sm:$0xff] %v4859_v33  ;;  %v1311_v22 = vsel %vm4951_vm4, %v4859_v33, 0.0 }
  0xbc   :  { %v1369_v34 = vsel %vm251_vm0, %v1311_v22, 0.0 }
  0xbd   :  { %v1370_v2 = vadd.f32 %v1369_v34, %v1368_v55  ;;  %v5004_v26 = vpop.f32.mrf.mxu3  ;;  %v647_v34 = vand.u32 15, %v489_v14  ;;  %v491_v55 = vadd.s32 152, %v4885_v46 }
  0xbf   :  { %vm5021_vm9 = vcmp.lt.s32.totalorder %v647_v34, 13  ;;  %v6589_v34 = vmov 0 }
  0xc2   :  { %v4865_v35 = vpop.f32.mrf.mxu0 }
  0xc3   :  { %v1371_v60 = vsel %vm251_vm0, %v4865_v35, 0.0 }
  0xc4   :  { %v1372_v7 = vadd.f32 %v1371_v60, %v1370_v2 }
  0xca   :  { %v4867_v36 = vpop.f32.mrf.mxu0 }
  0xcb   :  { %v1313_v58 = vsel %vm4963_vm5, %v4867_v36, 0.0 }
  0xcc   :  { %v1373_v4 = vsel %vm251_vm0, %v1313_v58, 0.0  ;;  %v5013_v58 = vpop.f32.mrf.mxu2 }
  0xcd   :  { %v1374_v17 = vadd.f32 %v1373_v4, %v1372_v7  ;;  %6585 = vst [vmem:[#allocation21_spill] sm:$0xff] %v5013_v58 }
  0xd2   :  { %v4869_v37 = vpop.f32.mrf.mxu0 }
  0xd3   :  { %v1375_v10 = vsel %vm251_vm0, %v4869_v37, 0.0 }
  0xd4   :  { %v1376_v22 = vadd.f32 %v1375_v10, %v1374_v17  ;;  %v493_v10 = vadd.s32 168, %v4885_v46 }
  0xda   :  { %v4871_v38 = vpop.f32.mrf.mxu0 }
  0xdb   :  { %v1315_v8 = vsel %vm4980_vm6, %v4871_v38, 0.0 }
  0xdc   :  { %v1377_v19 = vsel %vm251_vm0, %v1315_v8, 0.0  ;;  %v661_v8 = vand.u32 15, %v491_v55  ;;  %v675_v55 = vand.u32 15, %v493_v10  ;;  %v495_v10 = vadd.s32 184, %v4885_v46 }
  0xdd   :  { %v1378_v60 = vadd.f32 %v1377_v19, %v1376_v22  ;;  %v5029_v19 = vpop.f32.mrf.mxu1 }
  0xde   :  { %vm5036_vm10 = vcmp.lt.s32.totalorder %v661_v8, 13  ;;  %vm5050_vm11 = vcmp.lt.s32.totalorder %v675_v55, 13  ;;  %v6592_v8 = vmov 0  ;;  %v689_v51 = vand.u32 15, %v495_v10 }
  0xdf   :  { %v6590_v34 = vsel %vm5036_vm10, 4294967295, %v6589_v34  ;;  %v6593_v8 = vsel %vm5050_vm11, 4294967295, %v6592_v8  ;;  %v501_v10 = vadd.s32 232, %v4885_v46 }
  0xe0   :  { %6591 = vst [vmem:[#allocation23_spill] sm:$0xff] %v6590_v34  ;;  %vm5072_vm12 = vcmp.lt.s32.totalorder %v689_v51, 13 }
  0xe1   :  { %6594 = vst [vmem:[#allocation24_spill] sm:$0xff] %v6593_v8 }
  0xe2   :  { %v4873_v39 = vpop.f32.mrf.mxu0 }
  0xe3   :  { %v1379_v28 = vsel %vm251_vm0, %v4873_v39, 0.0 }
  0xe4   :  { %v1380_v0 = vadd.f32 %v1379_v28, %v1378_v60 }
  0xe5   :  { %v5064_v56 = vpop.f32.mrf.mxu1 }
  0xe6   :  { %6596 = vst [vmem:[#allocation26_spill] sm:$0xff] %v5064_v56 }
  0xea   :  { %v4877_v41 = vpop.f32.mrf.mxu0 }
  0xeb   :  { %v1317_v23 = vsel %vm4991_vm7, %v4877_v41, 0.0 }
  0xec   :  { %v1381_v63 = vsel %vm251_vm0, %v1317_v23, 0.0 }
  0xed   :  { %v1382_v12 = vadd.f32 %v1381_v63, %v1380_v0  ;;  %v5040_v63 = vpop.f32.mrf.mxu3 }
  0xf2   :  { %v4879_v42 = vpop.f32.mrf.mxu0 }
  0xf3   :  { %v1383_v4 = vsel %vm251_vm0, %v4879_v42, 0.0 }
  0xf4   :  { %v1384_v22 = vadd.f32 %v1383_v4, %v1382_v12 }
  0xfa   :  { %v4883_v45 = vpop.f32.mrf.mxu0 }
  0xfb   :  { %v1319_v2 = vsel %vm5008_vm8, %v4883_v45, 0.0 }
  0xfc   :  { %v1385_v14 = vsel %vm251_vm0, %v1319_v2, 0.0  ;;  %v5043_v2 = vpop.f32.mrf.mxu2 }
  0xfd   :  { %v1386_v60 = vadd.f32 %v1385_v14, %v1384_v22 }
 0x102   :  { %v4892_v49 = vpop.f32.mrf.mxu0 }
 0x103   :  { %v1387_v28 = vsel %vm251_vm0, %v4892_v49, 0.0 }
 0x104   :  { %v1388_v4 = vadd.f32 %v1387_v28, %v1386_v60  ;;  %v5076_v8 = vpop.f32.mrf.mxu2 }
 0x105   :  { %6599 = vst [vmem:[#allocation27_spill] sm:$0xff] %v5076_v8 }
 0x10a   :  { %v4910_v57 = vpop.f32.mrf.mxu0 }
 0x10b   :  { %v1321_v23 = vsel %vm5021_vm9, %v4910_v57, 0.0 }
 0x10c   :  { %v1389_v0 = vsel %vm251_vm0, %v1321_v23, 0.0  ;;  %v497_v23 = vadd.s32 200, %v4885_v46 }
 0x10d   :  { %v1390_v14 = vadd.f32 %v1389_v0, %v1388_v4 }
 0x10e   :  { %v703_v4 = vand.u32 15, %v497_v23 }
 0x110   :  { %vm5079_vm13 = vcmp.lt.s32.totalorder %v703_v4, 13  ;;  %v503_v4 = vadd.s32 248, %v4885_v46 }
 0x112   :  { %v4944_v9 = vpop.f32.mrf.mxu0 }
 0x113   :  { %6571 = vst [vmem:[#allocation17_spill] sm:$0xff] %v4944_v9  ;;  %v1391_v5 = vsel %vm251_vm0, %v4944_v9, 0.0  ;;  %v5068_v9 = vpop.f32.mrf.mxu3 }
 0x114   :  { %v1392_v28 = vadd.f32 %v1391_v5, %v1390_v14  ;;  %v6653_v14 = vld [vmem:[#allocation26_spill] sm:$0xff] }
 0x11a   :  { %v4971_v44 = vpop.f32.mrf.mxu0  ;;  %v6644_v30 = vld [vmem:[#allocation17_spill] sm:$0xff] }
 0x11b   :  { %v1323_v12 = vsel %vm5036_vm10, %v4971_v44, 0.0 }
 0x11c   :  { %v1393_v22 = vsel %vm251_vm0, %v1323_v12, 0.0  ;;  %v499_v12 = vadd.s32 216, %v4885_v46 }
 0x11d   :  { %v1394_v48 = vadd.f32 %v1393_v22, %v1392_v28  ;;  %v6600_v22 = vmov 0 }
 0x11e   :  { %v6601_v22 = vsel %vm5079_vm13, 4294967295, %v6600_v22 }
 0x11f   :  { %6602 = vst [vmem:[#allocation28_spill] sm:$0xff] %v6601_v22  ;;  %v745_v22 = vand.u32 15, %v503_v4  ;;  %v6612_v4 = vmov 0 }
 0x122   :  { %v4999_v20 = vpop.f32.mrf.mxu0 }
 0x123   :  { %6582 = vst [vmem:[#allocation20_spill] sm:$0xff] %v4999_v20  ;;  %v1395_v55 = vsel %vm251_vm0, %v4999_v20, 0.0 }
 0x124   :  { %v1396_v34 = vadd.f32 %v1395_v55, %v1394_v48  ;;  %v717_v48 = vand.u32 15, %v499_v12 }
 0x126   :  { %vm5097_vm14 = vcmp.lt.s32.totalorder %v717_v48, 13  ;;  %v505_v48 = vadd.s32 264, %v4885_v46 }
 0x12a   :  { %v5027_v17 = vpop.f32.mrf.mxu0  ;;  %v6647_v7 = vld [vmem:[#allocation20_spill] sm:$0xff] }
 0x12b   :  { %6588 = vst [vmem:[#allocation22_spill] sm:$0xff] %v5027_v17  ;;  %v1325_v60 = vsel %vm5050_vm11, %v5027_v17, 0.0  ;;  %v5095_v17 = vpop.f32.mrf.mxu1 }
 0x12c   :  { %v1397_v0 = vsel %vm251_vm0, %v1325_v60, 0.0  ;;  %6604 = vst [vmem:[#allocation30_spill] sm:$0xff] %v5095_v17 }
 0x12d   :  { %v1398_v20 = vadd.f32 %v1397_v0, %v1396_v34  ;;  %v1329_v34 = vsel %vm5079_vm13, %v5029_v19, 0.0  ;;  %v731_v0 = vand.u32 15, %v501_v10  ;;  %v5105_v10 = vpop.f32.mrf.mxu3 }
 0x12e   :  { %6608 = vst [vmem:[#allocation32_spill] sm:$0xff] %v5105_v10 }
 0x12f   :  { %vm5107_vm15 = vcmp.lt.s32.totalorder %v731_v0, 13  ;;  %v1411_v0 = vsel %vm251_vm0, %v4875_v40, 0.0 }
 0x132   :  { %v5057_v61 = vpop.f32.mrf.mxu0 }
 0x133   :  { %6595 = vst [vmem:[#allocation25_spill] sm:$0xff] %v5057_v61  ;;  %v1399_v5 = vsel %vm251_vm0, %v5057_v61, 0.0  ;;  %v1403_v61 = vsel %vm251_vm0, %v4996_v16, 0.0  ;;  %v1407_v16 = vsel %vm251_vm0, %v5064_v56, 0.0  ;;  %v507_v56 = vadd.s32 280, %v4885_v46 }
 0x134   :  { %v1400_v28 = vadd.f32 %v1399_v5, %v1398_v20  ;;  %v6605_v20 = vmov 0  ;;  %v1405_v5 = vsel %vm251_vm0, %v1329_v34, 0.0 }
 0x135   :  { %v6606_v20 = vsel %vm5097_vm14, 4294967295, %v6605_v20  ;;  %v5138_v40 = vpop.f32.mrf.mxu3 }
 0x136   :  { %6607 = vst [vmem:[#allocation31_spill] sm:$0xff] %v6606_v20  ;;  %v759_v20 = vand.u32 15, %v505_v48  ;;  %v509_v48 = vadd.s32 296, %v4885_v46 }
 0x13a   :  { %v5083_v23 = vpop.f32.mrf.mxu0 }
 0x13b   :  { %6603 = vst [vmem:[#allocation29_spill] sm:$0xff] %v5083_v23  ;;  %v1327_v51 = vsel %vm5072_vm12, %v5083_v23, 0.0 }
 0x13c   :  { %v1401_v60 = vsel %vm251_vm0, %v1327_v51, 0.0 }
 0x13d   :  { %v1402_v55 = vadd.f32 %v1401_v60, %v1400_v28  ;;  %v1331_v28 = vsel %vm5097_vm14, %v5095_v17, 0.0  ;;  %v6609_v60 = vmov 0  ;;  %vm5122_vm14 = vcmp.lt.s32.totalorder %v745_v22, 13 }
 0x13e   :  { %v6610_v60 = vsel %vm5107_vm15, 4294967295, %v6609_v60  ;;  %v6613_v4 = vsel %vm5122_vm14, 4294967295, %v6612_v4  ;;  %v773_v22 = vand.u32 15, %v507_v56  ;;  %v787_v56 = vand.u32 15, %v509_v48 }
 0x13f   :  { %v1404_v12 = vadd.f32 %v1403_v61, %v1402_v55  ;;  %6611 = vst [vmem:[#allocation33_spill] sm:$0xff] %v6610_v60  ;;  %v5114_v61 = vpop.f32.mrf.mxu2  ;;  %v1409_v55 = vsel %vm251_vm0, %v1331_v28, 0.0 }
 0x140   :  { %6614 = vst [vmem:[#allocation34_spill] sm:$0xff] %v6613_v4 }
 0x141   :  { %v1406_v51 = vadd.f32 %v1405_v5, %v1404_v12  ;;  %v1333_v12 = vsel %vm5107_vm15, %v4881_v43, 0.0  ;;  %vm5133_vm15 = vcmp.lt.s32.totalorder %v759_v20, 13  ;;  %v1419_v20 = vsel %vm251_vm0, %v4941_v6, 0.0 }
 0x143   :  { %v1408_v34 = vadd.f32 %v1407_v16, %v1406_v51  ;;  %v1413_v16 = vsel %vm251_vm0, %v1333_v12, 0.0  ;;  %v1335_v51 = vsel %vm5122_vm14, %v4900_v53, 0.0  ;;  %vm5148_vm14 = vcmp.lt.s32.totalorder %v773_v22, 13 }
 0x144   :  { %v1417_v12 = vsel %vm251_vm0, %v1335_v51, 0.0  ;;  %v1339_v4 = vsel %vm5148_vm14, %v5043_v2, 0.0  ;;  %v6622_v22 = vmov 0 }
 0x145   :  { %v1410_v5 = vadd.f32 %v1409_v55, %v1408_v34  ;;  %v1415_v34 = vsel %vm251_vm0, %v4887_v47, 0.0  ;;  %v6615_v55 = vmov 0 }
 0x146   :  { %v6616_v55 = vsel %vm5133_vm15, 4294967295, %v6615_v55 }
 0x147   :  { %v1412_v17 = vadd.f32 %v1411_v0, %v1410_v5  ;;  %6617 = vst [vmem:[#allocation35_spill] sm:$0xff] %v6616_v55  ;;  %v5141_v5 = vpop.f32.mrf.mxu2 }
 0x148   :  { %6618 = vst [vmem:[#allocation36_spill] sm:$0xff] %v5141_v5 }
 0x149   :  { %v1414_v28 = vadd.f32 %v1413_v16, %v1412_v17  ;;  %v1337_v17 = vsel %vm5133_vm15, %v4973_v50, 0.0  ;;  %v6619_v16 = vmov 0  ;;  %vm5160_vm15 = vcmp.lt.s32.totalorder %v787_v56, 13 }
 0x14a   :  { %v6620_v16 = vsel %vm5148_vm14, 4294967295, %v6619_v16  ;;  %v1421_v51 = vsel %vm251_vm0, %v1337_v17, 0.0  ;;  %v6623_v22 = vsel %vm5160_vm15, 4294967295, %v6622_v22  ;;  %v1341_v17 = vsel %vm5160_vm15, %v5114_v61, 0.0 }
 0x14b   :  { %v1416_v60 = vadd.f32 %v1415_v34, %v1414_v28  ;;  %6621 = vst [vmem:[#allocation37_spill] sm:$0xff] %v6620_v16  ;;  %v511_v28 = vadd.s32 312, %v4885_v46  ;;  %v5168_v16 = vpop.f32.mrf.mxu3  ;;  %v1427_v56 = vsel %vm251_vm0, %v5076_v8, 0.0 }
 0x14c   :  { %6624 = vst [vmem:[#allocation38_spill] sm:$0xff] %v6623_v22  ;;  %v517_v22 = vadd.s32 360, %v4885_v46 }
 0x14d   :  { %v1418_v0 = vadd.f32 %v1417_v12, %v1416_v60  ;;  %v513_v60 = vadd.s32 328, %v4885_v46  ;;  %v1423_v12 = vsel %vm251_vm0, %v5013_v58, 0.0  ;;  %v801_v48 = vand.u32 15, %v511_v28  ;;  %6625 = vst [vmem:[#allocation39_spill] sm:$0xff] %v5168_v16 }
 0x14e   :  { %v6626_v28 = vmov 0 }
 0x14f   :  { %v1420_v34 = vadd.f32 %v1419_v20, %v1418_v0  ;;  %v1425_v0 = vsel %vm251_vm0, %v1339_v4, 0.0  ;;  %v5173_v58 = vpop.f32.mrf.mxu2  ;;  %vm5175_vm14 = vcmp.lt.s32.totalorder %v801_v48, 13  ;;  %v1431_v48 = vsel %vm251_vm0, %v5141_v5, 0.0 }
 0x150   :  { %v6627_v28 = vsel %vm5175_vm14, 4294967295, %v6626_v28 }
 0x151   :  { %v1422_v55 = vadd.f32 %v1421_v51, %v1420_v34  ;;  %v815_v34 = vand.u32 15, %v513_v60  ;;  %v515_v51 = vadd.s32 344, %v4885_v46  ;;  %6628 = vst [vmem:[#allocation40_spill] sm:$0xff] %v6627_v28  ;;  %v6629_v60 = vmov 0 }
 0x153   :  { %v1424_v6 = vadd.f32 %v1423_v12, %v1422_v55  ;;  %v1343_v12 = vsel %vm5175_vm14, %v5173_v58, 0.0  ;;  %vm5183_vm15 = vcmp.lt.s32.totalorder %v815_v34, 13  ;;  %v1435_v34 = vsel %vm251_vm0, %v4898_v52, 0.0  ;;  %v5201_v5 = vpop.f32.mrf.mxu3 }
 0x154   :  { %v6630_v60 = vsel %vm5183_vm15, 4294967295, %v6629_v60 }
 0x155   :  { %v1426_v20 = vadd.f32 %v1425_v0, %v1424_v6  ;;  %v1429_v6 = vsel %vm251_vm0, %v1341_v17, 0.0  ;;  %v829_v0 = vand.u32 15, %v515_v51  ;;  %v1345_v17 = vsel %vm5183_vm15, %v4929_v1, 0.0 }
 0x156   :  { %v843_v51 = vand.u32 15, %v517_v22 }
 0x157   :  { %v1428_v4 = vadd.f32 %v1427_v56, %v1426_v20  ;;  %v1433_v20 = vsel %vm251_vm0, %v1343_v12, 0.0  ;;  %vm5196_vm14 = vcmp.lt.s32.totalorder %v829_v0, 13  ;;  %v6634_v0 = vmov 0 }
 0x158   :  { %v1347_v12 = vsel %vm5196_vm14, %v5004_v26, 0.0  ;;  %vm5209_vm15 = vcmp.lt.s32.totalorder %v843_v51, 13 }
 0x159   :  { %v1430_v55 = vadd.f32 %v1429_v6, %v1428_v4  ;;  %v6631_v4 = vmov 0  ;;  %v519_v6 = vadd.s32 376, %v4885_v46  ;;  %v6635_v0 = vsel %vm5209_vm15, 4294967295, %v6634_v0 }
 0x15a   :  { %v6632_v4 = vsel %vm5196_vm14, 4294967295, %v6631_v4 }
 0x15b   :  { %v1432_v8 = vadd.f32 %v1431_v48, %v1430_v55  ;;  %6633 = vst [vmem:[#allocation41_spill] sm:$0xff] %v6632_v4  ;;  %v1437_v55 = vsel %vm251_vm0, %v1345_v17, 0.0  ;;  %v1439_v48 = vsel %vm251_vm0, %v4968_v31, 0.0  ;;  %v857_v22 = vand.u32 15, %v519_v6 }
 0x15c   :  { %v1349_v17 = vsel %vm5209_vm15, %v5068_v9, 0.0 }
 0x15d   :  { %v1434_v56 = vadd.f32 %v1433_v20, %v1432_v8  ;;  %vm5220_vm14 = vcmp.lt.s32.totalorder %v857_v22, 13  ;;  %v1445_v6 = vsel %vm251_vm0, %v1349_v17, 0.0  ;;  %v6639_v22 = vmov 0 }
 0x15f   :  { %v1436_v28 = vadd.f32 %v1435_v34, %v1434_v56  ;;  %v521_v56 = vadd.s32 392, %v4885_v46  ;;  %v1441_v34 = vsel %vm251_vm0, %v1347_v12, 0.0  ;;  %v1351_v12 = vsel %vm5220_vm14, %v5138_v40, 0.0 }
 0x161   :  { %v1438_v8 = vadd.f32 %v1437_v55, %v1436_v28  ;;  %v1443_v28 = vsel %vm251_vm0, %v5040_v63, 0.0  ;;  %v6636_v55 = vmov 0  ;;  %v871_v31 = vand.u32 15, %v521_v56 }
 0x162   :  { %v6637_v55 = vsel %vm5220_vm14, 4294967295, %v6636_v55  ;;  %v1449_v56 = vsel %vm251_vm0, %v1351_v12, 0.0 }
 0x163   :  { %v1440_v20 = vadd.f32 %v1439_v48, %v1438_v8  ;;  %6638 = vst [vmem:[#allocation42_spill] sm:$0xff] %v6637_v55  ;;  %v5228_v48 = vpop.f32.mrf.mxu3  ;;  %vm5232_vm15 = vcmp.lt.s32.totalorder %v871_v31, 13 }
 0x164   :  { %v6640_v22 = vsel %vm5232_vm15, 4294967295, %v6639_v22  ;;  %v1455_v12 = vsel %vm251_vm0, %v5228_v48, 0.0 }
 0x165   :  { %v1442_v4 = vadd.f32 %v1441_v34, %v1440_v20  ;;  %v1447_v20 = vsel %vm251_vm0, %v5105_v10, 0.0  ;;  %6641 = vst [vmem:[#allocation43_spill] sm:$0xff] %v6640_v22 }
 0x167   :  { %v1444_v51 = vadd.f32 %v1443_v28, %v1442_v4  ;;  %v523_v4 = vadd.s32 408, %v4885_v46  ;;  %v1451_v28 = vsel %vm251_vm0, %v5168_v16, 0.0 }
 0x169   :  { %v1446_v8 = vadd.f32 %v1445_v6, %v1444_v51  ;;  %v1353_v51 = vsel %vm5232_vm15, %v5201_v5, 0.0  ;;  %v885_v55 = vand.u32 15, %v523_v4 }
 0x16b   :  { %v1448_v34 = vadd.f32 %v1447_v20, %v1446_v8  ;;  %v1453_v8 = vsel %vm251_vm0, %v1353_v51, 0.0  ;;  %v5244_v20 = vpop.f32.mrf.mxu3  ;;  %vm5246_vm14 = vcmp.lt.s32.totalorder %v885_v55, 13 }
 0x16d   :  { %v1450_v17 = vadd.f32 %v1449_v56, %v1448_v34  ;;  %v1355_v56 = vsel %vm5246_vm14, %v5244_v20, 0.0 }
 0x16f   :  { %v1452_v6 = vadd.f32 %v1451_v28, %v1450_v17  ;;  %v1457_v17 = vsel %vm251_vm0, %v1355_v56, 0.0 }
 0x171   :  { %v1454_v31 = vadd.f32 %v1453_v8, %v1452_v6 }
 0x173   :  { %v1456_v34 = vadd.f32 %v1455_v12, %v1454_v31 }
 0x175   :  { %v1458_v4 = vadd.f32 %v1457_v17, %v1456_v34 }
 0x177   :  { %v1459_v28 = vrot.slane %v1458_v4, 4 }
 0x179   :  { %v1460_v51 = vadd.f32 %v1459_v28, %v1458_v4 }
 0x17b   :  { %v1461_v6 = vrot.slane %v1460_v51, 2 }
 0x17d   :  { %v1462_v8 = vadd.f32 %v1461_v6, %v1460_v51 }
 0x17f   :  { %v1463_v46 = vrot.slane %v1462_v8, 1 }
 0x181   :  { %v1464_v55 = vadd.f32 %v1463_v46, %v1462_v8 }
 0x183   :  { %v5256_v22 = vmul.f32 0.00295858, %v1464_v55 }
 0x185   :  { %v1467_v16 = vsub.f32 %v4811_v18, %v5256_v22  ;;  %v1466_v31 = vsub.f32 %v4800_v15, %v5256_v22  ;;  %v1469_v12 = vsub.f32 %v4831_v24, %v5256_v22  ;;  %v1468_v56 = vsub.f32 %v4820_v21, %v5256_v22 }
 0x186   :  { %v1471_v46 = vsub.f32 %v4847_v29, %v5256_v22  ;;  %v1470_v51 = vsub.f32 %v4840_v27, %v5256_v22  ;;  %v1472_v59 = vsub.f32 %v4856_v32, %v5256_v22  ;;  %v1474_v3 = vsub.f32 %v4865_v35, %v5256_v22 }
 0x187   :  { %v1519_v34 = vsel %vm4902_vm1, %v1467_v16, 0.0  ;;  %v1570_v17 = vmul.f32 %v1466_v31, %v1466_v31  ;;  %v1521_v28 = vsel %vm4915_vm2, %v1469_v12, 0.0  ;;  %v1572_v6 = vmul.f32 %v1468_v56, %v1468_v56 }
 0x188   :  { %v1571_v4 = vmul.f32 %v1519_v34, %v1519_v34  ;;  %v1573_v8 = vmul.f32 %v1521_v28, %v1521_v28  ;;  %v1473_v16 = vsub.f32 %v4859_v33, %v5256_v22  ;;  %v1523_v31 = vsel %vm4933_vm3, %v1471_v46, 0.0 }
 0x189   :  { %v1622_v55 = vsel %vm251_vm0, %v1570_v17, 0.0  ;;  %v1574_v12 = vmul.f32 %v1470_v51, %v1470_v51  ;;  %v1625_v24 = vsel %vm251_vm0, %v1572_v6, 0.0  ;;  %v1575_v56 = vmul.f32 %v1523_v31, %v1523_v31 }
 0x18a   :  { %v1623_v54 = vsel %vm251_vm0, %v1571_v4, 0.0  ;;  %v1627_v28 = vsel %vm251_vm0, %v1573_v8, 0.0  ;;  %v1475_v17 = vsub.f32 %v4867_v36, %v5256_v22  ;;  %v1525_v4 = vsel %vm4951_vm4, %v1473_v16, 0.0 }
 0x18b   :  { %v1624_v34 = vadd.f32 %v1623_v54, %v1622_v55  ;;  %v1576_v46 = vmul.f32 %v1472_v59, %v1472_v59  ;;  %v1629_v55 = vsel %vm251_vm0, %v1574_v12, 0.0  ;;  %v1577_v54 = vmul.f32 %v1525_v4, %v1525_v4 }
 0x18c   :  { %v1477_v6 = vsub.f32 %v4871_v38, %v5256_v22  ;;  %v1527_v8 = vsel %vm4963_vm5, %v1475_v17, 0.0  ;;  %v1578_v13 = vmul.f32 %v1474_v3, %v1474_v3  ;;  %v1479_v12 = vsub.f32 %v4877_v41, %v5256_v22 }
 0x18d   :  { %v1626_v21 = vadd.f32 %v1625_v24, %v1624_v34  ;;  %v1631_v24 = vsel %vm251_vm0, %v1575_v56, 0.0  ;;  %v1633_v16 = vsel %vm251_vm0, %v1576_v46, 0.0  ;;  %v1579_v59 = vmul.f32 %v1527_v8, %v1527_v8 }
 0x18e   :  { %v1529_v56 = vsel %vm4980_vm6, %v1477_v6, 0.0  ;;  %v1478_v25 = vsub.f32 %v4873_v39, %v5256_v22  ;;  %v1637_v4 = vsel %vm251_vm0, %v1578_v13, 0.0  ;;  %v1480_v62 = vsub.f32 %v4879_v42, %v5256_v22 }
 0x18f   :  { %v1628_v33 = vadd.f32 %v1627_v28, %v1626_v21  ;;  %v1476_v21 = vsub.f32 %v4869_v37, %v5256_v22  ;;  %v1639_v46 = vsel %vm251_vm0, %v1579_v59, 0.0  ;;  %v1482_v11 = vsub.f32 %v4892_v49, %v5256_v22 }
 0x190   :  { %v1582_v6 = vmul.f32 %v1478_v25, %v1478_v25 }
 0x191   :  { %v1630_v51 = vadd.f32 %v1629_v55, %v1628_v33  ;;  %v1635_v33 = vsel %vm251_vm0, %v1577_v54, 0.0  ;;  %v1580_v17 = vmul.f32 %v1476_v21, %v1476_v21  ;;  %v1581_v55 = vmul.f32 %v1529_v56, %v1529_v56 }
 0x192   :  { %v1531_v54 = vsel %vm4991_vm7, %v1479_v12, 0.0  ;;  %v1645_v12 = vsel %vm251_vm0, %v1582_v6, 0.0  ;;  %v6645_v6 = vld [vmem:[#allocation22_spill] sm:$0xff] }
 0x193   :  { %v1632_v31 = vadd.f32 %v1631_v24, %v1630_v51  ;;  %v1481_v51 = vsub.f32 %v4883_v45, %v5256_v22  ;;  %v1641_v8 = vsel %vm251_vm0, %v1580_v17, 0.0  ;;  %v1583_v21 = vmul.f32 %v1531_v54, %v1531_v54 }
 0x194   :  { %v1643_v13 = vsel %vm251_vm0, %v1581_v55, 0.0  ;;  %v1485_v17 = vsub.f32 %v4971_v44, %v5256_v22  ;;  %v1484_v55 = vsub.f32 %v6644_v30, %v5256_v22 }
 0x195   :  { %v1634_v34 = vadd.f32 %v1633_v16, %v1632_v31  ;;  %v1483_v16 = vsub.f32 %v4910_v57, %v5256_v22  ;;  %v1647_v25 = vsel %vm251_vm0, %v1583_v21, 0.0 }
 0x196   :  { %v1537_v21 = vsel %vm5036_vm10, %v1485_v17, 0.0  ;;  %v6649_v17 = vld [vmem:[#allocation25_spill] sm:$0xff]  ;;  %vm6677_vm10 = vnez %v6635_v0  ;;  %v6681_v0 = vld [vmem:[#allocation39_spill] sm:$0xff] }
 0x197   :  { %v1636_v28 = vadd.f32 %v1635_v33, %v1634_v34  ;;  %v1533_v34 = vsel %vm5008_vm8, %v1481_v51, 0.0  ;;  %v1584_v33 = vmul.f32 %v1480_v62, %v1480_v62  ;;  %vm6673_vm8 = vnez %v6630_v60 }
 0x198   :  { %v1510_v60 = vsub.f32 %v5040_v63, %v5256_v22 }
 0x199   :  { %v1638_v3 = vadd.f32 %v1637_v4, %v1636_v28  ;;  %v1585_v28 = vmul.f32 %v1533_v34, %v1533_v34  ;;  %v1535_v4 = vsel %vm5021_vm9, %v1483_v16, 0.0  ;;  %v1649_v51 = vsel %vm251_vm0, %v1584_v33, 0.0 }
 0x19a   :  { %v1486_v16 = vsub.f32 %v6647_v7, %v5256_v22  ;;  %v1588_v34 = vmul.f32 %v1484_v55, %v1484_v55 }
 0x19b   :  { %v1640_v24 = vadd.f32 %v1639_v46, %v1638_v3  ;;  %v1586_v46 = vmul.f32 %v1482_v11, %v1482_v11  ;;  %v1651_v62 = vsel %vm251_vm0, %v1585_v28, 0.0  ;;  %v6651_v28 = vld [vmem:[#allocation30_spill] sm:$0xff] }
 0x19d   :  { %v1642_v31 = vadd.f32 %v1641_v8, %v1640_v24  ;;  %v1587_v24 = vmul.f32 %v1535_v4, %v1535_v4  ;;  %v1487_v8 = vsub.f32 %v6645_v6, %v5256_v22 }
 0x19f   :  { %v1644_v59 = vadd.f32 %v1643_v13, %v1642_v31  ;;  %v1655_v33 = vsel %vm251_vm0, %v1587_v24, 0.0  ;;  %v1491_v24 = vsub.f32 %v5029_v19, %v5256_v22 }
 0x1a1   :  { %v1646_v56 = vadd.f32 %v1645_v12, %v1644_v59  ;;  %v1653_v59 = vsel %vm251_vm0, %v1586_v46, 0.0  ;;  %v1589_v12 = vmul.f32 %v1537_v21, %v1537_v21  ;;  %v1543_v19 = vsel %vm5079_vm13, %v1491_v24, 0.0  ;;  %v6656_v24 = vld [vmem:[#allocation9_spill] sm:$0xff] }
 0x1a3   :  { %v1648_v3 = vadd.f32 %v1647_v25, %v1646_v56  ;;  %v1489_v56 = vsub.f32 %v5083_v23, %v5256_v22  ;;  %v1539_v25 = vsel %vm5050_vm11, %v1487_v8, 0.0  ;;  %v1659_v46 = vsel %vm251_vm0, %v1589_v12, 0.0  ;;  %v6650_v8 = vld [vmem:[#allocation19_spill] sm:$0xff] }
 0x1a4   :  { %v1493_v12 = vsub.f32 %v6651_v28, %v5256_v22 }
 0x1a5   :  { %v1650_v54 = vadd.f32 %v1649_v51, %v1648_v3  ;;  %v1488_v3 = vsub.f32 %v6649_v17, %v5256_v22  ;;  %v1590_v51 = vmul.f32 %v1486_v16, %v1486_v16  ;;  %v1541_v31 = vsel %vm5072_vm12, %v1489_v56, 0.0 }
 0x1a6   :  { %v1492_v56 = vsub.f32 %v6653_v14, %v5256_v22 }
 0x1a7   :  { %v1652_v13 = vadd.f32 %v1651_v62, %v1650_v54  ;;  %v1657_v54 = vsel %vm251_vm0, %v1588_v34, 0.0  ;;  %v1591_v62 = vmul.f32 %v1539_v25, %v1539_v25 }
 0x1a9   :  { %v1654_v11 = vadd.f32 %v1653_v59, %v1652_v13  ;;  %v1490_v13 = vsub.f32 %v6650_v8, %v5256_v22  ;;  %v1592_v59 = vmul.f32 %v1488_v3, %v1488_v3  ;;  %v1663_v34 = vsel %vm251_vm0, %v1591_v62, 0.0 }
 0x1aa   :  { %v1495_v62 = vsub.f32 %v4881_v43, %v5256_v22 }
 0x1ab   :  { %v1656_v4 = vadd.f32 %v1655_v33, %v1654_v11  ;;  %v1661_v11 = vsel %vm251_vm0, %v1590_v51, 0.0  ;;  %v1593_v33 = vmul.f32 %v1541_v31, %v1541_v31  ;;  %v6654_v31 = vld [vmem:[#allocation31_spill] sm:$0xff] }
 0x1ac   :  { %vm6655_vm1 = vnez %v6654_v31 }
 0x1ad   :  { %v1658_v55 = vadd.f32 %v1657_v54, %v1656_v4  ;;  %v1594_v54 = vmul.f32 %v1490_v13, %v1490_v13  ;;  %v1667_v51 = vsel %vm251_vm0, %v1593_v33, 0.0  ;;  %v1497_v33 = vsub.f32 %v4900_v53, %v5256_v22 }
 0x1af   :  { %v1660_v21 = vadd.f32 %v1659_v46, %v1658_v55  ;;  %v1665_v55 = vsel %vm251_vm0, %v1592_v59, 0.0  ;;  %v1595_v46 = vmul.f32 %v1543_v19, %v1543_v19  ;;  %v6657_v19 = vld [vmem:[#allocation33_spill] sm:$0xff] }
 0x1b0   :  { %vm6658_vm2 = vnez %v6657_v19 }
 0x1b1   :  { %v1662_v16 = vadd.f32 %v1661_v11, %v1660_v21  ;;  %v1545_v21 = vsel %vm6655_vm1, %v1493_v12, 0.0  ;;  %v1494_v11 = vsub.f32 %v6656_v24, %v5256_v22  ;;  %v1671_v59 = vsel %vm251_vm0, %v1595_v46, 0.0 }
 0x1b2   :  { %v1597_v25 = vmul.f32 %v1545_v21, %v1545_v21  ;;  %v1496_v12 = vsub.f32 %v4887_v47, %v5256_v22  ;;  %v1499_v46 = vsub.f32 %v4973_v50, %v5256_v22  ;;  %v6659_v21 = vld [vmem:[#allocation34_spill] sm:$0xff]  ;;  %vm2173_vm1 = vcmask 389376  }
 0x1b3   :  { %v1664_v4 = vadd.f32 %v1663_v34, %v1662_v16  ;;  %v1596_v16 = vmul.f32 %v1492_v56, %v1492_v56  ;;  %v1669_v34 = vsel %vm251_vm0, %v1594_v54, 0.0  ;;  %vm6660_vm3 = vnez %v6659_v21 }
 0x1b4   :  { %v1675_v54 = vsel %vm251_vm0, %v1597_v25, 0.0  ;;  %v1501_v25 = vsub.f32 %v5043_v2, %v5256_v22 }
 0x1b5   :  { %v1666_v3 = vadd.f32 %v1665_v55, %v1664_v4  ;;  %v1547_v4 = vsel %vm6658_vm2, %v1495_v62, 0.0  ;;  %v6661_v62 = vld [vmem:[#allocation16_spill] sm:$0xff]  ;;  %vm2244_vm2 = vcmask 520576  }
 0x1b6   :  { %v1599_v31 = vmul.f32 %v1547_v4, %v1547_v4  ;;  %v6662_v4 = vld [vmem:[#allocation35_spill] sm:$0xff] }
 0x1b7   :  { %v1668_v8 = vadd.f32 %v1667_v51, %v1666_v3  ;;  %v1598_v3 = vmul.f32 %v1494_v11, %v1494_v11  ;;  %v1673_v51 = vsel %vm251_vm0, %v1596_v16, 0.0  ;;  %vm6663_vm4 = vnez %v6662_v4 }
 0x1b8   :  { %v1679_v16 = vsel %vm251_vm0, %v1599_v31, 0.0  ;;  %v1503_v31 = vsub.f32 %v5114_v61, %v5256_v22 }
 0x1b9   :  { %v1670_v13 = vadd.f32 %v1669_v34, %v1668_v8  ;;  %v1549_v8 = vsel %vm6660_vm3, %v1497_v33, 0.0  ;;  %v1677_v19 = vsel %vm251_vm0, %v1598_v3, 0.0  ;;  %v6664_v33 = vld [vmem:[#allocation21_spill] sm:$0xff]  ;;  %vm2315_vm3 = vcmask 651776  }
 0x1ba   :  { %v1601_v24 = vmul.f32 %v1549_v8, %v1549_v8  ;;  %v6665_v8 = vld [vmem:[#allocation37_spill] sm:$0xff] }
 0x1bb   :  { %v1672_v55 = vadd.f32 %v1671_v59, %v1670_v13  ;;  %v1498_v13 = vsub.f32 %v6661_v62, %v5256_v22  ;;  %v1600_v59 = vmul.f32 %v1496_v12, %v1496_v12  ;;  %vm6666_vm5 = vnez %v6665_v8 }
 0x1bc   :  { %v1683_v3 = vsel %vm251_vm0, %v1601_v24, 0.0  ;;  %v1505_v24 = vsub.f32 %v5173_v58, %v5256_v22 }
 0x1bd   :  { %v1674_v56 = vadd.f32 %v1673_v51, %v1672_v55  ;;  %v1551_v55 = vsel %vm6663_vm4, %v1499_v46, 0.0  ;;  %v1681_v21 = vsel %vm251_vm0, %v1600_v59, 0.0  ;;  %v6667_v46 = vld [vmem:[#allocation27_spill] sm:$0xff]  ;;  %vm2386_vm4 = vcmask 782976  }
 0x1be   :  { %v1603_v28 = vmul.f32 %v1551_v55, %v1551_v55  ;;  %v6668_v55 = vld [vmem:[#allocation38_spill] sm:$0xff] }
 0x1bf   :  { %v1676_v34 = vadd.f32 %v1675_v54, %v1674_v56  ;;  %v1500_v56 = vsub.f32 %v6664_v33, %v5256_v22  ;;  %v1602_v54 = vmul.f32 %v1498_v13, %v1498_v13  ;;  %vm6669_vm6 = vnez %v6668_v55 }
 0x1c0   :  { %v1687_v59 = vsel %vm251_vm0, %v1603_v28, 0.0  ;;  %v1507_v28 = vsub.f32 %v4929_v1, %v5256_v22 }
 0x1c1   :  { %v1678_v11 = vadd.f32 %v1677_v19, %v1676_v34  ;;  %v1553_v34 = vsel %vm6666_vm5, %v1501_v25, 0.0  ;;  %v1685_v4 = vsel %vm251_vm0, %v1602_v54, 0.0  ;;  %v6670_v25 = vld [vmem:[#allocation36_spill] sm:$0xff]  ;;  %vm2457_vm5 = vcmask 914176  }
 0x1c2   :  { %v1605_v14 = vmul.f32 %v1553_v34, %v1553_v34  ;;  %v6671_v34 = vld [vmem:[#allocation40_spill] sm:$0xff] }
 0x1c3   :  { %v1680_v51 = vadd.f32 %v1679_v16, %v1678_v11  ;;  %v1502_v11 = vsub.f32 %v6667_v46, %v5256_v22  ;;  %v1604_v16 = vmul.f32 %v1500_v56, %v1500_v56  ;;  %vm6672_vm7 = vnez %v6671_v34 }
 0x1c4   :  { %v1691_v54 = vsel %vm251_vm0, %v1605_v14, 0.0  ;;  %v1509_v14 = vsub.f32 %v5004_v26, %v5256_v22 }
 0x1c5   :  { %v1682_v12 = vadd.f32 %v1681_v21, %v1680_v51  ;;  %v1555_v51 = vsel %vm6669_vm6, %v1503_v31, 0.0  ;;  %v1689_v8 = vsel %vm251_vm0, %v1604_v16, 0.0  ;;  %v1506_v31 = vsub.f32 %v4898_v52, %v5256_v22 }
 0x1c6   :  { %v1607_v23 = vmul.f32 %v1555_v51, %v1555_v51  ;;  %v1559_v51 = vsel %vm6673_vm8, %v1507_v28, 0.0  ;;  %vm2528_vm6 = vcmask 1045376  }
 0x1c7   :  { %v1684_v19 = vadd.f32 %v1683_v3, %v1682_v12  ;;  %v1504_v12 = vsub.f32 %v6670_v25, %v5256_v22  ;;  %v1606_v3 = vmul.f32 %v1502_v11, %v1502_v11  ;;  %v1611_v34 = vmul.f32 %v1559_v51, %v1559_v51 }
 0x1c8   :  { %v1695_v16 = vsel %vm251_vm0, %v1607_v23, 0.0  ;;  %v1511_v23 = vsub.f32 %v5068_v9, %v5256_v22 }
 0x1c9   :  { %v1686_v13 = vadd.f32 %v1685_v4, %v1684_v19  ;;  %v1557_v19 = vsel %vm6672_vm7, %v1505_v24, 0.0  ;;  %v6674_v24 = vld [vmem:[#allocation18_spill] sm:$0xff] }
 0x1ca   :  { %v1609_v55 = vmul.f32 %v1557_v19, %v1557_v19  ;;  %v6675_v19 = vld [vmem:[#allocation41_spill] sm:$0xff]  ;;  %v1563_v51 = vsel %vm6677_vm10, %v1511_v23, 0.0  ;;  %v1514_v23 = vsub.f32 %v6681_v0, %v5256_v22 }
 0x1cb   :  { %v1688_v21 = vadd.f32 %v1687_v59, %v1686_v13  ;;  %v1608_v13 = vmul.f32 %v1504_v12, %v1504_v12  ;;  %v1693_v59 = vsel %vm251_vm0, %v1606_v3, 0.0  ;;  %vm6676_vm9 = vnez %v6675_v19 }
 0x1cc   :  { %v1699_v3 = vsel %vm251_vm0, %v1609_v55, 0.0  ;;  %v1513_v55 = vsub.f32 %v5138_v40, %v5256_v22  ;;  %v1615_v19 = vmul.f32 %v1563_v51, %v1563_v51 }
 0x1cd   :  { %v1690_v56 = vadd.f32 %v1689_v8, %v1688_v21  ;;  %v1508_v8 = vsub.f32 %v6674_v24, %v5256_v22 }
 0x1cf   :  { %v1692_v4 = vadd.f32 %v1691_v54, %v1690_v56  ;;  %v1610_v56 = vmul.f32 %v1506_v31, %v1506_v31  ;;  %v1697_v54 = vsel %vm251_vm0, %v1608_v13, 0.0  ;;  %v1612_v28 = vmul.f32 %v1508_v8, %v1508_v8 }
 0x1d0   :  { %v1703_v13 = vsel %vm251_vm0, %v1611_v34, 0.0  ;;  %v1515_v34 = vsub.f32 %v5201_v5, %v5256_v22 }
 0x1d1   :  { %v1694_v11 = vadd.f32 %v1693_v59, %v1692_v4  ;;  %v1561_v4 = vsel %vm6676_vm9, %v1509_v14, 0.0  ;;  %v6678_v14 = vld [vmem:[#allocation32_spill] sm:$0xff] }
 0x1d3   :  { %v1696_v21 = vadd.f32 %v1695_v16, %v1694_v11  ;;  %v1701_v11 = vsel %vm251_vm0, %v1610_v56, 0.0  ;;  %v1613_v16 = vmul.f32 %v1561_v4, %v1561_v4  ;;  %v6679_v4 = vld [vmem:[#allocation42_spill] sm:$0xff] }
 0x1d4   :  { %vm6680_vm11 = vnez %v6679_v4 }
 0x1d5   :  { %v1698_v12 = vadd.f32 %v1697_v54, %v1696_v21  ;;  %v1512_v54 = vsub.f32 %v6678_v14, %v5256_v22  ;;  %v1707_v56 = vsel %vm251_vm0, %v1613_v16, 0.0  ;;  %v1517_v16 = vsub.f32 %v5244_v20, %v5256_v22 }
 0x1d7   :  { %v1700_v59 = vadd.f32 %v1699_v3, %v1698_v12  ;;  %v1614_v12 = vmul.f32 %v1510_v60, %v1510_v60  ;;  %v1705_v3 = vsel %vm251_vm0, %v1612_v28, 0.0  ;;  %v1711_v28 = vsel %vm251_vm0, %v1615_v19, 0.0 }
 0x1d8   :  { %v1569_v19 = vsel %vm5246_vm14, %v1517_v16, 0.0 }
 0x1d9   :  { %v1702_v31 = vadd.f32 %v1701_v11, %v1700_v59  ;;  %v1565_v59 = vsel %vm6680_vm11, %v1513_v55, 0.0  ;;  %v1516_v55 = vsub.f32 %v5228_v48, %v5256_v22  ;;  %vm3447_vm11 = vcmask 261120  }
 0x1da   :  { %v1617_v17 = vmul.f32 %v1565_v59, %v1565_v59 }
 0x1db   :  { %v1704_v21 = vadd.f32 %v1703_v13, %v1702_v31  ;;  %v1616_v31 = vmul.f32 %v1512_v54, %v1512_v54  ;;  %v1709_v13 = vsel %vm251_vm0, %v1614_v12, 0.0 }
 0x1dc   :  { %v1715_v12 = vsel %vm251_vm0, %v1617_v17, 0.0 }
 0x1dd   :  { %v1706_v8 = vadd.f32 %v1705_v3, %v1704_v21  ;;  %v1567_v21 = vsel %vm5232_vm15, %v1515_v34, 0.0  ;;  %v1621_v34 = vmul.f32 %v1569_v19, %v1569_v19  ;;  %vm2031_vm15 = vcmask 126976  }
 0x1de   :  { %v1619_v4 = vmul.f32 %v1567_v21, %v1567_v21 }
 0x1df   :  { %v1708_v11 = vadd.f32 %v1707_v56, %v1706_v8  ;;  %v1618_v8 = vmul.f32 %v1514_v23, %v1514_v23  ;;  %v1713_v56 = vsel %vm251_vm0, %v1616_v31, 0.0  ;;  %v1723_v31 = vsel %vm251_vm0, %v1621_v34, 0.0 }
 0x1e1   :  { %v1710_v60 = vadd.f32 %v1709_v13, %v1708_v11  ;;  %v1620_v11 = vmul.f32 %v1516_v55, %v1516_v55  ;;  %v1717_v20 = vsel %vm251_vm0, %v1618_v8, 0.0 }
 0x1e3   :  { %v1712_v3 = vadd.f32 %v1711_v28, %v1710_v60  ;;  %v1719_v60 = vsel %vm251_vm0, %v1619_v4, 0.0  ;;  %v1721_v48 = vsel %vm251_vm0, %v1620_v11, 0.0  ;;  %v469_v11 = vld [vmem:[%s6482_s2] sm:$0x1]  ;;  %s4684_s2 = smov 48  }
 0x1e5   :  { %v1714_v54 = vadd.f32 %v1713_v56, %v1712_v3 }
 0x1e7   :  { %v1716_v59 = vadd.f32 %v1715_v12, %v1714_v54 }
 0x1e9   :  { %v1718_v13 = vadd.f32 %v1717_v20, %v1716_v59 }
 0x1eb   :  { %v1720_v28 = vadd.f32 %v1719_v60, %v1718_v13  ;;  %v470_v60 = vld [vmem:[%s6483_s3] sm:$0x1]  ;;  %s4685_s3 = smov 32  }
 0x1ed   :  { %v1722_v23 = vadd.f32 %v1721_v48, %v1720_v28 }
 0x1ef   :  { %v1724_v51 = vadd.f32 %v1723_v31, %v1722_v23 }
 0x1f1   :  { %v1725_v21 = vrot.slane %v1724_v51, 4 }
 0x1f3   :  { %v1726_v17 = vadd.f32 %v1725_v21, %v1724_v51 }
 0x1f5   :  { %v1727_v3 = vrot.slane %v1726_v17, 2 }
 0x1f7   :  { %v1728_v10 = vadd.f32 %v1727_v3, %v1726_v17 }
 0x1f9   :  { %v1729_v16 = vrot.slane %v1728_v10, 1 }
 0x1fb   :  { %v1730_v56 = vadd.f32 %v1729_v16, %v1728_v10 }
 0x1fd   :  { %v1731_v55 = vmul.f32 0.00295858, %v1730_v56 }
 0x1ff   :  { %v1732_v54 = vadd.f32 1e-05, %v1731_v55 }
 0x201   :  { %4680 = vrsqrt.f32 %v1732_v54  ;;  %vm1739_vm13 = vweird.f32 %v1732_v54 }
 0x207   :  { %v4681_v8 = vpop.eup %4680 }
 0x208   :  { %v1734_v12 = vmul.f32 %v4681_v8, %v1732_v54  ;;  %vm1740_vm12 = vweird.f32 %v4681_v8 }
 0x209   :  { %vm1741_vm14 = vmor %vm1739_vm13, %vm1740_vm12 }
 0x20a   :  { %v1735_v19 = vmul.f32 %v4681_v8, %v1734_v12 }
 0x20c   :  { %v1736_v4 = vmul.f32 0.5, %v1735_v19 }
 0x20e   :  { %v1737_v59 = vsub.f32 1.5, %v1736_v4 }
 0x210   :  { %v1738_v20 = vmul.f32 %v4681_v8, %v1737_v59 }
 0x212   :  { %v1742_v13 = vsel %vm1741_vm14, %v4681_v8, %v1738_v20 }
 0x213   :  { %v1743_v34 = vmul.f32 %v1742_v13, %v469_v11 }
 0x215   :  { %v1744_v28 = vmul.f32 %v1743_v34, %v5256_v22  ;;  %v5473_v48 = vperm.slane %v1743_v34, 0 }
 0x217   :  { %v1745_v23 = vsub.f32 %v470_v60, %v1744_v28  ;;  %v1753_v51 = vmul.f32 %v5473_v48, %v4840_v27  ;;  %v1754_v21 = vmul.f32 %v5473_v48, %v4847_v29  ;;  %v1778_v10 = vmul.f32 %v5473_v48, %v4881_v43 }
 0x218   :  { %v1779_v22 = vmul.f32 %v5473_v48, %v4887_v47  ;;  %v1780_v55 = vmul.f32 %v5473_v48, %v4900_v53  ;;  %v1781_v27 = vmul.f32 %v5473_v48, %v6661_v62  ;;  %v1782_v29 = vmul.f32 %v5473_v48, %v4973_v50 }
 0x219   :  { %v5475_v31 = vperm.slane %v1745_v23, 0  ;;  %v1783_v54 = vmul.f32 %v5473_v48, %v6664_v33  ;;  %v1784_v43 = vmul.f32 %v5473_v48, %v5043_v2  ;;  %v1785_v47 = vmul.f32 %v5473_v48, %v6667_v46 }
 0x21a   :  { %v1786_v53 = vmul.f32 %v5473_v48, %v5114_v61  ;;  %v1787_v62 = vmul.f32 %v5473_v48, %v6670_v25  ;;  %v1788_v50 = vmul.f32 %v5473_v48, %v5173_v58  ;;  %v1789_v33 = vmul.f32 %v5473_v48, %v4898_v52 }
 0x21b   :  { %v1808_v17 = vadd.f32 %v5475_v31, %v1753_v51  ;;  %v1809_v3 = vadd.f32 %v5475_v31, %v1754_v21  ;;  %v1790_v2 = vmul.f32 %v5473_v48, %v4929_v1  ;;  %v1791_v46 = vmul.f32 %v5473_v48, %v6674_v24 }
 0x21c   :  { %v1792_v19 = vmul.f32 %v5473_v48, %v5004_v26  ;;  %v1793_v61 = vmul.f32 %v5473_v48, %v5040_v63  ;;  %v1794_v58 = vmul.f32 %v5473_v48, %v5068_v9  ;;  %v1795_v52 = vmul.f32 %v5473_v48, %v6678_v14 }
 0x21d   :  { %v1860_v16 = vmul.f32 0.2, %v1808_v17  ;;  %v1861_v56 = vmul.f32 0.2, %v1809_v3  ;;  %v1796_v1 = vmul.f32 %v5473_v48, %v5138_v40  ;;  %v1797_v25 = vmul.f32 %v5473_v48, %v6681_v0 }
 0x21e   :  { %v1798_v26 = vmul.f32 %v5473_v48, %v5201_v5  ;;  %v5528_v63 = vadd.f32 %v5475_v31, %v1778_v10  ;;  %v5531_v24 = vadd.f32 %v5475_v31, %v1779_v22  ;;  %v5534_v9 = vadd.f32 %v5475_v31, %v1780_v55 }
 0x21f   :  { %v1912_v8 = vmax.f32 %v1808_v17, %v1860_v16  ;;  %v1913_v12 = vmax.f32 %v1809_v3, %v1861_v56  ;;  %v5537_v14 = vadd.f32 %v5475_v31, %v1781_v27  ;;  %v5540_v40 = vadd.f32 %v5475_v31, %v1782_v29 }
 0x220   :  { %v5543_v0 = vadd.f32 %v5475_v31, %v1783_v54  ;;  %v5546_v5 = vadd.f32 %v5475_v31, %v1784_v43  ;;  %v5549_v4 = vadd.f32 %v5475_v31, %v1785_v47  ;;  %v5552_v59 = vadd.f32 %v5475_v31, %v1786_v53  ;;  %v6683_v47 = vld [vmem:[#allocation6_spill] sm:$0xff]  ;;  %v6684_v53 = vld [vmem:[#allocation7_spill] sm:$0xff] }
 0x221   :  { %1964 = vst.msk [vmem:[#allocation2 + $0x20] sm:$0xff] %vm251_vm0, %v1912_v8  ;;  %v5555_v11 = vadd.f32 %v5475_v31, %v1787_v62  ;;  %v5558_v20 = vadd.f32 %v5475_v31, %v1788_v50  ;;  %v5561_v13 = vadd.f32 %v5475_v31, %v1789_v33  ;;  %v5564_v34 = vadd.f32 %v5475_v31, %v1790_v2  ;;  %v6685_v33 = vld [vmem:[#allocation8_spill] sm:$0xff] }
 0x222   :  { %1965 = vst.msk [vmem:[#allocation2 + $0x28] sm:$0xff] %vm251_vm0, %v1913_v12  ;;  %v5567_v60 = vadd.f32 %v5475_v31, %v1791_v46  ;;  %v5570_v28 = vadd.f32 %v5475_v31, %v1792_v19  ;;  %v5573_v23 = vadd.f32 %v5475_v31, %v1793_v61  ;;  %v5576_v51 = vadd.f32 %v5475_v31, %v1794_v58 }
 0x223   :  { %v5579_v21 = vadd.f32 %v5475_v31, %v1795_v52  ;;  %v5582_v17 = vadd.f32 %v5475_v31, %v1796_v1  ;;  %v5585_v3 = vadd.f32 %v5475_v31, %v1797_v25  ;;  %v5588_v10 = vadd.f32 %v5475_v31, %v1798_v26 }
 0x224   :  { %v1757_v56 = vmul.f32 %v5473_v48, %v4865_v35  ;;  %v1758_v55 = vmul.f32 %v5473_v48, %v4867_v36  ;;  %v1749_v29 = vmul.f32 %v5473_v48, %v4800_v15  ;;  %v1750_v54 = vmul.f32 %v5473_v48, %v4811_v18 }
 0x225   :  { %v1751_v8 = vmul.f32 %v5473_v48, %v6683_v47  ;;  %v1752_v35 = vmul.f32 %v5473_v48, %v6684_v53  ;;  %v1755_v50 = vmul.f32 %v5473_v48, %v4856_v32  ;;  %v1756_v18 = vmul.f32 %v5473_v48, %v6685_v33 }
 0x226   :  { %v1812_v27 = vadd.f32 %v5475_v31, %v1757_v56  ;;  %v1813_v43 = vadd.f32 %v5475_v31, %v1758_v55  ;;  %v1804_v12 = vadd.f32 %v5475_v31, %v1749_v29  ;;  %v1805_v36 = vadd.f32 %v5475_v31, %v1750_v54 }
 0x227   :  { %v1806_v15 = vadd.f32 %v5475_v31, %v1751_v8  ;;  %v1807_v2 = vadd.f32 %v5475_v31, %v1752_v35  ;;  %v1759_v19 = vmul.f32 %v5473_v48, %v4869_v37  ;;  %v1810_v61 = vadd.f32 %v5475_v31, %v1755_v50 }
 0x228   :  { %v1864_v62 = vmul.f32 0.2, %v1812_v27  ;;  %v1865_v46 = vmul.f32 0.2, %v1813_v43  ;;  %v1856_v58 = vmul.f32 0.2, %v1804_v12  ;;  %v1760_v52 = vmul.f32 %v5473_v48, %v4871_v38 }
 0x229   :  { %v2710_v22 = vld [vmem:[#allocation2 + $0x23] ss:$2 sm:$0x1f]  ;;  %v2640_v16 = vld [vmem:[#allocation2 + $0x22] ss:$2 sm:$0x1f]  ;;  %v1811_v1 = vadd.f32 %v5475_v31, %v1756_v18  ;;  %v1761_v26 = vmul.f32 %v5473_v48, %v4873_v39  ;;  %v1762_v56 = vmul.f32 %v5473_v48, %v4877_v41  ;;  %v1763_v38 = vmul.f32 %v5473_v48, %v4879_v42 }
 0x22a   :  { %2739 = vrot.lane.b32.xlu2 %v2710_v22, %s4684_s2  ;;  %2669 = vrot.lane.b32.xlu1 %v2640_v16, %s4685_s3  ;;  %v1857_v32 = vmul.f32 0.2, %v1805_v36  ;;  %v1916_v25 = vmax.f32 %v1812_v27, %v1864_v62  ;;  %v1814_v22 = vadd.f32 %v5475_v31, %v1759_v19  ;;  %v1858_v16 = vmul.f32 0.2, %v1806_v15 }
 0x22b   :  { %v5626_v37 = vadd.f32 %v5475_v31, %v1760_v52  ;;  %v1859_v55 = vmul.f32 0.2, %v1807_v2  ;;  %v1917_v29 = vmax.f32 %v1813_v43, %v1865_v46  ;;  %v5631_v54 = vadd.f32 %v5475_v31, %v1761_v26  ;;  %v2570_v53 = vld [vmem:[#allocation2 + $0x21] ss:$2 sm:$0x1f] }
 0x22c   :  { %v1862_v27 = vmul.f32 0.2, %v1810_v61  ;;  %v1908_v47 = vmax.f32 %v1804_v12, %v1856_v58  ;;  %v1764_v39 = vmul.f32 %v5473_v48, %v4883_v45  ;;  %v5636_v8 = vadd.f32 %v5475_v31, %v1762_v56  ;;  %1968 = vst.msk [vmem:[#allocation2 + $0x40] sm:$0xff] %vm251_vm0, %v1916_v25  ;;  %2599 = vrot.lane.b32.xlu0 %v2570_v53, %s4686_s21 }
 0x22d   :  { %v1863_v41 = vmul.f32 0.2, %v1811_v1  ;;  %v1909_v35 = vmax.f32 %v1805_v36, %v1857_v32  ;;  %v1765_v43 = vmul.f32 %v5473_v48, %v4892_v49  ;;  %v5642_v42 = vadd.f32 %v5475_v31, %v1763_v38  ;;  %1969 = vst.msk [vmem:[#allocation2 + $0x48] sm:$0xff] %vm251_vm0, %v1917_v29  ;;  %v6687_v29 = vld [vmem:[#allocation29_spill] sm:$0xff] }
 0x22e   :  { %v1866_v62 = vmul.f32 0.2, %v1814_v22  ;;  %v1910_v12 = vmax.f32 %v1806_v15, %v1858_v16  ;;  %v1766_v45 = vmul.f32 %v5473_v48, %v4910_v57  ;;  %v1819_v50 = vadd.f32 %v5475_v31, %v1764_v39  ;;  %1960 = vst.msk [vmem:[#allocation2] sm:$0xff] %vm251_vm0, %v1908_v47  ;;  %v6686_v16 = vld [vmem:[#allocation25_spill] sm:$0xff] }
 0x22f   :  { %v1867_v36 = vmul.f32 0.2, %v5626_v37  ;;  %v1911_v33 = vmax.f32 %v1807_v2, %v1859_v55  ;;  %v1767_v49 = vmul.f32 %v5473_v48, %v6644_v30  ;;  %v1820_v18 = vadd.f32 %v5475_v31, %v1765_v43  ;;  %1961 = vst.msk [vmem:[#allocation2 + $0x8] sm:$0xff] %vm251_vm0, %v1909_v35 }
 0x230   :  { %v1868_v46 = vmul.f32 0.2, %v5631_v54  ;;  %v1914_v19 = vmax.f32 %v1810_v61, %v1862_v27  ;;  %v1768_v57 = vmul.f32 %v5473_v48, %v4971_v44  ;;  %v1821_v15 = vadd.f32 %v5475_v31, %v1766_v45  ;;  %1962 = vst.msk [vmem:[#allocation2 + $0x10] sm:$0xff] %vm251_vm0, %v1910_v12 }
 0x231   :  { %v1869_v58 = vmul.f32 0.2, %v5636_v8  ;;  %v1915_v2 = vmax.f32 %v1811_v1, %v1863_v41  ;;  %v1769_v30 = vmul.f32 %v5473_v48, %v6647_v7  ;;  %v1822_v52 = vadd.f32 %v5475_v31, %v1767_v49  ;;  %1963 = vst.msk [vmem:[#allocation2 + $0x18] sm:$0xff] %vm251_vm0, %v1911_v33 }
 0x232   :  { %v1870_v32 = vmul.f32 0.2, %v5642_v42  ;;  %v1918_v61 = vmax.f32 %v1814_v22, %v1866_v62  ;;  %v1770_v44 = vmul.f32 %v5473_v48, %v6645_v6  ;;  %v1823_v25 = vadd.f32 %v5475_v31, %v1768_v57  ;;  %1966 = vst.msk [vmem:[#allocation2 + $0x30] sm:$0xff] %vm251_vm0, %v1914_v19  ;;  %v6688_v62 = vld [vmem:[#allocation26_spill] sm:$0xff] }
 0x233   :  { %v1871_v26 = vmul.f32 0.2, %v1819_v50  ;;  %v1919_v1 = vmax.f32 %v5626_v37, %v1867_v36  ;;  %v1771_v7 = vmul.f32 %v5473_v48, %v6686_v16  ;;  %v1824_v56 = vadd.f32 %v5475_v31, %v1769_v30  ;;  %1967 = vst.msk [vmem:[#allocation2 + $0x38] sm:$0xff] %vm251_vm0, %v1915_v2  ;;  %v6689_v36 = vld [vmem:[#allocation30_spill] sm:$0xff] }
 0x234   :  { %v1872_v55 = vmul.f32 0.2, %v1820_v18  ;;  %v1920_v22 = vmax.f32 %v5631_v54, %v1868_v46  ;;  %v1772_v6 = vmul.f32 %v5473_v48, %v6687_v29  ;;  %v1825_v38 = vadd.f32 %v5475_v31, %v1770_v44  ;;  %v2712_v53 = vld [vmem:[#allocation2 + $0x43] ss:$2 sm:$0x1f]  ;;  %1970 = vst.msk [vmem:[#allocation2 + $0x50] sm:$0xff] %vm251_vm0, %v1918_v61 }
 0x235   :  { %v1873_v27 = vmul.f32 0.2, %v1821_v15  ;;  %v1921_v37 = vmax.f32 %v5636_v8, %v1869_v58  ;;  %v1826_v47 = vadd.f32 %v5475_v31, %v1771_v7  ;;  %v1874_v39 = vmul.f32 0.2, %v1822_v52  ;;  %2741 = vrot.lane.b32.xlu2 %v2712_v53, %s4684_s2  ;;  %1971 = vst.msk [vmem:[#allocation2 + $0x58] sm:$0xff] %vm251_vm0, %v1919_v1  ;;  %v6690_v46 = vld [vmem:[#allocation9_spill] sm:$0xff] }
 0x236   :  { %v1922_v41 = vmax.f32 %v5642_v42, %v1870_v32  ;;  %v1827_v54 = vadd.f32 %v5475_v31, %v1772_v6  ;;  %v1875_v35 = vmul.f32 0.2, %v1823_v25  ;;  %v1923_v43 = vmax.f32 %v1819_v50, %v1871_v26  ;;  %1972 = vst.msk [vmem:[#allocation2 + $0x60] sm:$0xff] %vm251_vm0, %v1920_v22 }
 0x237   :  { %v1775_v8 = vmul.f32 %v5473_v48, %v6688_v62  ;;  %v1876_v12 = vmul.f32 0.2, %v1824_v56  ;;  %v1924_v45 = vmax.f32 %v1820_v18, %v1872_v55  ;;  %v1776_v42 = vmul.f32 %v5473_v48, %v6689_v36  ;;  %1973 = vst.msk [vmem:[#allocation2 + $0x68] sm:$0xff] %vm251_vm0, %v1921_v37 }
 0x238   :  { %v1877_v33 = vmul.f32 0.2, %v1825_v38  ;;  %v1925_v49 = vmax.f32 %v1821_v15, %v1873_v27  ;;  %v1777_v50 = vmul.f32 %v5473_v48, %v6690_v46  ;;  %v1878_v57 = vmul.f32 0.2, %v1826_v47  ;;  %1974 = vst.msk [vmem:[#allocation2 + $0x70] sm:$0xff] %vm251_vm0, %v1922_v41 }
 0x239   :  { %v1830_v19 = vadd.f32 %v5475_v31, %v1775_v8  ;;  %v1926_v58 = vmax.f32 %v1822_v52, %v1874_v39  ;;  %v1831_v18 = vadd.f32 %v5475_v31, %v1776_v42  ;;  %v1879_v2 = vmul.f32 0.2, %v1827_v54  ;;  %1975 = vst.msk [vmem:[#allocation2 + $0x78] sm:$0xff] %vm251_vm0, %v1923_v43  ;;  %v2642_v52 = vld [vmem:[#allocation2 + $0x42] ss:$2 sm:$0x1f] }
 0x23a   :  { %v1927_v30 = vmax.f32 %v1823_v25, %v1875_v35  ;;  %v1832_v32 = vadd.f32 %v5475_v31, %v1777_v50  ;;  %v1928_v15 = vmax.f32 %v1824_v56, %v1876_v12  ;;  %1976 = vst.msk [vmem:[#allocation2 + $0x80] sm:$0xff] %vm251_vm0, %v1924_v45  ;;  %v1929_v61 = vmax.f32 %v1825_v38, %v1877_v33  ;;  %v2572_v25 = vld [vmem:[#allocation2 + $0x41] ss:$2 sm:$0x1f] }
 0x23b   :  { %1977 = vst.msk [vmem:[#allocation2 + $0x88] sm:$0xff] %vm251_vm0, %v1925_v49  ;;  %v1882_v48 = vmul.f32 0.2, %v1830_v19  ;;  %v1930_v44 = vmax.f32 %v1826_v47, %v1878_v57  ;;  %v1883_v26 = vmul.f32 0.2, %v1831_v18  ;;  %v1931_v1 = vmax.f32 %v1827_v54, %v1879_v2  ;;  %2671 = vrot.lane.b32.xlu1 %v2642_v52, %s4685_s3  ;;  %2601 = vrot.lane.b32.xlu0 %v2572_v25, %s4686_s21 }
 0x23c   :  { %1978 = vst.msk [vmem:[#allocation2 + $0x90] sm:$0xff] %vm251_vm0, %v1926_v58  ;;  %v1884_v16 = vmul.f32 0.2, %v1832_v32  ;;  %v2850_v31 = vld [vmem:[#allocation2 + $0x31] ss:$2 sm:$0x1f] }
 0x23d   :  { %1979 = vst.msk [vmem:[#allocation2 + $0x98] sm:$0xff] %vm251_vm0, %v1927_v30  ;;  %v1885_v7 = vmul.f32 0.2, %v5528_v63  ;;  %2879 = vrot.lane.b32.xlu2 %v2850_v31, %s4687_s22  ;;  %v1886_v56 = vmul.f32 0.2, %v5531_v24  ;;  %v1934_v55 = vmax.f32 %v1830_v19, %v1882_v48  ;;  %v1935_v29 = vmax.f32 %v1831_v18, %v1883_v26 }
 0x23e   :  { %1980 = vst.msk [vmem:[#allocation2 + $0xa0] sm:$0xff] %vm251_vm0, %v1928_v15  ;;  %v1887_v22 = vmul.f32 0.2, %v5534_v9  ;;  %v1888_v6 = vmul.f32 0.2, %v5537_v14  ;;  %v1936_v38 = vmax.f32 %v1832_v32, %v1884_v16 }
 0x23f   :  { %1981 = vst.msk [vmem:[#allocation2 + $0xa8] sm:$0xff] %vm251_vm0, %v1929_v61  ;;  %v1889_v27 = vmul.f32 0.2, %v5540_v40  ;;  %v1937_v37 = vmax.f32 %v5528_v63, %v1885_v7  ;;  %v1890_v47 = vmul.f32 0.2, %v5543_v0  ;;  %v1938_v39 = vmax.f32 %v5531_v24, %v1886_v56 }
 0x240   :  { %1982 = vst.msk [vmem:[#allocation2 + $0xb0] sm:$0xff] %vm251_vm0, %v1930_v44  ;;  %v2782_v41 = vld [vmem:[#allocation2 + $0x50] ss:$2 sm:$0x1f]  ;;  %v1891_v53 = vmul.f32 0.2, %v5546_v5  ;;  %v1939_v54 = vmax.f32 %v5534_v9, %v1887_v22  ;;  %v1940_v63 = vmax.f32 %v5537_v14, %v1888_v6 }
 0x241   :  { %1983 = vst.msk [vmem:[#allocation2 + $0xb8] sm:$0xff] %vm251_vm0, %v1931_v1  ;;  %v2780_v35 = vld [vmem:[#allocation2 + $0x30] ss:$2 sm:$0x1f]  ;;  %v1892_v43 = vmul.f32 0.2, %v5549_v4  ;;  %v1941_v8 = vmax.f32 %v5540_v40, %v1889_v27  ;;  %v1942_v12 = vmax.f32 %v5543_v0, %v1890_v47 }
 0x242   :  { %1986 = vst.msk [vmem:[#allocation2 + $0xd0] sm:$0xff] %vm251_vm0, %v1934_v55  ;;  %v2922_v24 = vld [vmem:[#allocation2 + $0x52] ss:$2 sm:$0x1f]  ;;  %v1893_v62 = vmul.f32 0.2, %v5552_v59  ;;  %v1943_v45 = vmax.f32 %v5546_v5, %v1891_v53 }
 0x243   :  { %1987 = vst.msk [vmem:[#allocation2 + $0xd8] sm:$0xff] %vm251_vm0, %v1935_v29  ;;  %2811 = vrot.lane.b32.xlu1 %v2782_v41, %s4688_s23  ;;  %2809 = vrot.lane.b32.xlu0 %v2780_v35, %s4688_s23  ;;  %v1894_v9 = vmul.f32 0.2, %v5555_v11  ;;  %v1895_v14 = vmul.f32 0.2, %v5558_v20  ;;  %v1944_v40 = vmax.f32 %v5549_v4, %v1892_v43 }
 0x244   :  { %1988 = vst.msk [vmem:[#allocation2 + $0xe0] sm:$0xff] %vm251_vm0, %v1936_v38  ;;  %v1896_v36 = vmul.f32 0.2, %v5561_v13  ;;  %v1897_v42 = vmul.f32 0.2, %v5564_v34  ;;  %v1945_v33 = vmax.f32 %v5552_v59, %v1893_v62 }
 0x245   :  { %1989 = vst.msk [vmem:[#allocation2 + $0xe8] sm:$0xff] %vm251_vm0, %v1937_v37  ;;  %2951 = vrot.lane.b32.xlu2 %v2922_v24, %s4689_s24  ;;  %v1898_v0 = vmul.f32 0.2, %v5567_v60  ;;  %v1946_v49 = vmax.f32 %v5555_v11, %v1894_v9  ;;  %v2920_v5 = vld [vmem:[#allocation2 + $0x32] ss:$2 sm:$0x1f]  ;;  %v1947_v50 = vmax.f32 %v5558_v20, %v1895_v14 }
 0x246   :  { %1990 = vst.msk [vmem:[#allocation2 + $0xf0] sm:$0xff] %vm251_vm0, %v1938_v39  ;;  %v1899_v46 = vmul.f32 0.2, %v5570_v28  ;;  %v2852_v4 = vld [vmem:[#allocation2 + $0x51] ss:$2 sm:$0x1f]  ;;  %v1948_v19 = vmax.f32 %v5561_v13, %v1896_v36  ;;  %v1949_v58 = vmax.f32 %v5564_v34, %v1897_v42 }
 0x247   :  { %1991 = vst.msk [vmem:[#allocation2 + $0xf8] sm:$0xff] %vm251_vm0, %v1939_v54  ;;  %v1900_v59 = vmul.f32 0.2, %v5573_v23  ;;  %v2990_v11 = vld [vmem:[#allocation2 + $0x33] ss:$2 sm:$0x1f]  ;;  %v1950_v18 = vmax.f32 %v5567_v60, %v1898_v0 }
 0x248   :  { %1992 = vst.msk [vmem:[#allocation2 + $0x100] sm:$0xff] %vm251_vm0, %v1940_v63  ;;  %v1901_v57 = vmul.f32 0.2, %v5576_v51  ;;  %v1902_v20 = vmul.f32 0.2, %v5579_v21  ;;  %v1951_v2 = vmax.f32 %v5570_v28, %v1899_v46 }
 0x249   :  { %1993 = vst.msk [vmem:[#allocation2 + $0x108] sm:$0xff] %vm251_vm0, %v1941_v8  ;;  %v1903_v13 = vmul.f32 0.2, %v5582_v17  ;;  %v1904_v30 = vmul.f32 0.2, %v5585_v3  ;;  %v1952_v34 = vmax.f32 %v5573_v23, %v1900_v59 }
 0x24a   :  { %1994 = vst.msk [vmem:[#allocation2 + $0x110] sm:$0xff] %vm251_vm0, %v1942_v12  ;;  %v1905_v32 = vmul.f32 0.2, %v5588_v10  ;;  %v1953_v15 = vmax.f32 %v5576_v51, %v1901_v57  ;;  %v1954_v60 = vmax.f32 %v5579_v21, %v1902_v20  ;;  %v2045_v61 = vld [vmem:[#allocation2 + $0x21] ss:$2 sm:$0x1f] }
 0x24b   :  { %1995 = vst.msk [vmem:[#allocation2 + $0x118] sm:$0xff] %vm251_vm0, %v1943_v45  ;;  %2949 = vrot.lane.b32.xlu1 %v2920_v5, %s4689_s24  ;;  %2881 = vrot.lane.b32.xlu0 %v2852_v4, %s4687_s22  ;;  %v1955_v28 = vmax.f32 %v5582_v17, %v1903_v13  ;;  %v2043_v23 = vld [vmem:[#allocation2 + $0x1] ss:$2 sm:$0x1f]  ;;  %v1956_v48 = vmax.f32 %v5585_v3, %v1904_v30 }
 0x24c   :  { %1996 = vst.msk [vmem:[#allocation2 + $0x120] sm:$0xff] %vm251_vm0, %v1944_v40  ;;  %v2116_v51 = vld [vmem:[#allocation2 + $0x22] ss:$2 sm:$0x1f]  ;;  %v1957_v44 = vmax.f32 %v5588_v10, %v1905_v32  ;;  %v4691_v10 = vmov 0.0  }
 0x24d   :  { %1997 = vst.msk [vmem:[#allocation2 + $0x128] sm:$0xff] %vm251_vm0, %v1945_v33  ;;  %3019 = vrot.lane.b32.xlu2 %v2990_v11, %s4690_s25  ;;  %v2114_v21 = vld [vmem:[#allocation2 + $0x2] ss:$2 sm:$0x1f] }
 0x24e   :  { %1998 = vst.msk [vmem:[#allocation2 + $0x130] sm:$0xff] %vm251_vm0, %v1946_v49  ;;  %v2992_v17 = vld [vmem:[#allocation2 + $0x53] ss:$2 sm:$0x1f] }
 0x24f   :  { %1999 = vst.msk [vmem:[#allocation2 + $0x138] sm:$0xff] %vm251_vm0, %v1947_v50  ;;  %v2256_v3 = vld [vmem:[#allocation2 + $0x10] ss:$2 sm:$0x1f] }
 0x250   :  { %2000 = vst.msk [vmem:[#allocation2 + $0x140] sm:$0xff] %vm251_vm0, %v1948_v19  ;;  %v2540_v52 = vld [vmem:[#allocation2 + $0x20] ss:$2 sm:$0x1f]  ;;  %v4635_v49 = vld [vmem:[%s6484_s4 + $0x78] sm:$0xff]  ;;  %v4634_v19 = vld [vmem:[%s6484_s4 + $0x70] sm:$0xff] }
 0x251   :  { %2001 = vst.msk [vmem:[#allocation2 + $0x148] sm:$0xff] %vm251_vm0, %v1949_v58  ;;  %v2187_v26 = vld [vmem:[#allocation2 + $0x23] ss:$2 sm:$0x1f]  ;;  %3251 = vmatpush.bf16.msrb.mxu2 %v4635_v49 }
 0x252   :  { %2002 = vst.msk [vmem:[#allocation2 + $0x150] sm:$0xff] %vm251_vm0, %v1950_v18  ;;  %v2185_v1 = vld [vmem:[#allocation2 + $0x3] ss:$2 sm:$0x1f] }
 0x253   :  { %2003 = vst.msk [vmem:[#allocation2 + $0x158] sm:$0xff] %vm251_vm0, %v1951_v2  ;;  %2074 = vrot.lane.b32.xlu1 %v2045_v61, %s4686_s21  ;;  %2072 = vrot.lane.b32.xlu0 %v2043_v23, %s4686_s21  ;;  %v2329_v25 = vld [vmem:[#allocation2 + $0x31] ss:$2 sm:$0x1f]  ;;  %v4633_v58 = vld [vmem:[%s6484_s4 + $0x68] sm:$0xff]  ;;  %v4632_v2 = vld [vmem:[%s6484_s4 + $0x60] sm:$0xff] }
 0x254   :  { %2004 = vst.msk [vmem:[#allocation2 + $0x160] sm:$0xff] %vm251_vm0, %v1952_v34  ;;  %v2327_v16 = vld [vmem:[#allocation2 + $0x11] ss:$2 sm:$0x1f] }
 0x255   :  { %2005 = vst.msk [vmem:[#allocation2 + $0x168] sm:$0xff] %vm251_vm0, %v1953_v15  ;;  %2145 = vrot.lane.b32.xlu2 %v2116_v51, %s4685_s3  ;;  %v2258_v31 = vld [vmem:[#allocation2 + $0x30] ss:$2 sm:$0x1f]  ;;  %3252 = vmatpush.bf16.msrb.mxu2 %v4634_v19 }
 0x256   :  { %2006 = vst.msk [vmem:[#allocation2 + $0x170] sm:$0xff] %vm251_vm0, %v1954_v60  ;;  %v2469_v7 = vld [vmem:[#allocation2 + $0x13] ss:$2 sm:$0x1f] }
 0x257   :  { %2007 = vst.msk [vmem:[#allocation2 + $0x178] sm:$0xff] %vm251_vm0, %v1955_v28  ;;  %v2400_v56 = vld [vmem:[#allocation2 + $0x32] ss:$2 sm:$0x1f] }
 0x258   :  { %2008 = vst.msk [vmem:[#allocation2 + $0x180] sm:$0xff] %vm251_vm0, %v1956_v48  ;;  %v2398_v55 = vld [vmem:[#allocation2 + $0x12] ss:$2 sm:$0x1f] }
 0x259   :  { %2009 = vst.msk [vmem:[#allocation2 + $0x188] sm:$0xff] %vm251_vm0, %v1957_v44  ;;  %v2576_v22 = vld [vmem:[#allocation2 + $0x81] ss:$2 sm:$0x1f]  ;;  %vm2102_vm0 = vcmask 258176   ;;  %3253 = vmatpush.bf16.msrb.mxu2 %v4633_v58  ;;  %v4631_v34 = vld [vmem:[%s6484_s4 + $0x58] sm:$0xff] }
 0x25a   :  { %34 = vst [vmem:[#allocation3 + $0x8] sm:$0xff] %v4691_v10  ;;  %v2574_v29 = vld [vmem:[#allocation2 + $0x61] ss:$2 sm:$0x1f]  ;;  %v4630_v23 = vld [vmem:[%s6484_s4 + $0x50] sm:$0xff] }
 0x25b   :  { %2143 = vrot.lane.b32.xlu1 %v2114_v21, %s4685_s3  ;;  %3021 = vrot.lane.b32.xlu0 %v2992_v17, %s4690_s25  ;;  %2559 = vst.msk [vmem:[#allocation3 + $0x8] sm:$0x1f] %vm2031_vm15, %v2540_v52  ;;  %v2471_v6 = vld [vmem:[#allocation2 + $0x33] ss:$2 sm:$0x1f]  ;;  %v4629_v21 = vld [vmem:[%s6484_s4 + $0x48] sm:$0xff] }
 0x25c   :  { %33 = vst [vmem:[#allocation3] sm:$0xff] %v4691_v10  ;;  %v2542_v38 = vld [vmem:[#allocation2 + $0x40] ss:$2 sm:$0x1f] }
 0x25d   :  { %2285 = vrot.lane.b32.xlu2 %v2256_v3, %s4688_s23  ;;  %35 = vst [vmem:[#allocation3 + $0x10] sm:$0xff] %v4691_v10  ;;  %v2714_v27 = vld [vmem:[#allocation2 + $0x63] ss:$2 sm:$0x1f]  ;;  %3254 = vmatpush.bf16.msrb.mxu2 %v4632_v2 }
 0x25e   :  { %36 = vst [vmem:[#allocation3 + $0x18] sm:$0xff] %v4691_v10  ;;  %v2014_v37 = vld [vmem:[#allocation2 + $0x20] ss:$2 sm:$0x1f] }
 0x25f   :  { %37 = vst [vmem:[#allocation3 + $0x20] sm:$0xff] %v4691_v10  ;;  %v2012_v47 = vld [vmem:[#allocation2] ss:$2 sm:$0x1f] }
 0x260   :  { %38 = vst [vmem:[#allocation3 + $0x28] sm:$0xff] %v4691_v10  ;;  %v2546_v39 = vld [vmem:[#allocation2 + $0x80] ss:$2 sm:$0x1f] }
 0x261   :  { %39 = vst [vmem:[#allocation3 + $0x30] sm:$0xff] %v4691_v10  ;;  %v2544_v41 = vld [vmem:[#allocation2 + $0x60] ss:$2 sm:$0x1f]  ;;  %3255 = vmatpush.bf16.msrb.mxu2 %v4631_v34 }
 0x262   :  { %40 = vst [vmem:[#allocation3 + $0x38] sm:$0xff] %v4691_v10  ;;  %v2646_v53 = vld [vmem:[#allocation2 + $0x82] ss:$2 sm:$0x1f] }
 0x263   :  { %2216 = vrot.lane.b32.xlu1 %v2187_v26, %s4684_s2  ;;  %2214 = vrot.lane.b32.xlu0 %v2185_v1, %s4684_s2  ;;  %41 = vst [vmem:[#allocation3 + $0x40] sm:$0xff] %v4691_v10  ;;  %v2018_v54 = vld [vmem:[#allocation2 + $0x60] ss:$2 sm:$0x1f] }
 0x264   :  { %42 = vst [vmem:[#allocation3 + $0x48] sm:$0xff] %v4691_v10  ;;  %v2644_v35 = vld [vmem:[#allocation2 + $0x62] ss:$2 sm:$0x1f] }
 0x265   :  { %2358 = vrot.lane.b32.xlu2 %v2329_v25, %s4687_s22  ;;  %43 = vst [vmem:[#allocation3 + $0x50] sm:$0xff] %v4691_v10  ;;  %v2786_v63 = vld [vmem:[#allocation2 + $0x90] ss:$2 sm:$0x1f]  ;;  %3256 = vmatpush.bf16.msrb.mxu2 %v4630_v23  ;;  %v4628_v25 = vld [vmem:[%s6484_s4 + $0x40] sm:$0xff] }
 0x266   :  { %44 = vst [vmem:[#allocation3 + $0x58] sm:$0xff] %v4691_v10  ;;  %v2016_v24 = vld [vmem:[#allocation2 + $0x40] ss:$2 sm:$0x1f] }
 0x267   :  { %45 = vst [vmem:[#allocation3 + $0x60] sm:$0xff] %v4691_v10  ;;  %v2784_v62 = vld [vmem:[#allocation2 + $0x70] ss:$2 sm:$0x1f] }
 0x268   :  { %46 = vst [vmem:[#allocation3 + $0x68] sm:$0xff] %v4691_v10  ;;  %v2716_v8 = vld [vmem:[#allocation2 + $0x83] ss:$2 sm:$0x1f] }
 0x269   :  { %47 = vst [vmem:[#allocation3 + $0x70] sm:$0xff] %v4691_v10  ;;  %v2924_v9 = vld [vmem:[#allocation2 + $0x72] ss:$2 sm:$0x1f]  ;;  %3257 = vmatpush.bf16.msrb.mxu2 %v4629_v21 }
 0x26a   :  { %48 = vst [vmem:[#allocation3 + $0x78] sm:$0xff] %v4691_v10  ;;  %v2548_v12 = vld [vmem:[#allocation2 + $0xa0] ss:$2 sm:$0x1f] }
 0x26b   :  { %2356 = vrot.lane.b32.xlu1 %v2327_v16, %s4687_s22  ;;  %2287 = vrot.lane.b32.xlu0 %v2258_v31, %s4688_s23  ;;  %49 = vst [vmem:[#allocation3 + $0x80] sm:$0xff] %v4691_v10  ;;  %v2856_v45 = vld [vmem:[#allocation2 + $0x91] ss:$2 sm:$0x1f] }
 0x26c   :  { %50 = vst [vmem:[#allocation3 + $0x88] sm:$0xff] %v4691_v10  ;;  %v2854_v36 = vld [vmem:[#allocation2 + $0x71] ss:$2 sm:$0x1f] }
 0x26d   :  { %2498 = vrot.lane.b32.xlu2 %v2469_v7, %s4690_s25  ;;  %51 = vst [vmem:[#allocation3 + $0x90] sm:$0xff] %v4691_v10  ;;  %v2020_v40 = vld [vmem:[#allocation2 + $0x80] ss:$2 sm:$0x1f]  ;;  %3258 = vmatpush.bf16.msrb.mxu2 %v4628_v25 }
 0x26e   :  { %52 = vst [vmem:[#allocation3 + $0x98] sm:$0xff] %v4691_v10  ;;  %v2550_v42 = vld [vmem:[#allocation2 + $0xf0] ss:$2 sm:$0x1f] }
 0x26f   :  { %53 = vst [vmem:[#allocation5] sm:$0xff] %v4691_v10  ;;  %v2049_v33 = vld [vmem:[#allocation2 + $0x61] ss:$2 sm:$0x1f] }
 0x270   :  { %54 = vst [vmem:[#allocation5 + $0x8] sm:$0xff] %v4691_v10  ;;  %v2047_v5 = vld [vmem:[#allocation2 + $0x41] ss:$2 sm:$0x1f] }
 0x271   :  { %55 = vst [vmem:[#allocation5 + $0x10] sm:$0xff] %v4691_v10  ;;  %v2926_v46 = vld [vmem:[#allocation2 + $0x92] ss:$2 sm:$0x1f] }
 0x272   :  { %56 = vst [vmem:[#allocation5 + $0x18] sm:$0xff] %v4691_v10  ;;  %v2118_v4 = vld [vmem:[#allocation2 + $0x42] ss:$2 sm:$0x1f] }
 0x273   :  { %2429 = vrot.lane.b32.xlu1 %v2400_v56, %s4689_s24  ;;  %2427 = vrot.lane.b32.xlu0 %v2398_v55, %s4689_s24  ;;  %57 = vst [vmem:[#allocation5 + $0x20] sm:$0xff] %v4691_v10  ;;  %v2022_v11 = vld [vmem:[#allocation2 + $0xd0] ss:$2 sm:$0x1f] }
 0x274   :  { %58 = vst [vmem:[#allocation5 + $0x28] sm:$0xff] %v4691_v10  ;;  %v2996_v20 = vld [vmem:[#allocation2 + $0x93] ss:$2 sm:$0x1f] }
 0x275   :  { %2605 = vrot.lane.b32.xlu2 %v2576_v22, %s4686_s21  ;;  %59 = vst [vmem:[#allocation5 + $0x30] sm:$0xff] %v4691_v10  ;;  %v2994_v18 = vld [vmem:[#allocation2 + $0x73] ss:$2 sm:$0x1f] }
 0x276   :  { %60 = vst [vmem:[#allocation5 + $0x38] sm:$0xff] %v4691_v10  ;;  %v2191_v13 = vld [vmem:[#allocation2 + $0x63] ss:$2 sm:$0x1f] }
 0x277   :  { %2560 = vst.msk [vmem:[#allocation3 + $0x18] sm:$0x1f] %vm2031_vm15, %v2542_v38  ;;  %v2554_v32 = vld [vmem:[#allocation2 + $0x130] ss:$2 sm:$0x1f] }
 0x278   :  { %2033 = vst.msk [vmem:[#allocation3 + $0x10] sm:$0x1f] %vm2031_vm15, %v2014_v37  ;;  %v2552_v15 = vld [vmem:[#allocation2 + $0x110] ss:$2 sm:$0x1f] }
 0x279   :  { %2032 = vst.msk [vmem:[#allocation3] sm:$0x1f] %vm2031_vm15, %v2012_v47  ;;  %v2189_v60 = vld [vmem:[#allocation2 + $0x43] ss:$2 sm:$0x1f]  ;;  %v4626_v37 = vld [vmem:[%s6484_s4 + $0x30] sm:$0xff] }
 0x27a   :  { %2562 = vst.msk [vmem:[#allocation3 + $0x38] sm:$0x1f] %vm2031_vm15, %v2546_v39  ;;  %v2120_v61 = vld [vmem:[#allocation2 + $0x62] ss:$2 sm:$0x1f] }
 0x27b   :  { %2603 = vrot.lane.b32.xlu1 %v2574_v29, %s4686_s21  ;;  %2500 = vrot.lane.b32.xlu0 %v2471_v6, %s4690_s25  ;;  %2561 = vst.msk [vmem:[#allocation3 + $0x28] sm:$0x1f] %vm2031_vm15, %v2544_v41  ;;  %v2331_v28 = vld [vmem:[#allocation2 + $0x51] ss:$2 sm:$0x1f] }
 0x27c   :  { %2035 = vst.msk [vmem:[#allocation3 + $0x30] sm:$0x1f] %vm2031_vm15, %v2018_v54  ;;  %v2262_v17 = vld [vmem:[#allocation2 + $0x70] ss:$2 sm:$0x1f] }
 0x27d   :  { %2743 = vrot.lane.b32.xlu2 %v2714_v27, %s4684_s2  ;;  %2034 = vst.msk [vmem:[#allocation3 + $0x20] sm:$0x1f] %vm2031_vm15, %v2016_v24  ;;  %v2260_v3 = vld [vmem:[#allocation2 + $0x50] ss:$2 sm:$0x1f] }
 0x27e   :  { %2563 = vst.msk [vmem:[#allocation3 + $0x48] sm:$0x1f] %vm2031_vm15, %v2548_v12  ;;  %v2026_v10 = vld [vmem:[#allocation2 + $0x110] ss:$2 sm:$0x1f] }
 0x27f   :  { %2036 = vst.msk [vmem:[#allocation3 + $0x40] sm:$0x1f] %vm2031_vm15, %v2020_v40  ;;  %v2024_v52 = vld [vmem:[#allocation2 + $0xf0] ss:$2 sm:$0x1f] }
 0x280   :  { %2564 = vst.msk [vmem:[#allocation3 + $0x58] sm:$0x1f] %vm2031_vm15, %v2550_v42  ;;  %v2558_v26 = vld [vmem:[#allocation2 + $0x170] ss:$2 sm:$0x1f] }
 0x281   :  { %2037 = vst.msk [vmem:[#allocation3 + $0x50] sm:$0x1f] %vm2031_vm15, %v2022_v11  ;;  %v2404_v1 = vld [vmem:[#allocation2 + $0x72] ss:$2 sm:$0x1f] }
 0x282   :  { %2566 = vst.msk [vmem:[#allocation3 + $0x78] sm:$0x1f] %vm2031_vm15, %v2554_v32  ;;  %v2556_v7 = vld [vmem:[#allocation2 + $0x150] ss:$2 sm:$0x1f] }
 0x283   :  { %2675 = vrot.lane.b32.xlu1 %v2646_v53, %s4685_s3  ;;  %2673 = vrot.lane.b32.xlu0 %v2644_v35, %s4685_s3  ;;  %2565 = vst.msk [vmem:[#allocation3 + $0x68] sm:$0x1f] %vm2031_vm15, %v2552_v15  ;;  %v2030_v55 = vld [vmem:[#allocation2 + $0x150] ss:$2 sm:$0x1f]  ;;  %v4625_v53 = vld [vmem:[%s6484_s4 + $0x28] sm:$0xff] }
 0x284   :  { %v2740_v43 = vpop.permute.xlu2 %2739  ;;  %2039 = vst.msk [vmem:[#allocation3 + $0x70] sm:$0x1f] %vm2031_vm15, %v2026_v10  ;;  %v2028_v22 = vld [vmem:[#allocation2 + $0x130] ss:$2 sm:$0x1f] }
 0x285   :  { %2815 = vrot.lane.b32.xlu2 %v2786_v63, %s4688_s23  ;;  %2038 = vst.msk [vmem:[#allocation3 + $0x60] sm:$0x1f] %vm2031_vm15, %v2024_v52  ;;  %v4627_v29 = vld [vmem:[%s6484_s4 + $0x38] sm:$0xff]  ;;  %v2578_v27 = vld [vmem:[#allocation2 + $0xa1] ss:$2 sm:$0x1f] }
 0x286   :  { %2568 = vst.msk [vmem:[#allocation3 + $0x98] sm:$0x1f] %vm2031_vm15, %v2558_v26  ;;  %v2402_v6 = vld [vmem:[#allocation2 + $0x52] ss:$2 sm:$0x1f]  ;;  %3217 = vmatpush.bf16.msrb.mxu1 %v4627_v29  ;;  %v4624_v63 = vld [vmem:[%s6484_s4 + $0x20] sm:$0xff] }
 0x287   :  { %2567 = vst.msk [vmem:[#allocation3 + $0x88] sm:$0x1f] %vm2031_vm15, %v2556_v7  ;;  %v2333_v38 = vld [vmem:[#allocation2 + $0x71] ss:$2 sm:$0x1f] }
 0x288   :  { %2041 = vst.msk [vmem:[#allocation3 + $0x90] sm:$0x1f] %vm2031_vm15, %v2030_v55  ;;  %v2475_v54 = vld [vmem:[#allocation2 + $0x73] ss:$2 sm:$0x1f] }
 0x289   :  { %2040 = vst.msk [vmem:[#allocation3 + $0x80] sm:$0x1f] %vm2031_vm15, %v2028_v22  ;;  %v2473_v35 = vld [vmem:[#allocation2 + $0x53] ss:$2 sm:$0x1f] }
 0x28a   :  { %3218 = vmatpush.bf16.msrb.mxu1 %v4626_v37  ;;  %v2648_v12 = vld [vmem:[#allocation2 + $0xa2] ss:$2 sm:$0x1f]  ;;  %v2720_v49 = vld [vmem:[#allocation2 + $0xf3] ss:$2 sm:$0x1f] }
 0x28b   :  { %2813 = vrot.lane.b32.xlu1 %v2784_v62, %s4688_s23  ;;  %2745 = vrot.lane.b32.xlu0 %v2716_v8, %s4684_s2  ;;  %v2930_v32 = vld [vmem:[#allocation2 + $0x102] ss:$2 sm:$0x1f]  ;;  %v2928_v15 = vld [vmem:[#allocation2 + $0xb2] ss:$2 sm:$0x1f] }
 0x28c   :  { %v2124_v10 = vld [vmem:[#allocation2 + $0xd2] ss:$2 sm:$0x1f]  ;;  %v2122_v52 = vld [vmem:[#allocation2 + $0x82] ss:$2 sm:$0x1f] }
 0x28d   :  { %2953 = vrot.lane.b32.xlu2 %v2924_v9, %s4689_s24  ;;  %v4623_v9 = vld [vmem:[%s6484_s4 + $0x18] sm:$0xff]  ;;  %v2266_v26 = vld [vmem:[#allocation2 + $0xe0] ss:$2 sm:$0x1f] }
 0x28e   :  { %3219 = vmatpush.bf16.msrb.mxu1 %v4625_v53  ;;  %v2264_v55 = vld [vmem:[#allocation2 + $0x90] ss:$2 sm:$0x1f]  ;;  %v2195_v22 = vld [vmem:[#allocation2 + $0xd3] ss:$2 sm:$0x1f] }
 0x28f   :  { %v5814_v14 = vpop.permute.xlu2 %2741  ;;  %v2406_v29 = vld [vmem:[#allocation2 + $0x92] ss:$2 sm:$0x1f]  ;;  %v2337_v37 = vld [vmem:[#allocation2 + $0xe1] ss:$2 sm:$0x1f] }
 0x292   :  { %3220 = vmatpush.bf16.msrb.mxu1 %v4624_v63  ;;  %v2652_v63 = vld [vmem:[#allocation2 + $0x112] ss:$2 sm:$0x1f] }
 0x293   :  { %2885 = vrot.lane.b32.xlu1 %v2856_v45, %s4687_s22  ;;  %2883 = vrot.lane.b32.xlu0 %v2854_v36, %s4687_s22  ;;  %v2788_v45 = vld [vmem:[#allocation2 + $0xb0] ss:$2 sm:$0x1f] }
 0x294   :  { %v4622_v36 = vld [vmem:[%s6484_s4 + $0x10] sm:$0xff] }
 0x295   :  { %2078 = vrot.lane.b32.xlu2 %v2049_v33, %s4686_s21 }
 0x296   :  { %3221 = vmatpush.bf16.msrb.mxu1 %v4623_v9  ;;  %v2584_v9 = vld [vmem:[#allocation2 + $0x131] ss:$2 sm:$0x1f] }
 0x297   :  { %v5822_v0 = vpop.permute.xlu2 %2879 }
 0x29a   :  { %3222 = vmatpush.bf16.msrb.mxu1 %v4622_v36 }
 0x29b   :  { %2076 = vrot.lane.b32.xlu1 %v2047_v5, %s4686_s21  ;;  %2955 = vrot.lane.b32.xlu0 %v2926_v46, %s4689_s24  ;;  %v2718_v5 = vld [vmem:[#allocation2 + $0xa3] ss:$2 sm:$0x1f] }
 0x29c   :  { %v2670_v50 = vpop.permute.xlu1 %2669  ;;  %v2860_v46 = vld [vmem:[#allocation2 + $0x101] ss:$2 sm:$0x1f] }
 0x29d   :  { %2147 = vrot.lane.b32.xlu2 %v2118_v4, %s4685_s3 }
 0x29e   :  { %v2600_v59 = vpop.permute.xlu0 %2599 }
 0x29f   :  { %2629 = vst.msk [vmem:[#allocation3 + $0x8] sm:$0x1f] %vm2102_vm0, %v2600_v59  ;;  %v5835_v57 = vpop.permute.xlu2 %2951 }
 0x2a0   :  { %2699 = vst.msk [vmem:[#allocation3 + $0x8] sm:$0x1f] %vm2173_vm1, %v2670_v50  ;;  %v4620_v50 = vld [vmem:[%s6484_s4] sm:$0xff] }
 0x2a1   :  { %2769 = vst.msk [vmem:[#allocation3 + $0x8] sm:$0x1f] %vm2244_vm2, %v2740_v43  ;;  %v2650_v43 = vld [vmem:[#allocation2 + $0xf2] ss:$2 sm:$0x1f] }
 0x2a3   :  { %3025 = vrot.lane.b32.xlu1 %v2996_v20, %s4690_s25  ;;  %3023 = vrot.lane.b32.xlu0 %v2994_v18, %s4690_s25  ;;  %v2858_v20 = vld [vmem:[#allocation2 + $0xb1] ss:$2 sm:$0x1f]  ;;  %v2790_v18 = vld [vmem:[#allocation2 + $0x100] ss:$2 sm:$0x1f] }
 0x2a5   :  { %2220 = vrot.lane.b32.xlu2 %v2191_v13, %s4684_s2  ;;  %v2051_v13 = vld [vmem:[#allocation2 + $0x81] ss:$2 sm:$0x1f] }
 0x2a7   :  { %v5848_v30 = vpop.permute.xlu2 %3019 }
 0x2ab   :  { %2218 = vrot.lane.b32.xlu1 %v2189_v60, %s4684_s2  ;;  %2149 = vrot.lane.b32.xlu0 %v2120_v61, %s4685_s3  ;;  %v3000_v60 = vld [vmem:[#allocation2 + $0x103] ss:$2 sm:$0x1f] }
 0x2ad   :  { %v2672_v48 = vpop.permute.xlu1 %2671  ;;  %2360 = vrot.lane.b32.xlu2 %v2331_v28, %s4687_s22  ;;  %v2602_v51 = vpop.permute.xlu0 %2601 }
 0x2ae   :  { %2630 = vst.msk [vmem:[#allocation3 + $0x18] sm:$0x1f] %vm2102_vm0, %v2602_v51  ;;  %v2053_v51 = vld [vmem:[#allocation2 + $0xd1] ss:$2 sm:$0x1f] }
 0x2af   :  { %v5862_v44 = vpop.permute.xlu2 %2145  ;;  %2700 = vst.msk [vmem:[#allocation3 + $0x18] sm:$0x1f] %vm2173_vm1, %v2672_v48  ;;  %v2998_v48 = vld [vmem:[#allocation2 + $0xb3] ss:$2 sm:$0x1f] }
 0x2b0   :  { %2770 = vst.msk [vmem:[#allocation3 + $0x18] sm:$0x1f] %vm2244_vm2, %v5814_v14  ;;  %v2580_v14 = vld [vmem:[#allocation2 + $0xf1] ss:$2 sm:$0x1f] }
 0x2b3   :  { %2291 = vrot.lane.b32.xlu1 %v2262_v17, %s4688_s23  ;;  %2289 = vrot.lane.b32.xlu0 %v2260_v3, %s4688_s23 }
 0x2b5   :  { %v2812_v16 = vpop.permute.xlu1 %2811  ;;  %2433 = vrot.lane.b32.xlu2 %v2404_v1, %s4689_s24  ;;  %v2810_v31 = vpop.permute.xlu0 %2809 }
 0x2b6   :  { %2840 = vst.msk [vmem:[#allocation3 + $0x18] sm:$0x1f] %vm2315_vm3, %v2812_v16 }
 0x2b7   :  { %2839 = vst.msk [vmem:[#allocation3 + $0x8] sm:$0x1f] %vm2315_vm3, %v2810_v31  ;;  %v5881_v56 = vpop.permute.xlu2 %2285 }
 0x2b8   :  { %2909 = vst.msk [vmem:[#allocation3 + $0x8] sm:$0x1f] %vm2386_vm4, %v5822_v0  ;;  %v4621_v0 = vld [vmem:[%s6484_s4 + $0x8] sm:$0xff] }
 0x2b9   :  { %3223 = vmatpush.bf16.msrb.mxu1 %v4621_v0  ;;  %v2862_v0 = vld [vmem:[#allocation2 + $0x121] ss:$2 sm:$0x1f] }
 0x2bb   :  { %2431 = vrot.lane.b32.xlu1 %v2402_v6, %s4689_s24  ;;  %2362 = vrot.lane.b32.xlu0 %v2333_v38, %s4687_s22 }
 0x2bd   :  { %v2950_v47 = vpop.permute.xlu1 %2949  ;;  %2607 = vrot.lane.b32.xlu2 %v2578_v27, %s4686_s21  ;;  %v2882_v39 = vpop.permute.xlu0 %2881  ;;  %3224 = vmatpush.bf16.msrb.mxu1 %v4620_v50 }
 0x2be   :  { %2979 = vst.msk [vmem:[#allocation3 + $0x8] sm:$0x1f] %vm2457_vm5, %v2950_v47  ;;  %v2335_v47 = vld [vmem:[#allocation2 + $0x91] ss:$2 sm:$0x1f] }
 0x2bf   :  { %3049 = vst.msk [vmem:[#allocation3 + $0x8] sm:$0x1f] %vm2528_vm6, %v5848_v30  ;;  %v5900_v41 = vpop.permute.xlu2 %2358 }
 0x2c0   :  { %2910 = vst.msk [vmem:[#allocation3 + $0x18] sm:$0x1f] %vm2386_vm4, %v2882_v39  ;;  %v2479_v39 = vld [vmem:[#allocation2 + $0xe3] ss:$2 sm:$0x1f] }
 0x2c1   :  { %2980 = vst.msk [vmem:[#allocation3 + $0x18] sm:$0x1f] %vm2457_vm5, %v5835_v57 }
 0x2c3   :  { %2504 = vrot.lane.b32.xlu1 %v2475_v54, %s4690_s25  ;;  %2502 = vrot.lane.b32.xlu0 %v2473_v35, %s4690_s25  ;;  %v2477_v35 = vld [vmem:[#allocation2 + $0x93] ss:$2 sm:$0x1f] }
 0x2c5   :  { %v2075_v24 = vpop.permute.xlu1 %2074  ;;  %2679 = vrot.lane.b32.xlu2 %v2650_v43, %s4685_s3  ;;  %v2073_v62 = vpop.permute.xlu0 %2072  ;;  %v2408_v43 = vld [vmem:[#allocation2 + $0xe2] ss:$2 sm:$0x1f] }
 0x2c6   :  { %2104 = vst.msk [vmem:[#allocation3 + $0x10] sm:$0x1f] %vm2102_vm0, %v2075_v24  ;;  %v3060_v19 = vld [vmem:[#allocation3 + $0x8] sm:$0xff] }
 0x2c7   :  { %2175 = vst.msk [vmem:[#allocation3 + $0x10] sm:$0x1f] %vm2173_vm1, %v5862_v44  ;;  %v2499_v8 = vpop.permute.xlu2 %2498  ;;  %v2193_v44 = vld [vmem:[#allocation2 + $0x83] ss:$2 sm:$0x1f] }
 0x2c8   :  { %2103 = vst.msk [vmem:[#allocation3] sm:$0x1f] %vm2102_vm0, %v2073_v62 }
 0x2cb   :  { %2677 = vrot.lane.b32.xlu1 %v2648_v12, %s4685_s3  ;;  %2609 = vrot.lane.b32.xlu0 %v2580_v14, %s4686_s21  ;;  %v2582_v12 = vld [vmem:[#allocation2 + $0x111] ss:$2 sm:$0x1f] }
 0x2cc   :  { %v2724_v14 = vld [vmem:[#allocation2 + $0x133] ss:$2 sm:$0x1f] }
 0x2cd   :  { %v2144_v40 = vpop.permute.xlu1 %2143  ;;  %2817 = vrot.lane.b32.xlu2 %v2788_v45, %s4688_s23  ;;  %v3022_v42 = vpop.permute.xlu0 %3021 }
 0x2ce   :  { %2174 = vst.msk [vmem:[#allocation3] sm:$0x1f] %vm2173_vm1, %v2144_v40 }
 0x2cf   :  { %3050 = vst.msk [vmem:[#allocation3 + $0x18] sm:$0x1f] %vm2528_vm6, %v3022_v42  ;;  %v2606_v33 = vpop.permute.xlu2 %2605  ;;  %v2722_v42 = vld [vmem:[#allocation2 + $0x113] ss:$2 sm:$0x1f] }
 0x2d0   :  { %2632 = vst.msk [vmem:[#allocation3 + $0x38] sm:$0x1f] %vm2102_vm0, %v2606_v33  ;;  %v2654_v33 = vld [vmem:[#allocation2 + $0x132] ss:$2 sm:$0x1f] }
 0x2d3   :  { %2749 = vrot.lane.b32.xlu1 %v2720_v49, %s4684_s2  ;;  %2747 = vrot.lane.b32.xlu0 %v2718_v5, %s4684_s2 }
 0x2d5   :  { %v2217_v4 = vpop.permute.xlu1 %2216  ;;  %2889 = vrot.lane.b32.xlu2 %v2860_v46, %s4687_s22  ;;  %v2215_v59 = vpop.permute.xlu0 %2214 }
 0x2d6   :  { %2246 = vst.msk [vmem:[#allocation3 + $0x10] sm:$0x1f] %vm2244_vm2, %v2217_v4  ;;  %v3062_v11 = vld [vmem:[#allocation3 + $0x18] sm:$0xff] }
 0x2d7   :  { %2245 = vst.msk [vmem:[#allocation3] sm:$0x1f] %vm2244_vm2, %v2215_v59  ;;  %v3080_v57 = vpack.c.bf16 %v3062_v11, %v3060_v19  ;;  %v2744_v58 = vpop.permute.xlu2 %2743  ;;  %v2794_v19 = vld [vmem:[#allocation2 + $0x140] ss:$2 sm:$0x1f] }
 0x2d8   :  { %2316 = vst.msk [vmem:[#allocation3] sm:$0x1f] %vm2315_vm3, %v5881_v56  ;;  %v2792_v11 = vld [vmem:[#allocation2 + $0x120] ss:$2 sm:$0x1f] }
 0x2d9   :  { %3259 = vmatmul.bf16.vlgmr.msrb.gmra.mxu2 %v3080_v57  ;;  %v2934_v57 = vld [vmem:[#allocation2 + $0x142] ss:$2 sm:$0x1f] }
 0x2db   :  { %2887 = vrot.lane.b32.xlu1 %v2858_v20, %s4687_s22  ;;  %2819 = vrot.lane.b32.xlu0 %v2790_v18, %s4688_s23 }
 0x2dd   :  { %v2357_v2 = vpop.permute.xlu1 %2356  ;;  %2080 = vrot.lane.b32.xlu2 %v2051_v13, %s4686_s21  ;;  %v2288_v30 = vpop.permute.xlu0 %2287  ;;  %v2932_v13 = vld [vmem:[#allocation2 + $0x122] ss:$2 sm:$0x1f] }
 0x2de   :  { %2387 = vst.msk [vmem:[#allocation3] sm:$0x1f] %vm2386_vm4, %v2357_v2  ;;  %v2864_v2 = vld [vmem:[#allocation2 + $0x141] ss:$2 sm:$0x1f] }
 0x2df   :  { %2317 = vst.msk [vmem:[#allocation3 + $0x10] sm:$0x1f] %vm2315_vm3, %v2288_v30  ;;  %v2816_v34 = vpop.permute.xlu2 %2815  ;;  %v3002_v30 = vld [vmem:[#allocation2 + $0x123] ss:$2 sm:$0x1f] }
 0x2e0   :  { %2388 = vst.msk [vmem:[#allocation3 + $0x10] sm:$0x1f] %vm2386_vm4, %v5900_v41 }
 0x2e3   :  { %2959 = vrot.lane.b32.xlu1 %v2930_v32, %s4689_s24  ;;  %2957 = vrot.lane.b32.xlu0 %v2928_v15, %s4689_s24 }
 0x2e5   :  { %v2430_v61 = vpop.permute.xlu1 %2429  ;;  %3029 = vrot.lane.b32.xlu2 %v3000_v60, %s4690_s25  ;;  %v2428_v28 = vpop.permute.xlu0 %2427  ;;  %v2057_v60 = vld [vmem:[#allocation2 + $0x111] ss:$2 sm:$0x1f] }
 0x2e6   :  { %2459 = vst.msk [vmem:[#allocation3 + $0x10] sm:$0x1f] %vm2457_vm5, %v2430_v61  ;;  %v2055_v61 = vld [vmem:[#allocation2 + $0xf1] ss:$2 sm:$0x1f] }
 0x2e7   :  { %2458 = vst.msk [vmem:[#allocation3] sm:$0x1f] %vm2457_vm5, %v2428_v28  ;;  %v2954_v23 = vpop.permute.xlu2 %2953  ;;  %v2128_v28 = vld [vmem:[#allocation2 + $0x112] ss:$2 sm:$0x1f] }
 0x2e8   :  { %2529 = vst.msk [vmem:[#allocation3] sm:$0x1f] %vm2528_vm6, %v2499_v8 }
 0x2eb   :  { %3027 = vrot.lane.b32.xlu1 %v2998_v48, %s4690_s25  ;;  %2082 = vrot.lane.b32.xlu0 %v2053_v51, %s4686_s21 }
 0x2ed   :  { %v2604_v21 = vpop.permute.xlu1 %2603  ;;  %2222 = vrot.lane.b32.xlu2 %v2193_v44, %s4684_s2  ;;  %v2501_v17 = vpop.permute.xlu0 %2500  ;;  %v2126_v44 = vld [vmem:[#allocation2 + $0xf2] ss:$2 sm:$0x1f] }
 0x2ee   :  { %2631 = vst.msk [vmem:[#allocation3 + $0x28] sm:$0x1f] %vm2102_vm0, %v2604_v21  ;;  %v3004_v21 = vld [vmem:[#allocation2 + $0x143] ss:$2 sm:$0x1f] }
 0x2ef   :  { %2530 = vst.msk [vmem:[#allocation3 + $0x10] sm:$0x1f] %vm2528_vm6, %v2501_v17  ;;  %v2079_v3 = vpop.permute.xlu2 %2078  ;;  %v3059_v16 = vld [vmem:[#allocation3] sm:$0xff] }
 0x2f0   :  { %2106 = vst.msk [vmem:[#allocation3 + $0x30] sm:$0x1f] %vm2102_vm0, %v2079_v3  ;;  %v2268_v17 = vld [vmem:[#allocation2 + $0x100] ss:$2 sm:$0x1f] }
 0x2f3   :  { %2153 = vrot.lane.b32.xlu1 %v2124_v10, %s4685_s3  ;;  %2151 = vrot.lane.b32.xlu0 %v2122_v52, %s4685_s3 }
 0x2f5   :  { %v2676_v1 = vpop.permute.xlu1 %2675  ;;  %2295 = vrot.lane.b32.xlu2 %v2266_v26, %s4688_s23  ;;  %v2674_v25 = vpop.permute.xlu0 %2673 }
 0x2f6   :  { %2702 = vst.msk [vmem:[#allocation3 + $0x38] sm:$0x1f] %vm2173_vm1, %v2676_v1  ;;  %v3061_v31 = vld [vmem:[#allocation3 + $0x10] sm:$0xff] }
 0x2f7   :  { %2701 = vst.msk [vmem:[#allocation3 + $0x28] sm:$0x1f] %vm2173_vm1, %v2674_v25  ;;  %v3079_v7 = vpack.c.bf16 %v3061_v31, %v3059_v16  ;;  %v2148_v56 = vpop.permute.xlu2 %2147  ;;  %v2199_v16 = vld [vmem:[#allocation2 + $0x113] ss:$2 sm:$0x1f] }
 0x2f8   :  { %2771 = vst.msk [vmem:[#allocation3 + $0x28] sm:$0x1f] %vm2244_vm2, %v2744_v58  ;;  %v2197_v31 = vld [vmem:[#allocation2 + $0xf3] ss:$2 sm:$0x1f] }
 0x2f9   :  { %3225 = vmatmul.bf16.vlgmr.msrb.gmra.mxu1 %v3079_v7  ;;  %v2341_v7 = vld [vmem:[#allocation2 + $0x121] ss:$2 sm:$0x1f] }
 0x2fb   :  { %2293 = vrot.lane.b32.xlu1 %v2264_v55, %s4688_s23  ;;  %2224 = vrot.lane.b32.xlu0 %v2195_v22, %s4684_s2 }
 0x2fd   :  { %v2814_v6 = vpop.permute.xlu1 %2813  ;;  %2435 = vrot.lane.b32.xlu2 %v2406_v29, %s4689_s24  ;;  %v2746_v38 = vpop.permute.xlu0 %2745  ;;  %v2339_v29 = vld [vmem:[#allocation2 + $0x101] ss:$2 sm:$0x1f] }
 0x2fe   :  { %2841 = vst.msk [vmem:[#allocation3 + $0x28] sm:$0x1f] %vm2315_vm3, %v2814_v6  ;;  %v2270_v6 = vld [vmem:[#allocation2 + $0x120] ss:$2 sm:$0x1f] }
 0x2ff   :  { %2772 = vst.msk [vmem:[#allocation3 + $0x38] sm:$0x1f] %vm2244_vm2, %v2746_v38  ;;  %v2221_v27 = vpop.permute.xlu2 %2220  ;;  %v2481_v38 = vld [vmem:[#allocation2 + $0x103] ss:$2 sm:$0x1f] }
 0x300   :  { %2842 = vst.msk [vmem:[#allocation3 + $0x38] sm:$0x1f] %vm2315_vm3, %v2816_v34 }
 0x303   :  { %2366 = vrot.lane.b32.xlu1 %v2337_v37, %s4687_s22  ;;  %2364 = vrot.lane.b32.xlu0 %v2335_v47, %s4687_s22 }
 0x305   :  { %v2886_v41 = vpop.permute.xlu1 %2885  ;;  %2508 = vrot.lane.b32.xlu2 %v2479_v39, %s4690_s25  ;;  %v2884_v53 = vpop.permute.xlu0 %2883  ;;  %v2412_v39 = vld [vmem:[#allocation2 + $0x122] ss:$2 sm:$0x1f] }
 0x306   :  { %2912 = vst.msk [vmem:[#allocation3 + $0x38] sm:$0x1f] %vm2386_vm4, %v2886_v41  ;;  %v2410_v41 = vld [vmem:[#allocation2 + $0x102] ss:$2 sm:$0x1f] }
 0x307   :  { %2911 = vst.msk [vmem:[#allocation3 + $0x28] sm:$0x1f] %vm2386_vm4, %v2884_v53  ;;  %v2361_v54 = vpop.permute.xlu2 %2360  ;;  %v2588_v53 = vld [vmem:[#allocation2 + $0x171] ss:$2 sm:$0x1f] }
 0x308   :  { %2981 = vst.msk [vmem:[#allocation3 + $0x28] sm:$0x1f] %vm2457_vm5, %v2954_v23 }
 0x30b   :  { %2506 = vrot.lane.b32.xlu1 %v2477_v35, %s4690_s25  ;;  %2437 = vrot.lane.b32.xlu0 %v2408_v43, %s4689_s24 }
 0x30d   :  { %v2077_v24 = vpop.permute.xlu1 %2076  ;;  %2681 = vrot.lane.b32.xlu2 %v2652_v63, %s4685_s3  ;;  %v2956_v62 = vpop.permute.xlu0 %2955  ;;  %v2586_v63 = vld [vmem:[#allocation2 + $0x151] ss:$2 sm:$0x1f] }
 0x30e   :  { %2105 = vst.msk [vmem:[#allocation3 + $0x20] sm:$0x1f] %vm2102_vm0, %v2077_v24  ;;  %v2483_v24 = vld [vmem:[#allocation2 + $0x123] ss:$2 sm:$0x1f] }
 0x30f   :  { %2176 = vst.msk [vmem:[#allocation3 + $0x20] sm:$0x1f] %vm2173_vm1, %v2148_v56  ;;  %v2434_v8 = vpop.permute.xlu2 %2433 }
 0x310   :  { %2982 = vst.msk [vmem:[#allocation3 + $0x38] sm:$0x1f] %vm2457_vm5, %v2956_v62  ;;  %v2726_v62 = vld [vmem:[#allocation2 + $0x153] ss:$2 sm:$0x1f] }
 0x313   :  { %2613 = vrot.lane.b32.xlu1 %v2584_v9, %s4686_s21  ;;  %2611 = vrot.lane.b32.xlu0 %v2582_v12, %s4686_s21 }
 0x315   :  { %v3026_v45 = vpop.permute.xlu1 %3025  ;;  %2753 = vrot.lane.b32.xlu2 %v2724_v14, %s4684_s2  ;;  %v3024_v36 = vpop.permute.xlu0 %3023  ;;  %v2658_v14 = vld [vmem:[#allocation2 + $0x172] ss:$2 sm:$0x1f] }
 0x316   :  { %3052 = vst.msk [vmem:[#allocation3 + $0x38] sm:$0x1f] %vm2528_vm6, %v3026_v45  ;;  %v2656_v45 = vld [vmem:[#allocation2 + $0x152] ss:$2 sm:$0x1f] }
 0x317   :  { %3051 = vst.msk [vmem:[#allocation3 + $0x28] sm:$0x1f] %vm2528_vm6, %v3024_v36  ;;  %v2608_v40 = vpop.permute.xlu2 %2607  ;;  %v2798_v36 = vld [vmem:[#allocation2 + $0x180] ss:$2 sm:$0x1f] }
 0x318   :  { %2633 = vst.msk [vmem:[#allocation3 + $0x48] sm:$0x1f] %vm2102_vm0, %v2608_v40 }
 0x31b   :  { %2751 = vrot.lane.b32.xlu1 %v2722_v42, %s4684_s2  ;;  %2683 = vrot.lane.b32.xlu0 %v2654_v33, %s4685_s3 }
 0x31d   :  { %v2219_v49 = vpop.permute.xlu1 %2218  ;;  %v3066_v5 = vld [vmem:[#allocation3 + $0x38] sm:$0xff]  ;;  %2891 = vrot.lane.b32.xlu2 %v2862_v0, %s4687_s22  ;;  %v2150_v46 = vpop.permute.xlu0 %2149 }
 0x31e   :  { %2247 = vst.msk [vmem:[#allocation3 + $0x20] sm:$0x1f] %vm2244_vm2, %v2219_v49  ;;  %v3064_v50 = vld [vmem:[#allocation3 + $0x28] sm:$0xff] }
 0x31f   :  { %2177 = vst.msk [vmem:[#allocation3 + $0x30] sm:$0x1f] %vm2173_vm1, %v2150_v46  ;;  %v3082_v4 = vpack.c.bf16 %v3066_v5, %v3064_v50  ;;  %v2680_v59 = vpop.permute.xlu2 %2679  ;;  %v2796_v46 = vld [vmem:[#allocation2 + $0x160] ss:$2 sm:$0x1f] }
 0x320   :  { %2248 = vst.msk [vmem:[#allocation3 + $0x30] sm:$0x1f] %vm2244_vm2, %v2221_v27  ;;  %v2728_v50 = vld [vmem:[#allocation2 + $0x173] ss:$2 sm:$0x1f] }
 0x321   :  { %3264 = vmatmul.bf16.gmra.mxu2 %v3082_v4  ;;  %v2936_v4 = vld [vmem:[#allocation2 + $0x162] ss:$2 sm:$0x1f] }
 0x323   :  { %2823 = vrot.lane.b32.xlu1 %v2794_v19, %s4688_s23  ;;  %2821 = vrot.lane.b32.xlu0 %v2792_v11, %s4688_s23 }
 0x325   :  { %v2292_v58 = vpop.permute.xlu1 %2291  ;;  %2963 = vrot.lane.b32.xlu2 %v2934_v57, %s4689_s24  ;;  %v2290_v20 = vpop.permute.xlu0 %2289  ;;  %v2868_v57 = vld [vmem:[#allocation2 + $0x181] ss:$2 sm:$0x1f] }
 0x326   :  { %2319 = vst.msk [vmem:[#allocation3 + $0x30] sm:$0x1f] %vm2315_vm3, %v2292_v58  ;;  %v2866_v58 = vld [vmem:[#allocation2 + $0x161] ss:$2 sm:$0x1f] }
 0x327   :  { %2318 = vst.msk [vmem:[#allocation3 + $0x20] sm:$0x1f] %vm2315_vm3, %v2290_v20  ;;  %v2818_v18 = vpop.permute.xlu2 %2817  ;;  %v2061_v20 = vld [vmem:[#allocation2 + $0x151] ss:$2 sm:$0x1f] }
 0x328   :  { %2389 = vst.msk [vmem:[#allocation3 + $0x20] sm:$0x1f] %vm2386_vm4, %v2361_v54 }
 0x32b   :  { %2961 = vrot.lane.b32.xlu1 %v2932_v13, %s4689_s24  ;;  %2893 = vrot.lane.b32.xlu0 %v2864_v2, %s4687_s22 }
 0x32d   :  { %v2432_v34 = vpop.permute.xlu1 %2431  ;;  %3031 = vrot.lane.b32.xlu2 %v3002_v30, %s4690_s25  ;;  %v2363_v32 = vpop.permute.xlu0 %2362  ;;  %v2059_v30 = vld [vmem:[#allocation2 + $0x131] ss:$2 sm:$0x1f] }
 0x32e   :  { %2460 = vst.msk [vmem:[#allocation3 + $0x20] sm:$0x1f] %vm2457_vm5, %v2432_v34  ;;  %v2938_v34 = vld [vmem:[#allocation2 + $0x182] ss:$2 sm:$0x1f] }
 0x32f   :  { %2390 = vst.msk [vmem:[#allocation3 + $0x30] sm:$0x1f] %vm2386_vm4, %v2363_v32  ;;  %v2890_v15 = vpop.permute.xlu2 %2889  ;;  %v2130_v32 = vld [vmem:[#allocation2 + $0x132] ss:$2 sm:$0x1f] }
 0x330   :  { %2461 = vst.msk [vmem:[#allocation3 + $0x30] sm:$0x1f] %vm2457_vm5, %v2434_v8 }
 0x333   :  { %2086 = vrot.lane.b32.xlu1 %v2057_v60, %s4686_s21  ;;  %2084 = vrot.lane.b32.xlu0 %v2055_v61, %s4686_s21 }
 0x335   :  { %v2505_v23 = vpop.permute.xlu1 %2504  ;;  %2157 = vrot.lane.b32.xlu2 %v2128_v28, %s4685_s3  ;;  %v2503_v48 = vpop.permute.xlu0 %2502  ;;  %v3008_v28 = vld [vmem:[#allocation2 + $0x183] ss:$2 sm:$0x1f] }
 0x336   :  { %2532 = vst.msk [vmem:[#allocation3 + $0x30] sm:$0x1f] %vm2528_vm6, %v2505_v23  ;;  %v3006_v23 = vld [vmem:[#allocation2 + $0x163] ss:$2 sm:$0x1f] }
 0x337   :  { %2531 = vst.msk [vmem:[#allocation3 + $0x20] sm:$0x1f] %vm2528_vm6, %v2503_v48  ;;  %v2081_v51 = vpop.permute.xlu2 %2080  ;;  %v2203_v48 = vld [vmem:[#allocation2 + $0x153] ss:$2 sm:$0x1f] }
 0x338   :  { %2107 = vst.msk [vmem:[#allocation3 + $0x40] sm:$0x1f] %vm2102_vm0, %v2081_v51 }
 0x33b   :  { %2155 = vrot.lane.b32.xlu1 %v2126_v44, %s4685_s3  ;;  %3033 = vrot.lane.b32.xlu0 %v3004_v21, %s4690_s25 }
 0x33d   :  { %v2678_v3 = vpop.permute.xlu1 %2677  ;;  %v3065_v10 = vld [vmem:[#allocation3 + $0x30] sm:$0xff]  ;;  %2297 = vrot.lane.b32.xlu2 %v2268_v17, %s4688_s23  ;;  %v2610_v52 = vpop.permute.xlu0 %2609 }
 0x33e   :  { %2703 = vst.msk [vmem:[#allocation3 + $0x48] sm:$0x1f] %vm2173_vm1, %v2678_v3  ;;  %v3063_v26 = vld [vmem:[#allocation3 + $0x20] sm:$0xff] }
 0x33f   :  { %2634 = vst.msk [vmem:[#allocation3 + $0x58] sm:$0x1f] %vm2102_vm0, %v2610_v52  ;;  %v3081_v1 = vpack.c.bf16 %v3065_v10, %v3063_v26  ;;  %v3030_v25 = vpop.permute.xlu2 %3029  ;;  %v2201_v52 = vld [vmem:[#allocation2 + $0x133] ss:$2 sm:$0x1f] }
 0x340   :  { %2704 = vst.msk [vmem:[#allocation3 + $0x58] sm:$0x1f] %vm2173_vm1, %v2680_v59  ;;  %v2132_v26 = vld [vmem:[#allocation2 + $0x152] ss:$2 sm:$0x1f] }
 0x341   :  { %3230 = vmatmul.bf16.gmra.mxu1 %v3081_v1  ;;  %v2343_v1 = vld [vmem:[#allocation2 + $0x141] ss:$2 sm:$0x1f] }
 0x343   :  { %2228 = vrot.lane.b32.xlu1 %v2199_v16, %s4684_s2  ;;  %2226 = vrot.lane.b32.xlu0 %v2197_v31, %s4684_s2 }
 0x345   :  { %v2750_v56 = vpop.permute.xlu1 %2749  ;;  %2370 = vrot.lane.b32.xlu2 %v2341_v7, %s4687_s22  ;;  %v2748_v55 = vpop.permute.xlu0 %2747  ;;  %v2274_v7 = vld [vmem:[#allocation2 + $0x160] ss:$2 sm:$0x1f] }
 0x346   :  { %2774 = vst.msk [vmem:[#allocation3 + $0x58] sm:$0x1f] %vm2244_vm2, %v2750_v56  ;;  %v2272_v56 = vld [vmem:[#allocation2 + $0x140] ss:$2 sm:$0x1f] }
 0x347   :  { %2773 = vst.msk [vmem:[#allocation3 + $0x48] sm:$0x1f] %vm2244_vm2, %v2748_v55  ;;  %v2223_v22 = vpop.permute.xlu2 %2222  ;;  %v2416_v55 = vld [vmem:[#allocation2 + $0x162] ss:$2 sm:$0x1f] }
 0x348   :  { %2843 = vst.msk [vmem:[#allocation3 + $0x48] sm:$0x1f] %vm2315_vm3, %v2818_v18 }
 0x34b   :  { %2368 = vrot.lane.b32.xlu1 %v2339_v29, %s4687_s22  ;;  %2299 = vrot.lane.b32.xlu0 %v2270_v6, %s4688_s23 }
 0x34d   :  { %v2888_v27 = vpop.permute.xlu1 %2887  ;;  %2510 = vrot.lane.b32.xlu2 %v2481_v38, %s4690_s25  ;;  %v2820_v37 = vpop.permute.xlu0 %2819  ;;  %v2414_v38 = vld [vmem:[#allocation2 + $0x142] ss:$2 sm:$0x1f] }
 0x34e   :  { %2913 = vst.msk [vmem:[#allocation3 + $0x48] sm:$0x1f] %vm2386_vm4, %v2888_v27  ;;  %v2345_v27 = vld [vmem:[#allocation2 + $0x161] ss:$2 sm:$0x1f] }
 0x34f   :  { %2844 = vst.msk [vmem:[#allocation3 + $0x58] sm:$0x1f] %vm2315_vm3, %v2820_v37  ;;  %v2296_v47 = vpop.permute.xlu2 %2295 }
 0x350   :  { %2914 = vst.msk [vmem:[#allocation3 + $0x58] sm:$0x1f] %vm2386_vm4, %v2890_v15 }
 0x353   :  { %2441 = vrot.lane.b32.xlu1 %v2412_v39, %s4689_s24  ;;  %2439 = vrot.lane.b32.xlu0 %v2410_v41, %s4689_s24  ;;  %v2487_v41 = vld [vmem:[#allocation2 + $0x163] ss:$2 sm:$0x1f] }
 0x355   :  { %v2960_v54 = vpop.permute.xlu1 %2959  ;;  %2617 = vrot.lane.b32.xlu2 %v2588_v53, %s4686_s21  ;;  %v2958_v35 = vpop.permute.xlu0 %2957  ;;  %v2485_v53 = vld [vmem:[#allocation2 + $0x143] ss:$2 sm:$0x1f] }
 0x356   :  { %2984 = vst.msk [vmem:[#allocation3 + $0x58] sm:$0x1f] %vm2457_vm5, %v2960_v54 }
 0x357   :  { %3054 = vst.msk [vmem:[#allocation3 + $0x58] sm:$0x1f] %vm2528_vm6, %v3030_v25  ;;  %v2436_v43 = vpop.permute.xlu2 %2435 }
 0x358   :  { %2983 = vst.msk [vmem:[#allocation3 + $0x48] sm:$0x1f] %vm2457_vm5, %v2958_v35 }
 0x35b   :  { %2615 = vrot.lane.b32.xlu1 %v2586_v63, %s4686_s21  ;;  %2512 = vrot.lane.b32.xlu0 %v2483_v24, %s4690_s25 }
 0x35d   :  { %v3028_v8 = vpop.permute.xlu1 %3027  ;;  %2755 = vrot.lane.b32.xlu2 %v2726_v62, %s4684_s2  ;;  %v2083_v9 = vpop.permute.xlu0 %2082 }
 0x35e   :  { %3053 = vst.msk [vmem:[#allocation3 + $0x48] sm:$0x1f] %vm2528_vm6, %v3028_v8  ;;  %v3070_v33 = vld [vmem:[#allocation3 + $0x58] sm:$0xff] }
 0x35f   :  { %2108 = vst.msk [vmem:[#allocation3 + $0x50] sm:$0x1f] %vm2102_vm0, %v2083_v9  ;;  %v2509_v12 = vpop.permute.xlu2 %2508 }
 0x363   :  { %2687 = vrot.lane.b32.xlu1 %v2658_v14, %s4685_s3  ;;  %2685 = vrot.lane.b32.xlu0 %v2656_v45, %s4685_s3 }
 0x365   :  { %v2154_v40 = vpop.permute.xlu1 %2153  ;;  %v3068_v42 = vld [vmem:[#allocation3 + $0x48] sm:$0xff]  ;;  %2827 = vrot.lane.b32.xlu2 %v2798_v36, %s4688_s23  ;;  %v2152_v0 = vpop.permute.xlu0 %2151 }
 0x366   :  { %2179 = vst.msk [vmem:[#allocation3 + $0x50] sm:$0x1f] %vm2173_vm1, %v2154_v40  ;;  %v3084_v49 = vpack.c.bf16 %v3070_v33, %v3068_v42 }
 0x367   :  { %2178 = vst.msk [vmem:[#allocation3 + $0x40] sm:$0x1f] %vm2173_vm1, %v2152_v0  ;;  %v2682_v5 = vpop.permute.xlu2 %2681 }
 0x368   :  { %2249 = vst.msk [vmem:[#allocation3 + $0x40] sm:$0x1f] %vm2244_vm2, %v2223_v22  ;;  %3269 = vmatmul.bf16.gmra.mxu2 %v3084_v49 }
 0x36b   :  { %2825 = vrot.lane.b32.xlu1 %v2796_v46, %s4688_s23  ;;  %2757 = vrot.lane.b32.xlu0 %v2728_v50, %s4684_s2 }
 0x36d   :  { %v2294_v59 = vpop.permute.xlu1 %2293  ;;  %2965 = vrot.lane.b32.xlu2 %v2936_v4, %s4689_s24  ;;  %v2225_v19 = vpop.permute.xlu0 %2224 }
 0x36e   :  { %2320 = vst.msk [vmem:[#allocation3 + $0x40] sm:$0x1f] %vm2315_vm3, %v2294_v59 }
 0x36f   :  { %2250 = vst.msk [vmem:[#allocation3 + $0x50] sm:$0x1f] %vm2244_vm2, %v2225_v19  ;;  %v2754_v11 = vpop.permute.xlu2 %2753 }
 0x370   :  { %2321 = vst.msk [vmem:[#allocation3 + $0x50] sm:$0x1f] %vm2315_vm3, %v2296_v47 }
 0x373   :  { %2897 = vrot.lane.b32.xlu1 %v2868_v57, %s4687_s22  ;;  %2895 = vrot.lane.b32.xlu0 %v2866_v58, %s4687_s22 }
 0x375   :  { %v2367_v18 = vpop.permute.xlu1 %2366  ;;  %2090 = vrot.lane.b32.xlu2 %v2061_v20, %s4686_s21  ;;  %v2365_v13 = vpop.permute.xlu0 %2364 }
 0x376   :  { %2392 = vst.msk [vmem:[#allocation3 + $0x50] sm:$0x1f] %vm2386_vm4, %v2367_v18 }
 0x377   :  { %2391 = vst.msk [vmem:[#allocation3 + $0x40] sm:$0x1f] %vm2386_vm4, %v2365_v13  ;;  %v2892_v2 = vpop.permute.xlu2 %2891 }
 0x378   :  { %2462 = vst.msk [vmem:[#allocation3 + $0x40] sm:$0x1f] %vm2457_vm5, %v2436_v43 }
 0x37b   :  { %2088 = vrot.lane.b32.xlu1 %v2059_v30, %s4686_s21  ;;  %2967 = vrot.lane.b32.xlu0 %v2938_v34, %s4689_s24 }
 0x37d   :  { %v2507_v15 = vpop.permute.xlu1 %2506  ;;  %2159 = vrot.lane.b32.xlu2 %v2130_v32, %s4685_s3  ;;  %v2438_v60 = vpop.permute.xlu0 %2437 }
 0x37e   :  { %2533 = vst.msk [vmem:[#allocation3 + $0x40] sm:$0x1f] %vm2528_vm6, %v2507_v15 }
 0x37f   :  { %2463 = vst.msk [vmem:[#allocation3 + $0x50] sm:$0x1f] %vm2457_vm5, %v2438_v60  ;;  %v2964_v61 = vpop.permute.xlu2 %2963 }
 0x380   :  { %2534 = vst.msk [vmem:[#allocation3 + $0x50] sm:$0x1f] %vm2528_vm6, %v2509_v12 }
 0x383   :  { %3037 = vrot.lane.b32.xlu1 %v3008_v28, %s4690_s25  ;;  %3035 = vrot.lane.b32.xlu0 %v3006_v23, %s4690_s25 }
 0x385   :  { %v2614_v51 = vpop.permute.xlu1 %2613  ;;  %v3067_v44 = vld [vmem:[#allocation3 + $0x40] sm:$0xff]  ;;  %2232 = vrot.lane.b32.xlu2 %v2203_v48, %s4684_s2  ;;  %v2612_v21 = vpop.permute.xlu0 %2611 }
 0x386   :  { %2636 = vst.msk [vmem:[#allocation3 + $0x78] sm:$0x1f] %vm2102_vm0, %v2614_v51 }
 0x387   :  { %2635 = vst.msk [vmem:[#allocation3 + $0x68] sm:$0x1f] %vm2102_vm0, %v2612_v21  ;;  %v3069_v17 = vld [vmem:[#allocation3 + $0x50] sm:$0xff]  ;;  %v3032_v3 = vpop.permute.xlu2 %3031 }
 0x388   :  { %2705 = vst.msk [vmem:[#allocation3 + $0x68] sm:$0x1f] %vm2173_vm1, %v2682_v5  ;;  %v3083_v10 = vpack.c.bf16 %v3069_v17, %v3067_v44 }
 0x38a   :  { %3235 = vmatmul.bf16.gmra.mxu1 %v3083_v10 }
 0x38b   :  { %2230 = vrot.lane.b32.xlu1 %v2201_v52, %s4684_s2  ;;  %2161 = vrot.lane.b32.xlu0 %v2132_v26, %s4685_s3 }
 0x38d   :  { %v2752_v25 = vpop.permute.xlu1 %2751  ;;  %2372 = vrot.lane.b32.xlu2 %v2343_v1, %s4687_s22  ;;  %v2684_v16 = vpop.permute.xlu0 %2683 }
 0x38e   :  { %2775 = vst.msk [vmem:[#allocation3 + $0x68] sm:$0x1f] %vm2244_vm2, %v2752_v25 }
 0x38f   :  { %2706 = vst.msk [vmem:[#allocation3 + $0x78] sm:$0x1f] %vm2173_vm1, %v2684_v16  ;;  %v2158_v31 = vpop.permute.xlu2 %2157 }
 0x390   :  { %2776 = vst.msk [vmem:[#allocation3 + $0x78] sm:$0x1f] %vm2244_vm2, %v2754_v11 }
 0x393   :  { %2303 = vrot.lane.b32.xlu1 %v2274_v7, %s4688_s23  ;;  %2301 = vrot.lane.b32.xlu0 %v2272_v56, %s4688_s23  ;;  %v3260_v56 = vpop.f32.mrf.mxu2 }
 0x395   :  { %v2824_v22 = vpop.permute.xlu1 %2823  ;;  %2445 = vrot.lane.b32.xlu2 %v2416_v55, %s4689_s24  ;;  %v2822_v29 = vpop.permute.xlu0 %2821 }
 0x396   :  { %2846 = vst.msk [vmem:[#allocation3 + $0x78] sm:$0x1f] %vm2315_vm3, %v2824_v22  ;;  %v3226_v55 = vpop.f32.mrf.mxu1 }
 0x397   :  { %2845 = vst.msk [vmem:[#allocation3 + $0x68] sm:$0x1f] %vm2315_vm3, %v2822_v29  ;;  %v2298_v6 = vpop.permute.xlu2 %2297 }
 0x398   :  { %2915 = vst.msk [vmem:[#allocation3 + $0x68] sm:$0x1f] %vm2386_vm4, %v2892_v2 }
 0x39b   :  { %2443 = vrot.lane.b32.xlu1 %v2414_v38, %s4689_s24  ;;  %2374 = vrot.lane.b32.xlu0 %v2345_v27, %s4687_s22  ;;  %v3262_v22 = vpop.f32.mrf.mxu2 }
 0x39d   :  { %v2962_v37 = vpop.permute.xlu1 %2961  ;;  %v2894_v47 = vpop.permute.xlu0 %2893 }
 0x39e   :  { %2985 = vst.msk [vmem:[#allocation3 + $0x68] sm:$0x1f] %vm2457_vm5, %v2962_v37  ;;  %v3228_v29 = vpop.f32.mrf.mxu1 }
 0x39f   :  { %3055 = vst.msk [vmem:[#allocation3 + $0x68] sm:$0x1f] %vm2528_vm6, %v3032_v3  ;;  %v2371_v39 = vpop.permute.xlu2 %2370 }
 0x3a0   :  { %2916 = vst.msk [vmem:[#allocation3 + $0x78] sm:$0x1f] %vm2386_vm4, %v2894_v47 }
 0x3a1   :  { %2986 = vst.msk [vmem:[#allocation3 + $0x78] sm:$0x1f] %vm2457_vm5, %v2964_v61 }
 0x3a3   :  { %2516 = vrot.lane.b32.xlu1 %v2487_v41, %s4690_s25  ;;  %2514 = vrot.lane.b32.xlu0 %v2485_v53, %s4690_s25 }
 0x3a5   :  { %v2087_v54 = vpop.permute.xlu1 %2086  ;;  %v2085_v35 = vpop.permute.xlu0 %2084 }
 0x3a6   :  { %2110 = vst.msk [vmem:[#allocation3 + $0x70] sm:$0x1f] %vm2102_vm0, %v2087_v54  ;;  %v3072_v12 = vld [vmem:[#allocation3 + $0x68] sm:$0xff] }
 0x3a7   :  { %2181 = vst.msk [vmem:[#allocation3 + $0x70] sm:$0x1f] %vm2173_vm1, %v2158_v31  ;;  %v2511_v43 = vpop.permute.xlu2 %2510 }
 0x3a8   :  { %2109 = vst.msk [vmem:[#allocation3 + $0x60] sm:$0x1f] %vm2102_vm0, %v2085_v35  ;;  %v6691_v35 = vld [vmem:[#allocation10_spill] sm:$0xff] }
 0x3ad   :  { %v2156_v63 = vpop.permute.xlu1 %2155  ;;  %v3034_v24 = vpop.permute.xlu0 %3033 }
 0x3ae   :  { %2180 = vst.msk [vmem:[#allocation3 + $0x60] sm:$0x1f] %vm2173_vm1, %v2156_v63 }
 0x3af   :  { %3056 = vst.msk [vmem:[#allocation3 + $0x78] sm:$0x1f] %vm2528_vm6, %v3034_v24  ;;  %v2618_v62 = vpop.permute.xlu2 %2617  ;;  %v6692_v24 = vld [vmem:[#allocation11_spill] sm:$0xff] }
 0x3b0   :  { %2638 = vst.msk [vmem:[#allocation3 + $0x98] sm:$0x1f] %vm2102_vm0, %v2618_v62  ;;  %v3298_v62 = vand.u32 7, %v6692_v24 }
 0x3b2   :  { %vm6144_vm7 = vcmp.lt.s32.totalorder %v3298_v62, 5 }
 0x3b5   :  { %v2229_v8 = vpop.permute.xlu1 %2228  ;;  %v2227_v9 = vpop.permute.xlu0 %2226 }
 0x3b6   :  { %2252 = vst.msk [vmem:[#allocation3 + $0x70] sm:$0x1f] %vm2244_vm2, %v2229_v8  ;;  %v3074_v14 = vld [vmem:[#allocation3 + $0x78] sm:$0xff]  ;;  %v3291_v8 = vand.u32 7, %v6691_v35 }
 0x3b7   :  { %2251 = vst.msk [vmem:[#allocation3 + $0x60] sm:$0x1f] %vm2244_vm2, %v2227_v9  ;;  %v3086_v45 = vpack.c.bf16 %v3074_v14, %v3072_v12  ;;  %v2756_v36 = vpop.permute.xlu2 %2755  ;;  %v476_v12 = vadd.s32 32, %v6691_v35  ;;  %v6142_v14 = vadd.f32 %v3262_v22, %v3228_v29 }
 0x3b8   :  { %2322 = vst.msk [vmem:[#allocation3 + $0x60] sm:$0x1f] %vm2315_vm3, %v2298_v6  ;;  %v3265_v6 = vpop.f32.mrf.mxu2  ;;  %vm6153_vm8 = vcmp.lt.s32.totalorder %v3291_v8, 5 }
 0x3b9   :  { %3274 = vmatmul.bf16.gmra.mxu2 %v3086_v45 }
 0x3bd   :  { %v2369_v40 = vpop.permute.xlu1 %2368  ;;  %v2300_v42 = vpop.permute.xlu0 %2299 }
 0x3be   :  { %2393 = vst.msk [vmem:[#allocation3 + $0x60] sm:$0x1f] %vm2386_vm4, %v2369_v40  ;;  %v3231_v38 = vpop.f32.mrf.mxu1 }
 0x3bf   :  { %2323 = vst.msk [vmem:[#allocation3 + $0x70] sm:$0x1f] %vm2315_vm3, %v2300_v42  ;;  %v2828_v33 = vpop.permute.xlu2 %2827  ;;  %v6149_v42 = vadd.f32 %v3260_v56, %v3226_v55 }
 0x3c0   :  { %2394 = vst.msk [vmem:[#allocation3 + $0x70] sm:$0x1f] %vm2386_vm4, %v2371_v39  ;;  %v3267_v27 = vpop.f32.mrf.mxu2 }
 0x3c5   :  { %v2442_v0 = vpop.permute.xlu1 %2441  ;;  %v2440_v49 = vpop.permute.xlu0 %2439 }
 0x3c6   :  { %2465 = vst.msk [vmem:[#allocation3 + $0x70] sm:$0x1f] %vm2457_vm5, %v2442_v0  ;;  %v3233_v37 = vpop.f32.mrf.mxu1 }
 0x3c7   :  { %2464 = vst.msk [vmem:[#allocation3 + $0x60] sm:$0x1f] %vm2457_vm5, %v2440_v49  ;;  %v2966_v5 = vpop.permute.xlu2 %2965 }
 0x3c8   :  { %2535 = vst.msk [vmem:[#allocation3 + $0x60] sm:$0x1f] %vm2528_vm6, %v2511_v43  ;;  %v474_v43 = vadd.s32 16, %v6691_v35 }
 0x3ca   :  { %v3305_v9 = vand.u32 7, %v474_v43 }
 0x3cc   :  { %vm6157_vm9 = vcmp.lt.s32.totalorder %v3305_v9, 5 }
 0x3cd   :  { %v2616_v46 = vpop.permute.xlu1 %2615  ;;  %v2513_v50 = vpop.permute.xlu0 %2512 }
 0x3ce   :  { %2637 = vst.msk [vmem:[#allocation3 + $0x88] sm:$0x1f] %vm2102_vm0, %v2616_v46 }
 0x3cf   :  { %2536 = vst.msk [vmem:[#allocation3 + $0x70] sm:$0x1f] %vm2528_vm6, %v2513_v50  ;;  %v2091_v4 = vpop.permute.xlu2 %2090  ;;  %v3071_v11 = vld [vmem:[#allocation3 + $0x60] sm:$0xff]  ;;  %v478_v50 = vadd.s32 48, %v6691_v35 }
 0x3d0   :  { %2112 = vst.msk [vmem:[#allocation3 + $0x90] sm:$0x1f] %vm2102_vm0, %v2091_v4  ;;  %v3438_v4 = vsel %vm6144_vm7, %v6142_v14, 0.0 }
 0x3d5   :  { %v2688_v59 = vpop.permute.xlu1 %2687  ;;  %v2686_v19 = vpop.permute.xlu0 %2685 }
 0x3d6   :  { %2708 = vst.msk [vmem:[#allocation3 + $0x98] sm:$0x1f] %vm2173_vm1, %v2688_v59  ;;  %v3073_v57 = vld [vmem:[#allocation3 + $0x70] sm:$0xff]  ;;  %v6165_v59 = vadd.f32 %v3267_v27, %v3233_v37 }
 0x3d7   :  { %2707 = vst.msk [vmem:[#allocation3 + $0x88] sm:$0x1f] %vm2173_vm1, %v2686_v19  ;;  %v3085_v58 = vpack.c.bf16 %v3073_v57, %v3071_v11  ;;  %v2160_v34 = vpop.permute.xlu2 %2159  ;;  %v6702_v11 = vld [vmem:[#allocation13_spill] sm:$0xff] }
 0x3d8   :  { %2777 = vst.msk [vmem:[#allocation3 + $0x88] sm:$0x1f] %vm2244_vm2, %v2756_v36  ;;  %v6695_v36 = vld [vmem:[#allocation12_spill] sm:$0xff]  ;;  %v3326_v57 = vand.u32 7, %v6702_v11 }
 0x3d9   :  { %3240 = vmatmul.bf16.gmra.mxu1 %v3085_v58  ;;  %v3312_v40 = vand.u32 7, %v6695_v36 }
 0x3da   :  { %vm6193_vm13 = vcmp.lt.s32.totalorder %v3326_v57, 5 }
 0x3db   :  { %vm6167_vm10 = vcmp.lt.s32.totalorder %v3312_v40, 5 }
 0x3dd   :  { %v2826_v20 = vpop.permute.xlu1 %2825  ;;  %v2758_v18 = vpop.permute.xlu0 %2757 }
 0x3de   :  { %2847 = vst.msk [vmem:[#allocation3 + $0x88] sm:$0x1f] %vm2315_vm3, %v2826_v20  ;;  %v3437_v20 = vsel %vm6153_vm8, %v6149_v42, 0.0 }
 0x3df   :  { %2778 = vst.msk [vmem:[#allocation3 + $0x98] sm:$0x1f] %vm2244_vm2, %v2758_v18  ;;  %v2233_v61 = vpop.permute.xlu2 %2232 }
 0x3e0   :  { %2848 = vst.msk [vmem:[#allocation3 + $0x98] sm:$0x1f] %vm2315_vm3, %v2828_v33  ;;  %v6151_v33 = vadd.f32 %v3265_v6, %v3231_v38 }
 0x3e2   :  { %v3439_v18 = vsel %vm6157_vm9, %v6151_v33, 0.0 }
 0x3e5   :  { %v2898_v13 = vpop.permute.xlu1 %2897  ;;  %v2896_v2 = vpop.permute.xlu0 %2895 }
 0x3e6   :  { %2918 = vst.msk [vmem:[#allocation3 + $0x98] sm:$0x1f] %vm2386_vm4, %v2898_v13 }
 0x3e7   :  { %2917 = vst.msk [vmem:[#allocation3 + $0x88] sm:$0x1f] %vm2386_vm4, %v2896_v2  ;;  %v2373_v21 = vpop.permute.xlu2 %2372  ;;  %v3449_v2 = vsel %vm3447_vm11, %v3438_v4, 0.0 }
 0x3e8   :  { %2987 = vst.msk [vmem:[#allocation3 + $0x88] sm:$0x1f] %vm2457_vm5, %v2966_v5  ;;  %v3319_v5 = vand.u32 7, %v476_v12 }
 0x3ea   :  { %vm6181_vm12 = vcmp.lt.s32.totalorder %v3319_v5, 5 }
 0x3eb   :  { %v3270_v47 = vpop.f32.mrf.mxu2 }
 0x3ed   :  { %v2089_v30 = vpop.permute.xlu1 %2088  ;;  %v2968_v32 = vpop.permute.xlu0 %2967 }
 0x3ee   :  { %2111 = vst.msk [vmem:[#allocation3 + $0x80] sm:$0x1f] %vm2102_vm0, %v2089_v30 }
 0x3ef   :  { %2182 = vst.msk [vmem:[#allocation3 + $0x80] sm:$0x1f] %vm2173_vm1, %v2160_v34  ;;  %v2446_v26 = vpop.permute.xlu2 %2445  ;;  %v3333_v34 = vand.u32 7, %v478_v50 }
 0x3f0   :  { %2988 = vst.msk [vmem:[#allocation3 + $0x98] sm:$0x1f] %vm2457_vm5, %v2968_v32  ;;  %v480_v32 = vadd.s32 64, %v6691_v35 }
 0x3f1   :  { %vm6204_vm14 = vcmp.lt.s32.totalorder %v3333_v34, 5 }
 0x3f3   :  { %v3272_v41 = vpop.f32.mrf.mxu2 }
 0x3f5   :  { %v3038_v15 = vpop.permute.xlu1 %3037  ;;  %v3036_v60 = vpop.permute.xlu0 %3035 }
 0x3f6   :  { %3058 = vst.msk [vmem:[#allocation3 + $0x98] sm:$0x1f] %vm2528_vm6, %v3038_v15  ;;  %v3440_v15 = vsel %vm6167_vm10, %v6165_v59, 0.0 }
 0x3f7   :  { %3057 = vst.msk [vmem:[#allocation3 + $0x88] sm:$0x1f] %vm2528_vm6, %v3036_v60 }
 0x3fd   :  { %v2231_v28 = vpop.permute.xlu1 %2230  ;;  %v3078_v23 = vld [vmem:[#allocation3 + $0x98] sm:$0xff]  ;;  %v2162_v48 = vpop.permute.xlu0 %2161 }
 0x3fe   :  { %2253 = vst.msk [vmem:[#allocation3 + $0x80] sm:$0x1f] %vm2244_vm2, %v2231_v28  ;;  %v3076_v51 = vld [vmem:[#allocation3 + $0x88] sm:$0xff]  ;;  %v3451_v28 = vsel %vm3447_vm11, %v3439_v18, 0.0 }
 0x3ff   :  { %2183 = vst.msk [vmem:[#allocation3 + $0x90] sm:$0x1f] %vm2173_vm1, %v2162_v48  ;;  %v3088_v44 = vpack.c.bf16 %v3078_v23, %v3076_v51  ;;  %v6707_v48 = vld [vmem:[#allocation14_spill] sm:$0xff] }
 0x400   :  { %2254 = vst.msk [vmem:[#allocation3 + $0x90] sm:$0x1f] %vm2244_vm2, %v2233_v61  ;;  %v3448_v61 = vsel %vm3447_vm11, %v3437_v20, 0.0  ;;  %v3340_v51 = vand.u32 7, %v6707_v48 }
 0x401   :  { %3279 = vmatmul.bf16.gmra.mxu2 %v3088_v44  ;;  %v3450_v44 = vadd.f32 %v3449_v2, %v3448_v61 }
 0x402   :  { %vm6214_vm15 = vcmp.lt.s32.totalorder %v3340_v51, 5 }
 0x405   :  { %v2304_v17 = vpop.permute.xlu1 %2303  ;;  %v2302_v3 = vpop.permute.xlu0 %2301 }
 0x406   :  { %2325 = vst.msk [vmem:[#allocation3 + $0x90] sm:$0x1f] %vm2315_vm3, %v2304_v17 }
 0x407   :  { %2324 = vst.msk [vmem:[#allocation3 + $0x80] sm:$0x1f] %vm2315_vm3, %v2302_v3  ;;  %v3236_v39 = vpop.f32.mrf.mxu1  ;;  %v3453_v3 = vsel %vm3447_vm11, %v3440_v15, 0.0 }
 0x408   :  { %2395 = vst.msk [vmem:[#allocation3 + $0x80] sm:$0x1f] %vm2386_vm4, %v2373_v21  ;;  %v6178_v13 = vadd.f32 %v3270_v47, %v3236_v39  ;;  %v6714_v39 = vld [vmem:[#allocation15_spill] sm:$0xff] }
 0x40a   :  { %v3441_v21 = vsel %vm6181_vm12, %v6178_v13, 0.0 }
 0x40d   :  { %v2444_v10 = vpop.permute.xlu1 %2443  ;;  %v2375_v52 = vpop.permute.xlu0 %2374 }
 0x40e   :  { %2466 = vst.msk [vmem:[#allocation3 + $0x80] sm:$0x1f] %vm2457_vm5, %v2444_v10 }
 0x40f   :  { %2396 = vst.msk [vmem:[#allocation3 + $0x90] sm:$0x1f] %vm2386_vm4, %v2375_v52  ;;  %v3238_v53 = vpop.f32.mrf.mxu1 }
 0x410   :  { %2467 = vst.msk [vmem:[#allocation3 + $0x90] sm:$0x1f] %vm2457_vm5, %v2446_v26  ;;  %v6189_v60 = vadd.f32 %v3272_v41, %v3238_v53  ;;  %v3347_v26 = vand.u32 7, %v480_v32  ;;  %v3354_v41 = vand.u32 7, %v6714_v39  ;;  %vm3603_vm5 = vcmask 253952  }
 0x412   :  { %vm6224_vm0 = vcmp.lt.s32.totalorder %v3347_v26, 5  ;;  %vm6238_vm1 = vcmp.lt.s32.totalorder %v3354_v41, 5 }
 0x415   :  { %v2517_v1 = vpop.permute.xlu1 %2516  ;;  %v2515_v25 = vpop.permute.xlu0 %2514 }
 0x416   :  { %2538 = vst.msk [vmem:[#allocation3 + $0x90] sm:$0x1f] %vm2528_vm6, %v2517_v1  ;;  %v3452_v1 = vadd.f32 %v3451_v28, %v3450_v44 }
 0x417   :  { %2537 = vst.msk [vmem:[#allocation3 + $0x80] sm:$0x1f] %vm2528_vm6, %v2515_v25  ;;  %v3442_v25 = vsel %vm6193_vm13, %v6189_v60, 0.0  ;;  %vm3618_vm6 = vcmask 516352  }
 0x418   :  { %v3454_v55 = vadd.f32 %v3453_v3, %v3452_v1  ;;  %v3457_v6 = vsel %vm3447_vm11, %v3442_v25, 0.0 }
 0x41d   :  { %v3077_v16 = vld [vmem:[#allocation3 + $0x90] sm:$0xff] }
 0x41e   :  { %v3075_v31 = vld [vmem:[#allocation3 + $0x80] sm:$0xff] }
 0x41f   :  { %v3087_v7 = vpack.c.bf16 %v3077_v16, %v3075_v31  ;;  %v3455_v31 = vsel %vm3447_vm11, %v3441_v21, 0.0 }
 0x420   :  { %v3456_v27 = vadd.f32 %v3455_v31, %v3454_v55 }
 0x421   :  { %3245 = vmatmul.bf16.gmra.mxu1 %v3087_v7 }
 0x422   :  { %v3458_v53 = vadd.f32 %v3457_v6, %v3456_v27 }
 0x43c   :  { %v3275_v54 = vpop.f32.mrf.mxu2 }
 0x444   :  { %v3277_v46 = vpop.f32.mrf.mxu2 }
 0x456   :  { %v3241_v63 = vpop.f32.mrf.mxu1 }
 0x457   :  { %v6201_v17 = vadd.f32 %v3275_v54, %v3241_v63 }
 0x459   :  { %v3443_v22 = vsel %vm6204_vm14, %v6201_v17, 0.0 }
 0x45a   :  { %v3459_v47 = vsel %vm3447_vm11, %v3443_v22, 0.0 }
 0x45b   :  { %v3460_v43 = vadd.f32 %v3459_v47, %v3458_v53 }
 0x45e   :  { %v3243_v58 = vpop.f32.mrf.mxu1 }
 0x45f   :  { %v6211_v16 = vadd.f32 %v3277_v46, %v3243_v58 }
 0x461   :  { %v3444_v37 = vsel %vm6214_vm15, %v6211_v16, 0.0 }
 0x462   :  { %v3461_v35 = vsel %vm3447_vm11, %v3444_v37, 0.0 }
 0x463   :  { %v3462_v9 = vadd.f32 %v3461_v35, %v3460_v43 }
 0x484   :  { %v3280_v52 = vpop.f32.mrf.mxu2 }
 0x48c   :  { %v3282_v63 = vpop.f32.mrf.mxu2 }
 0x49e   :  { %v3246_v56 = vpop.f32.mrf.mxu1 }
 0x49f   :  { %v6221_v29 = vadd.f32 %v3280_v52, %v3246_v56 }
 0x4a1   :  { %v3445_v54 = vsel %vm6224_vm0, %v6221_v29, 0.0 }
 0x4a2   :  { %v3463_v24 = vsel %vm3447_vm11, %v3445_v54, 0.0 }
 0x4a3   :  { %v3464_v36 = vadd.f32 %v3463_v24, %v3462_v9 }
 0x4a6   :  { %v3248_v62 = vpop.f32.mrf.mxu1 }
 0x4a7   :  { %v3283_v12 = vadd.f32 %v3282_v63, %v3248_v62 }
 0x4a9   :  { %v3446_v40 = vsel %vm6238_vm1, %v3283_v12, 0.0 }
 0x4aa   :  { %v3465_v5 = vsel %vm3447_vm11, %v3446_v40, 0.0 }
 0x4ab   :  { %v3466_v46 = vadd.f32 %v3465_v5, %v3464_v36 }
 0x4ad   :  { %v3467_v50 = vrot.slane %v3466_v46, 4 }
 0x4af   :  { %v3468_v4 = vadd.f32 %v3467_v50, %v3466_v46 }
 0x4b1   :  { %v3469_v11 = vrot.slane %v3468_v4, 2 }
 0x4b3   :  { %v3470_v57 = vadd.f32 %v3469_v11, %v3468_v4 }
 0x4b5   :  { %v3471_v58 = vrot.slane %v3470_v57, 1 }
 0x4b7   :  { %v3472_v20 = vadd.f32 %v3471_v58, %v3470_v57 }
 0x4b9   :  { %v6245_v18 = vmul.f32 0.02, %v3472_v20 }
 0x4bb   :  { %v3474_v2 = vsub.f32 %v6149_v42, %v6245_v18  ;;  %v3475_v34 = vsub.f32 %v6142_v14, %v6245_v18  ;;  %v3476_v32 = vsub.f32 %v6151_v33, %v6245_v18  ;;  %v3477_v15 = vsub.f32 %v6165_v59, %v6245_v18 }
 0x4bc   :  { %v3478_v61 = vsub.f32 %v6178_v13, %v6245_v18  ;;  %v3479_v44 = vsub.f32 %v6189_v60, %v6245_v18  ;;  %v3480_v13 = vsub.f32 %v6201_v17, %v6245_v18  ;;  %v3481_v25 = vsub.f32 %v6211_v16, %v6245_v18 }
 0x4bd   :  { %v3484_v28 = vsel %vm6153_vm8, %v3474_v2, 0.0  ;;  %v3485_v48 = vsel %vm6144_vm7, %v3475_v34, 0.0  ;;  %v3486_v51 = vsel %vm6157_vm9, %v3476_v32, 0.0  ;;  %v3487_v21 = vsel %vm6167_vm10, %v3477_v15, 0.0 }
 0x4be   :  { %v3494_v3 = vmul.f32 %v3484_v28, %v3484_v28  ;;  %v3495_v52 = vmul.f32 %v3485_v48, %v3485_v48  ;;  %v3496_v26 = vmul.f32 %v3486_v51, %v3486_v51  ;;  %v3488_v0 = vsel %vm6181_vm12, %v3478_v61, 0.0  ;;  %v3285_v51 = vld [vmem:[%s6485_s5] sm:$0x1] }
 0x4bf   :  { %v3497_v45 = vmul.f32 %v3487_v21, %v3487_v21  ;;  %v3489_v19 = vsel %vm6193_vm13, %v3479_v44, 0.0  ;;  %v3498_v56 = vmul.f32 %v3488_v0, %v3488_v0  ;;  %v3482_v22 = vsub.f32 %v6221_v29, %v6245_v18 }
 0x4c0   :  { %v3504_v1 = vsel %vm3447_vm11, %v3494_v3, 0.0  ;;  %v3505_v49 = vsel %vm3447_vm11, %v3495_v52, 0.0  ;;  %v3507_v55 = vsel %vm3447_vm11, %v3496_v26, 0.0  ;;  %v3490_v30 = vsel %vm6204_vm14, %v3480_v13, 0.0  ;;  %v3286_v52 = vld [vmem:[%s6486_s6] sm:$0x1] }
 0x4c1   :  { %v3506_v31 = vadd.f32 %v3505_v49, %v3504_v1  ;;  %v3499_v27 = vmul.f32 %v3489_v19, %v3489_v19  ;;  %v3509_v37 = vsel %vm3447_vm11, %v3497_v45, 0.0  ;;  %v3483_v47 = vsub.f32 %v3283_v12, %v6245_v18 }
 0x4c2   :  { %v3491_v23 = vsel %vm6214_vm15, %v3481_v25, 0.0  ;;  %v3500_v41 = vmul.f32 %v3490_v30, %v3490_v30  ;;  %v3511_v53 = vsel %vm3447_vm11, %v3498_v56, 0.0  ;;  %v3492_v54 = vsel %vm6224_vm0, %v3482_v22, 0.0 }
 0x4c3   :  { %v3508_v6 = vadd.f32 %v3507_v55, %v3506_v31  ;;  %v3501_v43 = vmul.f32 %v3491_v23, %v3491_v23  ;;  %v3513_v10 = vsel %vm3447_vm11, %v3499_v27, 0.0  ;;  %v3493_v63 = vsel %vm6238_vm1, %v3483_v47, 0.0 }
 0x4c4   :  { %v3502_v62 = vmul.f32 %v3492_v54, %v3492_v54  ;;  %v3515_v9 = vsel %vm3447_vm11, %v3500_v41, 0.0  ;;  %v3503_v12 = vmul.f32 %v3493_v63, %v3493_v63  ;;  %vm3633_vm7 = vcmask 778752  }
 0x4c5   :  { %v3510_v39 = vadd.f32 %v3509_v37, %v3508_v6  ;;  %v3517_v36 = vsel %vm3447_vm11, %v3501_v43, 0.0  ;;  %vm3648_vm8 = vcmask 1041152  }
 0x4c6   :  { %v3519_v5 = vsel %vm3447_vm11, %v3502_v62, 0.0  ;;  %v3521_v46 = vsel %vm3447_vm11, %v3503_v12, 0.0 }
 0x4c7   :  { %v3512_v35 = vadd.f32 %v3511_v53, %v3510_v39 }
 0x4c9   :  { %v3514_v24 = vadd.f32 %v3513_v10, %v3512_v35 }
 0x4cb   :  { %v3516_v7 = vadd.f32 %v3515_v9, %v3514_v24 }
 0x4cd   :  { %v3518_v40 = vadd.f32 %v3517_v36, %v3516_v7 }
 0x4cf   :  { %v3520_v38 = vadd.f32 %v3519_v5, %v3518_v40 }
 0x4d1   :  { %v3522_v50 = vadd.f32 %v3521_v46, %v3520_v38 }
 0x4d3   :  { %v3523_v4 = vrot.slane %v3522_v50, 4 }
 0x4d5   :  { %v3524_v11 = vadd.f32 %v3523_v4, %v3522_v50 }
 0x4d7   :  { %v3525_v57 = vrot.slane %v3524_v11, 2 }
 0x4d9   :  { %v3526_v8 = vadd.f32 %v3525_v57, %v3524_v11 }
 0x4db   :  { %v3527_v58 = vrot.slane %v3526_v8, 1 }
 0x4dd   :  { %v3528_v20 = vadd.f32 %v3527_v58, %v3526_v8  ;;  %v4641_v58 = vld [vmem:[%s6487_s7 + $0x28] sm:$0xff] }
 0x4df   :  { %v3529_v2 = vmul.f32 0.02, %v3528_v20 }
 0x4e1   :  { %v3530_v34 = vadd.f32 1e-05, %v3529_v2 }
 0x4e3   :  { %4682 = vrsqrt.f32 %v3530_v34  ;;  %vm3537_vm3 = vweird.f32 %v3530_v34 }
 0x4e9   :  { %v4683_v32 = vpop.eup %4682 }
 0x4ea   :  { %v3532_v15 = vmul.f32 %v4683_v32, %v3530_v34  ;;  %vm3538_vm2 = vweird.f32 %v4683_v32 }
 0x4eb   :  { %vm3539_vm4 = vmor %vm3537_vm3, %vm3538_vm2 }
 0x4ec   :  { %v3533_v61 = vmul.f32 %v4683_v32, %v3532_v15 }
 0x4ee   :  { %v3534_v28 = vmul.f32 0.5, %v3533_v61 }
 0x4f0   :  { %v3535_v48 = vsub.f32 1.5, %v3534_v28 }
 0x4f2   :  { %v3536_v44 = vmul.f32 %v4683_v32, %v3535_v48 }
 0x4f4   :  { %v3540_v21 = vsel %vm3539_vm4, %v4683_v32, %v3536_v44  ;;  %v4640_v32 = vld [vmem:[%s6487_s7 + $0x20] sm:$0xff] }
 0x4f5   :  { %v3541_v3 = vmul.f32 %v3540_v21, %v3285_v51 }
 0x4f7   :  { %v3542_v26 = vmul.f32 %v3541_v3, %v6245_v18  ;;  %v3545_v13 = vperm.slane %v3541_v3, 0 }
 0x4f9   :  { %v3543_v0 = vsub.f32 %v3286_v52, %v3542_v26  ;;  %v3552_v1 = vmul.f32 %v3545_v13, %v6189_v60  ;;  %v3547_v49 = vmul.f32 %v3545_v13, %v6149_v42  ;;  %v3553_v25 = vmul.f32 %v3545_v13, %v6201_v17 }
 0x4fa   :  { %v3548_v55 = vmul.f32 %v3545_v13, %v6142_v14  ;;  %v3554_v42 = vmul.f32 %v3545_v13, %v6211_v16  ;;  %v3549_v54 = vmul.f32 %v3545_v13, %v6151_v33  ;;  %v4643_v33 = vld [vmem:[%s6487_s7 + $0x38] sm:$0xff]  ;;  %v3555_v9 = vmul.f32 %v3545_v13, %v6221_v29 }
 0x4fb   :  { %v3558_v45 = vperm.slane %v3543_v0, 0  ;;  %4067 = vmatpush.bf16.msrb.mxu3 %v4643_v33  ;;  %v3550_v46 = vmul.f32 %v3545_v13, %v6165_v59  ;;  %v4642_v59 = vld [vmem:[%s6487_s7 + $0x30] sm:$0xff]  ;;  %v4639_v13 = vld [vmem:[%s6487_s7 + $0x18] sm:$0xff] }
 0x4fc   :  { %v4638_v0 = vld [vmem:[%s6487_s7 + $0x10] sm:$0xff] }
 0x4fd   :  { %v3565_v19 = vadd.f32 %v3558_v45, %v3552_v1  ;;  %v3560_v31 = vadd.f32 %v3558_v45, %v3547_v49  ;;  %v3566_v56 = vadd.f32 %v3558_v45, %v3553_v25  ;;  %v3561_v27 = vadd.f32 %v3558_v45, %v3548_v55  ;;  %v4667_v1 = vld [vmem:[%s6487_s7 + $0xf8] sm:$0xff]  ;;  %v4636_v25 = vld [vmem:[%s6487_s7] sm:$0xff]  ;;  %v4649_v55 = vld [vmem:[%s6487_s7 + $0x68] sm:$0xff] }
 0x4fe   :  { %v3567_v14 = vadd.f32 %v3558_v45, %v3554_v42  ;;  %v3562_v43 = vadd.f32 %v3558_v45, %v3549_v54  ;;  %v3568_v7 = vadd.f32 %v3558_v45, %v3555_v9  ;;  %v3563_v50 = vadd.f32 %v3558_v45, %v3550_v46  ;;  %v4637_v45 = vld [vmem:[%s6487_s7 + $0x8] sm:$0xff]  ;;  %4109 = vmatpush.bf16.msra.mxu1 %v4667_v1 }
 0x4ff   :  { %v3575_v22 = vmul.f32 0.2, %v3565_v19  ;;  %v3570_v30 = vmul.f32 0.2, %v3560_v31  ;;  %v3576_v6 = vmul.f32 0.2, %v3566_v56  ;;  %4068 = vmatpush.bf16.msrb.mxu3 %v4642_v59 }
 0x500   :  { %v3571_v47 = vmul.f32 0.2, %v3561_v27  ;;  %v3577_v60 = vmul.f32 0.2, %v3567_v14  ;;  %v3572_v16 = vmul.f32 0.2, %v3562_v43 }
 0x501   :  { %v3585_v37 = vmax.f32 %v3565_v19, %v3575_v22  ;;  %v3580_v18 = vmax.f32 %v3560_v31, %v3570_v30  ;;  %v3586_v23 = vmax.f32 %v3566_v56, %v3576_v6  ;;  %v3578_v12 = vmul.f32 0.2, %v3568_v7  ;;  %v4651_v19 = vld [vmem:[%s6487_s7 + $0x78] sm:$0xff]  ;;  %v4650_v31 = vld [vmem:[%s6487_s7 + $0x70] sm:$0xff]  ;;  %v4648_v30 = vld [vmem:[%s6487_s7 + $0x60] sm:$0xff] }
 0x502   :  { %v3581_v39 = vmax.f32 %v3561_v27, %v3571_v47  ;;  %v3587_v35 = vmax.f32 %v3567_v14, %v3577_v60  ;;  %v3582_v63 = vmax.f32 %v3562_v43, %v3572_v16  ;;  %v3573_v4 = vmul.f32 0.2, %v3563_v50  ;;  %v4666_v56 = vld [vmem:[%s6487_s7 + $0xf0] sm:$0xff]  ;;  %v4665_v6 = vld [vmem:[%s6487_s7 + $0xe8] sm:$0xff]  ;;  %v4647_v27 = vld [vmem:[%s6487_s7 + $0x58] sm:$0xff] }
 0x503   :  { %3595 = vst.msk [vmem:[#allocation4 + $0x28] sm:$0xff] %vm3447_vm11, %v3585_v37  ;;  %v3588_v40 = vmax.f32 %v3568_v7, %v3578_v12  ;;  %4069 = vmatpush.bf16.msrb.mxu3 %v4641_v58  ;;  %4110 = vmatpush.bf16.msra.mxu1 %v4666_v56  ;;  %v4646_v47 = vld [vmem:[%s6487_s7 + $0x50] sm:$0xff]  ;;  %v4661_v9 = vld [vmem:[%s6487_s7 + $0xc8] sm:$0xff]  ;;  %v4656_v59 = vld [vmem:[%s6487_s7 + $0xa0] sm:$0xff] }
 0x504   :  { %3590 = vst.msk [vmem:[#allocation4] sm:$0xff] %vm3447_vm11, %v3580_v18  ;;  %v3583_v29 = vmax.f32 %v3563_v50, %v3573_v4  ;;  %v4658_v50 = vld [vmem:[%s6487_s7 + $0xb0] sm:$0xff] }
 0x505   :  { %3596 = vst.msk [vmem:[#allocation4 + $0x30] sm:$0xff] %vm3447_vm11, %v3586_v23 }
 0x506   :  { %3591 = vst.msk [vmem:[#allocation4 + $0x8] sm:$0xff] %vm3447_vm11, %v3581_v39  ;;  %v4645_v39 = vld [vmem:[%s6487_s7 + $0x48] sm:$0xff] }
 0x507   :  { %3597 = vst.msk [vmem:[#allocation4 + $0x38] sm:$0xff] %vm3447_vm11, %v3587_v35  ;;  %4070 = vmatpush.bf16.msrb.mxu3 %v4640_v32  ;;  %4111 = vmatpush.bf16.msra.mxu1 %v4665_v6  ;;  %v4663_v35 = vld [vmem:[%s6487_s7 + $0xd8] sm:$0xff] }
 0x508   :  { %3592 = vst.msk [vmem:[#allocation4 + $0x10] sm:$0xff] %vm3447_vm11, %v3582_v63  ;;  %v4662_v63 = vld [vmem:[%s6487_s7 + $0xd0] sm:$0xff]  ;;  %v4655_v32 = vld [vmem:[%s6487_s7 + $0x98] sm:$0xff] }
 0x509   :  { %3598 = vst.msk [vmem:[#allocation4 + $0x40] sm:$0xff] %vm3447_vm11, %v3588_v40 }
 0x50a   :  { %v3609_v17 = vld [vmem:[#allocation4 + $0x29] ss:$2 sm:$0x1]  ;;  %v3639_v24 = vld [vmem:[#allocation4 + $0x2b] ss:$2 sm:$0x1] }
 0x50b   :  { %3614 = vrot.lane.b32.xlu0 %v3609_v17, %s4685_s3  ;;  %v3622_v41 = vld [vmem:[#allocation4 + $0x2] ss:$2 sm:$0x1]  ;;  %v3607_v53 = vld [vmem:[#allocation4 + $0x1] ss:$2 sm:$0x1]  ;;  %4071 = vmatpush.bf16.msrb.mxu3 %v4639_v13 }
 0x50c   :  { %3627 = vrot.lane.b32.xlu1 %v3622_v41, %s4688_s23  ;;  %3612 = vrot.lane.b32.xlu2 %v3607_v53, %s4685_s3  ;;  %v3637_v10 = vld [vmem:[#allocation4 + $0x3] ss:$2 sm:$0x1]  ;;  %v3624_v62 = vld [vmem:[#allocation4 + $0x2a] ss:$2 sm:$0x1] }
 0x50d   :  { %v3660_v36 = vld [vmem:[#allocation4 + $0x31] ss:$2 sm:$0x1]  ;;  %v3672_v5 = vld [vmem:[#allocation4 + $0xa] ss:$2 sm:$0x1] }
 0x50e   :  { %v3658_v38 = vld [vmem:[#allocation4 + $0x9] ss:$2 sm:$0x1]  ;;  %v3686_v11 = vld [vmem:[#allocation4 + $0xb] ss:$2 sm:$0x1] }
 0x50f   :  { %v3688_v57 = vld [vmem:[#allocation4 + $0x33] ss:$2 sm:$0x1]  ;;  %v3674_v8 = vld [vmem:[#allocation4 + $0x32] ss:$2 sm:$0x1]  ;;  %4072 = vmatpush.bf16.msrb.mxu3 %v4638_v0 }
 0x510   :  { %3593 = vst.msk [vmem:[#allocation4 + $0x18] sm:$0xff] %vm3447_vm11, %v3583_v29  ;;  %v3708_v20 = vld [vmem:[#allocation4 + $0x39] ss:$2 sm:$0x1]  ;;  %v4664_v41 = vld [vmem:[%s6487_s7 + $0xe0] sm:$0xff] }
 0x511   :  { %v3720_v2 = vld [vmem:[#allocation4 + $0x12] ss:$2 sm:$0x1]  ;;  %v3706_v34 = vld [vmem:[#allocation4 + $0x11] ss:$2 sm:$0x1]  ;;  %4112 = vmatpush.bf16.msra.mxu1 %v4664_v41 }
 0x512   :  { %v3734_v15 = vld [vmem:[#allocation4 + $0x13] ss:$2 sm:$0x1]  ;;  %v3736_v61 = vld [vmem:[#allocation4 + $0x3b] ss:$2 sm:$0x1] }
 0x513   :  { %3642 = vrot.lane.b32.xlu0 %v3637_v10, %s4689_s24  ;;  %v3722_v28 = vld [vmem:[#allocation4 + $0x3a] ss:$2 sm:$0x1]  ;;  %v3756_v48 = vld [vmem:[#allocation4 + $0x41] ss:$2 sm:$0x1]  ;;  %4073 = vmatpush.bf16.msrb.mxu3 %v4637_v45 }
 0x514   :  { %3644 = vrot.lane.b32.xlu1 %v3639_v24, %s4689_s24  ;;  %3629 = vrot.lane.b32.xlu2 %v3624_v62, %s4688_s23  ;;  %v3784_v3 = vld [vmem:[#allocation4 + $0x43] ss:$2 sm:$0x1]  ;;  %v3770_v52 = vld [vmem:[#allocation4 + $0x42] ss:$2 sm:$0x1] }
 0x515   :  { %v3600_v26 = vld [vmem:[#allocation4] ss:$2 sm:$0x1]  ;;  %v3652_v49 = vld [vmem:[#allocation4 + $0x8] ss:$2 sm:$0x1]  ;;  %4113 = vmatpush.bf16.msra.mxu1 %v4663_v35 }
 0x516   :  { %3604 = vst.msk [vmem:[#allocation5] sm:$0x1] %vm3603_vm5, %v3600_v26  ;;  %v3602_v22 = vld [vmem:[#allocation4 + $0x28] ss:$2 sm:$0x1]  ;;  %v4644_v53 = vld [vmem:[%s6487_s7 + $0x40] sm:$0xff] }
 0x517   :  { %v3768_v51 = vld [vmem:[#allocation4 + $0x1a] ss:$2 sm:$0x1]  ;;  %v3754_v44 = vld [vmem:[#allocation4 + $0x19] ss:$2 sm:$0x1]  ;;  %4074 = vmatpush.bf16.msrb.mxu3 %v4636_v25 }
 0x518   :  { %v3782_v21 = vld [vmem:[#allocation4 + $0x1b] ss:$2 sm:$0x1]  ;;  %3655 = vst.msk [vmem:[#allocation5 + $0x8] sm:$0x1] %vm3603_vm5, %v3652_v49 }
 0x519   :  { %3605 = vst.msk [vmem:[#allocation5 + $0x20] sm:$0x1] %vm3603_vm5, %v3602_v22  ;;  %v3700_v18 = vld [vmem:[#allocation4 + $0x10] ss:$2 sm:$0x1]  ;;  %4114 = vmatpush.bf16.msra.mxu1 %v4662_v63 }
 0x51a   :  { %3703 = vst.msk [vmem:[#allocation5 + $0x10] sm:$0x1] %vm3603_vm5, %v3700_v18  ;;  %v3654_v23 = vld [vmem:[#allocation4 + $0x30] ss:$2 sm:$0x1] }
 0x51b   :  { %3665 = vrot.lane.b32.xlu0 %v3660_v36, %s4685_s3  ;;  %4081 = vmatpush.bf16.msra.mxu3 %v4651_v19  ;;  %3656 = vst.msk [vmem:[#allocation5 + $0x28] sm:$0x1] %vm3603_vm5, %v3654_v23  ;;  %v3748_v42 = vld [vmem:[#allocation4 + $0x18] ss:$2 sm:$0x1] }
 0x51c   :  { %3677 = vrot.lane.b32.xlu1 %v3672_v5, %s4688_s23  ;;  %3663 = vrot.lane.b32.xlu2 %v3658_v38, %s4685_s3  ;;  %v3702_v14 = vld [vmem:[#allocation4 + $0x38] ss:$2 sm:$0x1]  ;;  %3751 = vst.msk [vmem:[#allocation5 + $0x18] sm:$0x1] %vm3603_vm5, %v3748_v42 }
 0x51d   :  { %v3750_v17 = vld [vmem:[#allocation4 + $0x40] ss:$2 sm:$0x1]  ;;  %3704 = vst.msk [vmem:[#allocation5 + $0x30] sm:$0x1] %vm3603_vm5, %v3702_v14  ;;  %4115 = vmatpush.bf16.msra.mxu1 %v4661_v9  ;;  %v4659_v38 = vld [vmem:[%s6487_s7 + $0xb8] sm:$0xff] }
 0x51e   :  { %3752 = vst.msk [vmem:[#allocation5 + $0x38] sm:$0x1] %vm3603_vm5, %v3750_v17 }
 0x51f   :  { %4082 = vmatpush.bf16.msra.mxu3 %v4650_v31 }
 0x523   :  { %3691 = vrot.lane.b32.xlu0 %v3686_v11, %s4689_s24  ;;  %4083 = vmatpush.bf16.msra.mxu3 %v4649_v55 }
 0x524   :  { %3693 = vrot.lane.b32.xlu1 %v3688_v57, %s4689_s24  ;;  %3679 = vrot.lane.b32.xlu2 %v3674_v8, %s4688_s23  ;;  %v4657_v57 = vld [vmem:[%s6487_s7 + $0xa8] sm:$0xff]  ;;  %v4660_v8 = vld [vmem:[%s6487_s7 + $0xc0] sm:$0xff] }
 0x525   :  { %4116 = vmatpush.bf16.msra.mxu1 %v4660_v8 }
 0x527   :  { %4084 = vmatpush.bf16.msra.mxu3 %v4648_v30  ;;  %v4679_v30 = vld [vmem:[%s6488_s8] ss:$0 sm:$0xff] }
 0x52b   :  { %3713 = vrot.lane.b32.xlu0 %v3708_v20, %s4685_s3  ;;  %4085 = vmatpush.bf16.msra.mxu3 %v4647_v27 }
 0x52c   :  { %3725 = vrot.lane.b32.xlu1 %v3720_v2, %s4688_s23  ;;  %3711 = vrot.lane.b32.xlu2 %v3706_v34, %s4685_s3 }
 0x52f   :  { %4086 = vmatpush.bf16.msra.mxu3 %v4646_v47 }
 0x533   :  { %3739 = vrot.lane.b32.xlu0 %v3734_v15, %s4689_s24  ;;  %4087 = vmatpush.bf16.msra.mxu3 %v4645_v39 }
 0x534   :  { %3741 = vrot.lane.b32.xlu1 %v3736_v61, %s4689_s24  ;;  %3727 = vrot.lane.b32.xlu2 %v3722_v28, %s4688_s23  ;;  %v4654_v61 = vld [vmem:[%s6487_s7 + $0x90] sm:$0xff] }
 0x537   :  { %4088 = vmatpush.bf16.msra.mxu3 %v4644_v53 }
 0x53b   :  { %3761 = vrot.lane.b32.xlu0 %v3756_v48, %s4685_s3 }
 0x53c   :  { %3773 = vrot.lane.b32.xlu1 %v3768_v51, %s4688_s23  ;;  %3759 = vrot.lane.b32.xlu2 %v3754_v44, %s4685_s3  ;;  %v4653_v51 = vld [vmem:[%s6487_s7 + $0x88] sm:$0xff]  ;;  %v4652_v44 = vld [vmem:[%s6487_s7 + $0x80] sm:$0xff] }
 0x543   :  { %3787 = vrot.lane.b32.xlu0 %v3782_v21, %s4689_s24 }
 0x544   :  { %3789 = vrot.lane.b32.xlu1 %v3784_v3, %s4689_s24  ;;  %3775 = vrot.lane.b32.xlu2 %v3770_v52, %s4688_s23 }
 0x566   :  { %v3613_v37 = vpop.permute.xlu2 %3612 }
 0x567   :  { %3619 = vst.msk [vmem:[#allocation5] sm:$0x1] %vm3618_vm6, %v3613_v37 }
 0x56e   :  { %v3630_v60 = vpop.permute.xlu2 %3629 }
 0x576   :  { %v3664_v54 = vpop.permute.xlu2 %3663 }
 0x577   :  { %3669 = vst.msk [vmem:[#allocation5 + $0x8] sm:$0x1] %vm3618_vm6, %v3664_v54 }
 0x57d   :  { %v3615_v43 = vpop.permute.xlu0 %3614 }
 0x57e   :  { %3620 = vst.msk [vmem:[#allocation5 + $0x20] sm:$0x1] %vm3618_vm6, %v3615_v43  ;;  %v3628_v16 = vpop.permute.xlu1 %3627  ;;  %v3680_v10 = vpop.permute.xlu2 %3679 }
 0x57f   :  { %3634 = vst.msk [vmem:[#allocation5] sm:$0x1] %vm3633_vm7, %v3628_v16 }
 0x580   :  { %3635 = vst.msk [vmem:[#allocation5 + $0x20] sm:$0x1] %vm3633_vm7, %v3630_v60 }
 0x585   :  { %v3643_v24 = vpop.permute.xlu0 %3642 }
 0x586   :  { %3649 = vst.msk [vmem:[#allocation5] sm:$0x1] %vm3648_vm8, %v3643_v24  ;;  %v3645_v62 = vpop.permute.xlu1 %3644  ;;  %v3712_v33 = vpop.permute.xlu2 %3711 }
 0x587   :  { %3650 = vst.msk [vmem:[#allocation5 + $0x20] sm:$0x1] %vm3648_vm8, %v3645_v62 }
 0x588   :  { %3717 = vst.msk [vmem:[#allocation5 + $0x10] sm:$0x1] %vm3618_vm6, %v3712_v33 }
 0x58d   :  { %v3666_v7 = vpop.permute.xlu0 %3665  ;;  %v3795_v12 = vld [vmem:[#allocation5] sm:$0xff] }
 0x58e   :  { %3670 = vst.msk [vmem:[#allocation5 + $0x28] sm:$0x1] %vm3618_vm6, %v3666_v7  ;;  %v3678_v36 = vpop.permute.xlu1 %3677  ;;  %v3728_v40 = vpop.permute.xlu2 %3727  ;;  %v3799_v5 = vld [vmem:[#allocation5 + $0x20] sm:$0xff] }
 0x58f   :  { %3684 = vst.msk [vmem:[#allocation5 + $0x28] sm:$0x1] %vm3633_vm7, %v3680_v10  ;;  %v3803_v46 = vpack.c.bf16 %v3799_v5, %v3795_v12 }
 0x590   :  { %3683 = vst.msk [vmem:[#allocation5 + $0x8] sm:$0x1] %vm3633_vm7, %v3678_v36 }
 0x591   :  { %4075 = vmatmul.bf16.vlgmr.msrb.gmra.mxu3 %v3803_v46 }
 0x592   :  { %4095 = vmatpush.bf16.msrb.mxu3 %v4659_v38 }
 0x595   :  { %v3692_v4 = vpop.permute.xlu0 %3691 }
 0x596   :  { %3697 = vst.msk [vmem:[#allocation5 + $0x8] sm:$0x1] %vm3648_vm8, %v3692_v4  ;;  %v3694_v29 = vpop.permute.xlu1 %3693  ;;  %v3760_v11 = vpop.permute.xlu2 %3759  ;;  %4096 = vmatpush.bf16.msrb.mxu3 %v4658_v50 }
 0x597   :  { %3698 = vst.msk [vmem:[#allocation5 + $0x28] sm:$0x1] %vm3648_vm8, %v3694_v29 }
 0x598   :  { %3765 = vst.msk [vmem:[#allocation5 + $0x18] sm:$0x1] %vm3618_vm6, %v3760_v11 }
 0x59a   :  { %4097 = vmatpush.bf16.msrb.mxu3 %v4657_v57 }
 0x59d   :  { %v3714_v58 = vpop.permute.xlu0 %3713  ;;  %v3796_v20 = vld [vmem:[#allocation5 + $0x8] sm:$0xff] }
 0x59e   :  { %3718 = vst.msk [vmem:[#allocation5 + $0x30] sm:$0x1] %vm3618_vm6, %v3714_v58  ;;  %v3726_v2 = vpop.permute.xlu1 %3725  ;;  %4098 = vmatpush.bf16.msrb.mxu3 %v4656_v59  ;;  %v3800_v34 = vld [vmem:[#allocation5 + $0x28] sm:$0xff]  ;;  %v3776_v52 = vpop.permute.xlu2 %3775 }
 0x59f   :  { %3732 = vst.msk [vmem:[#allocation5 + $0x30] sm:$0x1] %vm3633_vm7, %v3728_v40  ;;  %v3804_v15 = vpack.c.bf16 %v3800_v34, %v3796_v20 }
 0x5a0   :  { %3731 = vst.msk [vmem:[#allocation5 + $0x10] sm:$0x1] %vm3633_vm7, %v3726_v2 }
 0x5a1   :  { %4089 = vmatmul.bf16.vlgmr.msra.gmra.mxu3 %v3804_v15 }
 0x5a2   :  { %4099 = vmatpush.bf16.msrb.mxu3 %v4655_v32 }
 0x5a5   :  { %v3740_v28 = vpop.permute.xlu0 %3739 }
 0x5a6   :  { %3745 = vst.msk [vmem:[#allocation5 + $0x10] sm:$0x1] %vm3648_vm8, %v3740_v28  ;;  %v3742_v48 = vpop.permute.xlu1 %3741  ;;  %4100 = vmatpush.bf16.msrb.mxu3 %v4654_v61 }
 0x5a7   :  { %3746 = vst.msk [vmem:[#allocation5 + $0x30] sm:$0x1] %vm3648_vm8, %v3742_v48 }
 0x5aa   :  { %4101 = vmatpush.bf16.msrb.mxu3 %v4653_v51 }
 0x5ad   :  { %v3762_v21 = vpop.permute.xlu0 %3761  ;;  %v3797_v3 = vld [vmem:[#allocation5 + $0x10] sm:$0xff] }
 0x5ae   :  { %3766 = vst.msk [vmem:[#allocation5 + $0x38] sm:$0x1] %vm3618_vm6, %v3762_v21  ;;  %v3774_v26 = vpop.permute.xlu1 %3773  ;;  %4102 = vmatpush.bf16.msrb.mxu3 %v4652_v44  ;;  %v3801_v13 = vld [vmem:[#allocation5 + $0x30] sm:$0xff] }
 0x5af   :  { %3780 = vst.msk [vmem:[#allocation5 + $0x38] sm:$0x1] %vm3633_vm7, %v3776_v52  ;;  %v3805_v0 = vpack.c.bf16 %v3801_v13, %v3797_v3 }
 0x5b0   :  { %3779 = vst.msk [vmem:[#allocation5 + $0x18] sm:$0x1] %vm3633_vm7, %v3774_v26 }
 0x5b1   :  { %4103 = vmatmul.bf16.vlgmr.msrb.gmra.mxu3 %v3805_v0 }
 0x5b5   :  { %v3788_v45 = vpop.permute.xlu0 %3787 }
 0x5b6   :  { %3793 = vst.msk [vmem:[#allocation5 + $0x18] sm:$0x1] %vm3648_vm8, %v3788_v45  ;;  %v3790_v1 = vpop.permute.xlu1 %3789 }
 0x5b7   :  { %3794 = vst.msk [vmem:[#allocation5 + $0x38] sm:$0x1] %vm3648_vm8, %v3790_v1 }
 0x5bd   :  { %v3798_v49 = vld [vmem:[#allocation5 + $0x18] sm:$0xff] }
 0x5be   :  { %v3802_v25 = vld [vmem:[#allocation5 + $0x38] sm:$0xff] }
 0x5bf   :  { %v3806_v19 = vpack.c.bf16 %v3802_v25, %v3798_v49 }
 0x5c1   :  { %4117 = vmatmul.bf16.vlgmr.msra.gmra.mxu1 %v3806_v19 }
 0x614   :  { %v4076_v31 = vpop.f32.mrf.mxu3 }
 0x615   :  { %v4077_v27 = vadd.f32 %v4679_v30, %v4076_v31 }
 0x61c   :  { %v4078_v56 = vpop.f32.mrf.mxu3 }
 0x61d   :  { %v4079_v39 = vadd.f32 %v4679_v30, %v4078_v56 }
 0x624   :  { %v4090_v55 = vpop.f32.mrf.mxu3 }
 0x625   :  { %v4091_v37 = vadd.f32 %v4090_v55, %v4077_v27 }
 0x62c   :  { %v4092_v22 = vpop.f32.mrf.mxu3 }
 0x62d   :  { %v4093_v14 = vadd.f32 %v4092_v22, %v4079_v39 }
 0x634   :  { %v4104_v6 = vpop.f32.mrf.mxu3 }
 0x635   :  { %v4105_v18 = vadd.f32 %v4104_v6, %v4091_v37 }
 0x63c   :  { %v4106_v42 = vpop.f32.mrf.mxu3 }
 0x63d   :  { %v4107_v60 = vadd.f32 %v4106_v42, %v4093_v14 }
 0x63e   :  { %v4118_v47 = vpop.f32.mrf.mxu1 }
 0x63f   :  { %v4119_v23 = vadd.f32 %v4118_v47, %v4105_v18 }
 0x641   :  { %4123 = vst [vmem:[%s6489_s9] sm:$0xff] %v4119_v23 }
 0x646   :  { %v4120_v17 = vpop.f32.mrf.mxu1 }
 0x647   :  { %v4121_v41 = vadd.f32 %v4120_v17, %v4107_v60 }
 0x649   :  { %4124 = vst [vmem:[%s6489_s9 + $0x8] sm:$0xff] %v4121_v41 }

</bundles_post_ra>
